<compile_context>
chip_gen: v7x
topology: tpu7x:2x2x1
jax: 0.10.0
libtpu: 0.0.40
codegen_flags: <defaults>
</compile_context>

<pallas_src>
import functools
import numpy as np

import jax
import jax.numpy as jnp
from jax import lax
from jax.experimental import pallas as pl
from jax.experimental.pallas import tpu as pltpu

_VMEM_LIMIT = 32 * 1024 * 1024   # safe on v5e/v6e/v7x; could be raised on v6e only
_LRELU_SLOPE = 0.1


def _round_up(x, m):
    return (x + m - 1) // m * m


# ----------------------------------------------------------------------------
# STFT magnitude kernel: frames rebuilt in-kernel from a signal chunk, one
# bf16 DFT GEMM with f32 accumulation, |.| fused into the epilogue.
# ----------------------------------------------------------------------------
def _stft_mag_kernel(chunk_ref, basis_ref, o_ref, *, n_fft, hop, frames_per_blk, halfp):
    chunk = chunk_ref[0, 0]                                   # [1, clen] bf16
    frames = jnp.concatenate(
        [chunk[:, j * hop: j * hop + n_fft] for j in range(frames_per_blk)],
        axis=0)                                               # [TB, n_fft]
    r = jnp.dot(frames, basis_ref[...], preferred_element_type=jnp.float32)
    re = r[:, :halfp]
    im = r[:, halfp:]
    o_ref[0] = jnp.sqrt(re * re + im * im).astype(o_ref.dtype)


def build_stft_basis(n_fft, win_length):
    """Real/imag DFT basis with torch.stft's default (rectangular, centered) window."""
    half = n_fft // 2 + 1
    halfp = _round_up(half, 128)                              # lane-aligned re/im halves
    win = np.zeros(n_fft, np.float64)
    start = (n_fft - win_length) // 2
    win[start:start + win_length] = 1.0                       # window=None in torch.stft
    n = np.arange(n_fft)[:, None]
    k = np.arange(half)[None, :]
    ang = 2.0 * np.pi * n * k / n_fft
    basis = np.zeros((n_fft, 2 * halfp), np.float32)
    basis[:, :half] = np.cos(ang) * win[:, None]
    basis[:, halfp:halfp + half] = -np.sin(ang) * win[:, None]
    return jnp.asarray(basis, jnp.bfloat16), half, halfp


def spectrogram(x, n_fft, hop, basis, half, halfp, frames_per_blk=16):
    """x: [B, 1, T] -> (|STFT| as [B, T_frames_padded, halfp] bf16, n_frames)."""
    B = x.shape[0]
    pad = (n_fft - hop) // 2
    xs = jnp.pad(x[:, 0, :], ((0, 0), (pad, pad)), mode='reflect')
    L = xs.shape[1]
    n_frames = (L - n_fft) // hop + 1
    TB = frames_per_blk
    n_blk = -(-n_frames // TB)
    clen = (TB - 1) * hop + n_fft
    need = (n_blk - 1) * TB * hop + clen
    if need > L:
        xs = jnp.pad(xs, ((0, 0), (0, need - L)))             # zero frames, sliced off later
    xs = xs.astype(jnp.bfloat16)
    # Lightly-overlapping chunks (<= ~1.2x signal duplication) replace the old
    # full per-frame gather (n_fft/hop duplication); frames are rebuilt in VMEM.
    chunks = jnp.stack([xs[:, c * TB * hop: c * TB * hop + clen] for c in range(n_blk)],
                       axis=1)[:, :, None, :]                 # [B, n_blk, 1, clen]

    out = pl.pallas_call(
        functools.partial(_stft_mag_kernel, n_fft=n_fft, hop=hop,
                          frames_per_blk=TB, halfp=halfp),
        out_shape=jax.ShapeDtypeStruct((B, n_blk * TB, halfp), jnp.bfloat16),
        grid_spec=pltpu.PrefetchScalarGridSpec(
            num_scalar_prefetch=0,
            grid=(B, n_blk),
            in_specs=[
                pl.BlockSpec((1, 1, 1, clen), lambda b, c: (b, c, 0, 0)),
                # TODO(synk): constant-index basis could be single-buffered
                # (pl.Buffered(1)) to halve its VMEM footprint at large n_fft.
                pl.BlockSpec((n_fft, 2 * halfp), lambda b, c: (0, 0)),
            ],
            out_specs=pl.BlockSpec((1, TB, halfp), lambda b, c: (b, c, 0)),
        ),
        compiler_params=pltpu.CompilerParams(
            dimension_semantics=("parallel", "parallel"),
            vmem_limit_bytes=_VMEM_LIMIT),
    )(chunks, basis)
    return out, n_frames


# ----------------------------------------------------------------------------
# Conv2d (torch semantics, stride_h = 1) with im2col fused into the kernel:
# the padded per-batch slab stays resident in VMEM, the column matrix is built
# in-register per output row, bias + LeakyReLU fused into the f32 epilogue.
# Layout: activations are [B, H, Cin, W]  (time W = lanes, channels = sublanes).
# ----------------------------------------------------------------------------
def _conv_kernel(*refs, kh, kw, sw, hout, wout, act, alpha):
    w2_ref, bias_ref = refs[0], refs[1]
    phase_refs = refs[2:-1]                                   # one ref per W-phase
    out_ref = refs[-1]
    w2 = w2_ref[...]                                          # [Cout, K] bf16 (hoisted)
    bias = bias_ref[...]                                      # [Cout, 1] f32

    def body(ho, carry):
        rows = [pref[0, pl.ds(ho, kh), :, :] for pref in phase_refs]   # [kh, Cin, Wq]
        pieces = []
        for di in range(kh):
            for dj in range(kw):
                a = dj // sw
                pieces.append(rows[dj % sw][di, :, a:a + wout])        # [Cin, Wout]
        col = jnp.concatenate(pieces, axis=0)                 # [Cin*kh*kw, Wout] bf16
        res = jnp.dot(w2, col, preferred_element_type=jnp.float32) + bias
        if act:
            res = jnp.where(res >= 0, res, alpha * res)       # LeakyReLU on f32 acc
        out_ref[0, pl.ds(ho, 1), :, :] = res[None].astype(out_ref.dtype)
        return carry

    lax.fori_loop(0, hout, body, 0)


def conv_layer(x, w, b, *, stride_w, pad_hw, act, out_dtype):
    """x: [B, Hin, Cin, Win]; w: torch-layout [Cout, Cin, kh, kw]; b: [Cout].
    Returns [B, Hout, Cout, Wout] (stride_h is always 1 in this model)."""
    B, Hin, Cin, Win = x.shape
    Cout, Cin2, kh, kw = w.shape
    assert Cin == Cin2
    ph, pw = pad_hw
    sw = stride_w
    Hp = Hin + 2 * ph
    Wp = Win + 2 * pw
    Hout = Hp - kh + 1
    Wout = (Wp - kw) // sw + 1
    Wq = (kw - 1) // sw + Wout                                # columns per W-phase
    extra = max(0, sw * Wq - Wp)

    xp = jnp.pad(x.astype(jnp.bfloat16),
                 ((0, 0), (ph, ph), (0, 0), (pw, pw + extra)))
    # Even/odd phase split (host side, one fused XLA pass) so the kernel only
    # does contiguous static slices for the strided-W taps.
    phases = [xp[:, :, :, r::sw] for r in range(sw)]          # each [B, Hp, Cin, Wq]

    K = Cin * kh * kw
    w2 = jnp.transpose(w, (0, 2, 3, 1)).reshape(Cout, K).astype(jnp.bfloat16)
    b2 = b.reshape(Cout, 1).astype(jnp.float32)

    in_specs = [
        pl.BlockSpec((Cout, K), lambda bb: (0, 0)),           # weights (constant index)
        pl.BlockSpec((Cout, 1), lambda bb: (0, 0)),           # bias
    ]
    for _ in range(sw):
        # Whole padded per-batch slab resident in VMEM (constant over the H loop).
        # TODO(synk): tile the W axis (manual halo DMA) for very long signals.
        in_specs.append(pl.BlockSpec((1, Hp, Cin, Wq), lambda bb: (bb, 0, 0, 0)))

    out = pl.pallas_call(
        functools.partial(_conv_kernel, kh=kh, kw=kw, sw=sw,
                          hout=Hout, wout=Wout, act=act, alpha=_LRELU_SLOPE),
        out_shape=jax.ShapeDtypeStruct((B, Hout, Cout, Wout), out_dtype),
        grid_spec=pltpu.PrefetchScalarGridSpec(
            num_scalar_prefetch=0,
            grid=(B,),
            in_specs=in_specs,
            out_specs=pl.BlockSpec((1, Hout, Cout, Wout), lambda bb: (bb, 0, 0, 0)),
        ),
        compiler_params=pltpu.CompilerParams(
            dimension_semantics=("parallel",),
            vmem_limit_bytes=_VMEM_LIMIT),
    )(w2, b2, *phases)
    return out


# ----------------------------------------------------------------------------
# Parameters (torch Conv2d default init; weight_norm at init is identity).
# ----------------------------------------------------------------------------
def _init_conv(key, cout, cin, kh, kw):
    k_w, k_b = jax.random.split(key)
    fan_in = cin * kh * kw
    s = 1.0 / np.sqrt(fan_in)
    w = jax.random.uniform(k_w, (cout, cin, kh, kw), jnp.float32, -s, s)
    b = jax.random.uniform(k_b, (cout,), jnp.float32, -s, s)
    return w, b


def build_discriminator_r(key, resolution, d_mult=1.0):
    assert len(resolution) == 3
    n_fft, hop, win_length = resolution
    ch = int(32 * d_mult)
    keys = jax.random.split(key, 6)
    convs = [
        dict(wb=_init_conv(keys[0], ch, 1, 3, 9), stride=1, pad=(1, 4)),
        dict(wb=_init_conv(keys[1], ch, ch, 3, 9), stride=2, pad=(1, 4)),
        dict(wb=_init_conv(keys[2], ch, ch, 3, 9), stride=2, pad=(1, 4)),
        dict(wb=_init_conv(keys[3], ch, ch, 3, 9), stride=2, pad=(1, 4)),
        dict(wb=_init_conv(keys[4], ch, ch, 3, 3), stride=1, pad=(1, 1)),
    ]
    post = _init_conv(keys[5], 1, ch, 3, 3)
    basis, half, halfp = build_stft_basis(n_fft, win_length)
    return dict(convs=convs, post=post, n_fft=n_fft, hop=hop,
                basis=basis, half=half, halfp=halfp)


# ----------------------------------------------------------------------------
# DiscriminatorR forward
# ----------------------------------------------------------------------------
def discriminator_r_forward(p, x):
    """x: [B, 1, T] -> (flattened logits [B, F*T'], fmap list of NCHW feature maps)."""
    fmap = []
    spec, n_frames = spectrogram(x, p['n_fft'], p['hop'],
                                 p['basis'], p['half'], p['halfp'])
    # [B, Tpad, halfp] -> [B, F, 1, T]   (transpose + slice + pad fuse into one pass)
    h = jnp.transpose(spec, (0, 2, 1))[:, :p['half'], :n_frames][:, :, None, :]
    for c in p['convs']:
        w, b = c['wb']
        h = conv_layer(h, w, b, stride_w=c['stride'], pad_hw=c['pad'],
                       act=True, out_dtype=jnp.bfloat16)      # LeakyReLU(0.1) fused
        # TODO(synk): NCHW transpose kept only for torch-interface parity of fmap;
        # the compute path itself stays in the lane-dense [B, H, C, W] layout.
        fmap.append(jnp.transpose(h, (0, 2, 1, 3)))
    pw_, pb_ = p['post']
    out = conv_layer(h, pw_, pb_, stride_w=1, pad_hw=(1, 1),
                     act=False, out_dtype=jnp.float32)        # [B, H, 1, W] f32
    out_nchw = jnp.transpose(out, (0, 2, 1, 3))               # [B, 1, H, W]
    fmap.append(out_nchw)
    x_flat = out_nchw.reshape(out_nchw.shape[0], -1)          # torch.flatten(x, 1, -1)
    return x_flat, fmap


if __name__ == "__main__":
    key = jax.random.PRNGKey(0)
    k_param, k_x = jax.random.split(key)

    resolution = [128, 32, 64]        # [n_fft, hop_length, win_length] (small test config)
    params = build_discriminator_r(k_param, resolution, d_mult=1.0)

    B, T = 2, 512
    x = jax.random.normal(k_x, (B, 1, T), jnp.float32)

    fwd = jax.jit(lambda inp: discriminator_r_forward(params, inp))
    logits, fmap = fwd(x)
    jax.block_until_ready((logits, fmap))
    print("KERNEL_OK")
</pallas_src>

<mosaic_0001>
module attributes {stable_mosaic.version = 11 : i64} {
  func.func @_stft_mag_kernel(%arg0: i32, %arg1: i32, %arg2: memref<1x1x1x608xbf16, #tpu.memory_space<vmem>>, %arg3: memref<128x256xbf16, #tpu.memory_space<vmem>>, %arg4: memref<1x16x128xbf16, #tpu.memory_space<vmem>>) attributes {dimension_semantics = [#tpu.dimension_semantics<parallel>, #tpu.dimension_semantics<parallel>], iteration_bounds = array<i64: 2, 1>, scalar_prefetch = 0 : i64, scratch_operands = 0 : i64, tpu.core_type = #tpu.core_type<tc>, window_params = [{transform_indices = @transform_0, window_bounds = array<i64: 1, 1, 1, 608>}, {pipeline_mode = #tpu.pipeline_mode<synchronous>, transform_indices = @transform_1, window_bounds = array<i64: 128, 256>}, {transform_indices = @transform_2, window_bounds = array<i64: 1, 16, 128>}]} {
    %c0 = arith.constant 0 : index
    %c0_0 = arith.constant 0 : index
    %c0_1 = arith.constant 0 : index
    %c0_2 = arith.constant 0 : index
    %0 = vector.load %arg2[%c0, %c0_0, %c0_1, %c0_2] : memref<1x1x1x608xbf16, #tpu.memory_space<vmem>>, vector<1x1x1x608xbf16>
    %1 = vector.shape_cast %0 : vector<1x1x1x608xbf16> to vector<1x608xbf16>
    %2 = vector.extract_strided_slice %1 {offsets = [0, 0], sizes = [1, 128], strides = [1, 1]} : vector<1x608xbf16> to vector<1x128xbf16>
    %3 = vector.extract_strided_slice %1 {offsets = [0, 32], sizes = [1, 128], strides = [1, 1]} : vector<1x608xbf16> to vector<1x128xbf16>
    %4 = vector.extract_strided_slice %1 {offsets = [0, 64], sizes = [1, 128], strides = [1, 1]} : vector<1x608xbf16> to vector<1x128xbf16>
    %5 = vector.extract_strided_slice %1 {offsets = [0, 96], sizes = [1, 128], strides = [1, 1]} : vector<1x608xbf16> to vector<1x128xbf16>
    %6 = vector.extract_strided_slice %1 {offsets = [0, 128], sizes = [1, 128], strides = [1, 1]} : vector<1x608xbf16> to vector<1x128xbf16>
    %7 = vector.extract_strided_slice %1 {offsets = [0, 160], sizes = [1, 128], strides = [1, 1]} : vector<1x608xbf16> to vector<1x128xbf16>
    %8 = vector.extract_strided_slice %1 {offsets = [0, 192], sizes = [1, 128], strides = [1, 1]} : vector<1x608xbf16> to vector<1x128xbf16>
    %9 = vector.extract_strided_slice %1 {offsets = [0, 224], sizes = [1, 128], strides = [1, 1]} : vector<1x608xbf16> to vector<1x128xbf16>
    %10 = vector.extract_strided_slice %1 {offsets = [0, 256], sizes = [1, 128], strides = [1, 1]} : vector<1x608xbf16> to vector<1x128xbf16>
    %11 = vector.extract_strided_slice %1 {offsets = [0, 288], sizes = [1, 128], strides = [1, 1]} : vector<1x608xbf16> to vector<1x128xbf16>
    %12 = vector.extract_strided_slice %1 {offsets = [0, 320], sizes = [1, 128], strides = [1, 1]} : vector<1x608xbf16> to vector<1x128xbf16>
    %13 = vector.extract_strided_slice %1 {offsets = [0, 352], sizes = [1, 128], strides = [1, 1]} : vector<1x608xbf16> to vector<1x128xbf16>
    %14 = vector.extract_strided_slice %1 {offsets = [0, 384], sizes = [1, 128], strides = [1, 1]} : vector<1x608xbf16> to vector<1x128xbf16>
    %15 = vector.extract_strided_slice %1 {offsets = [0, 416], sizes = [1, 128], strides = [1, 1]} : vector<1x608xbf16> to vector<1x128xbf16>
    %16 = vector.extract_strided_slice %1 {offsets = [0, 448], sizes = [1, 128], strides = [1, 1]} : vector<1x608xbf16> to vector<1x128xbf16>
    %17 = vector.extract_strided_slice %1 {offsets = [0, 480], sizes = [1, 128], strides = [1, 1]} : vector<1x608xbf16> to vector<1x128xbf16>
    %18 = tpu.concatenate %2, %3, %4, %5, %6, %7, %8, %9, %10, %11, %12, %13, %14, %15, %16, %17 in 0 : vector<1x128xbf16>, vector<1x128xbf16>, vector<1x128xbf16>, vector<1x128xbf16>, vector<1x128xbf16>, vector<1x128xbf16>, vector<1x128xbf16>, vector<1x128xbf16>, vector<1x128xbf16>, vector<1x128xbf16>, vector<1x128xbf16>, vector<1x128xbf16>, vector<1x128xbf16>, vector<1x128xbf16>, vector<1x128xbf16>, vector<1x128xbf16> -> vector<16x128xbf16>
    %c0_3 = arith.constant 0 : index
    %c0_4 = arith.constant 0 : index
    %19 = vector.load %arg3[%c0_3, %c0_4] : memref<128x256xbf16, #tpu.memory_space<vmem>>, vector<128x256xbf16>
    %cst = arith.constant dense<0.000000e+00> : vector<16x256xf32>
    %20 = tpu.matmul %18, %19, %cst {dimension_numbers = #tpu.dot_dimension_numbers<[1], [0], [0], [1], [0, 0, 1, 1], [], []>} : vector<16x128xbf16>, vector<128x256xbf16>, vector<16x256xf32> -> vector<16x256xf32>
    %21 = vector.extract_strided_slice %20 {offsets = [0, 0], sizes = [16, 128], strides = [1, 1]} : vector<16x256xf32> to vector<16x128xf32>
    %22 = vector.extract_strided_slice %20 {offsets = [0, 128], sizes = [16, 128], strides = [1, 1]} : vector<16x256xf32> to vector<16x128xf32>
    %23 = arith.mulf %21, %21 : vector<16x128xf32>
    %24 = arith.mulf %22, %22 : vector<16x128xf32>
    %25 = arith.addf %23, %24 : vector<16x128xf32>
    %26 = math.sqrt %25 : vector<16x128xf32>
    %27 = arith.truncf %26 : vector<16x128xf32> to vector<16x128xbf16>
    %c0_5 = arith.constant 0 : index
    %c0_6 = arith.constant 0 : index
    %c0_7 = arith.constant 0 : index
    %28 = vector.load %arg4[%c0_5, %c0_6, %c0_7] : memref<1x16x128xbf16, #tpu.memory_space<vmem>>, vector<1x16x128xbf16>
    %29 = vector.shape_cast %28 : vector<1x16x128xbf16> to vector<16x128xbf16>
    %30 = vector.shape_cast %27 : vector<16x128xbf16> to vector<1x16x128xbf16>
    tpu.vector_store %arg4[%c0_5, %c0_6, %c0_7], %30 {strides = array<i32>} : memref<1x16x128xbf16, #tpu.memory_space<vmem>>, vector<1x16x128xbf16>,
    return
  }
  func.func @transform_0(%arg0: i32, %arg1: i32) -> (i32, i32, i32, i32) {
    %c0_i32 = arith.constant 0 : i32
    %c0_i32_0 = arith.constant 0 : i32
    %c0_i32_1 = arith.constant 0 : i32
    return %arg0, %arg1, %c0_i32, %c0_i32_0 : i32, i32, i32, i32
  }
  func.func @transform_1(%arg0: i32, %arg1: i32) -> (i32, i32) {
    %c0_i32 = arith.constant 0 : i32
    %c0_i32_0 = arith.constant 0 : i32
    %c0_i32_1 = arith.constant 0 : i32
    return %c0_i32, %c0_i32_0 : i32, i32
  }
  func.func @transform_2(%arg0: i32, %arg1: i32) -> (i32, i32, i32) {
    %c0_i32 = arith.constant 0 : i32
    %c0_i32_0 = arith.constant 0 : i32
    return %arg0, %arg1, %c0_i32 : i32, i32, i32
  }
}

module attributes {stable_mosaic.version = 11 : i64} {
  func.func @_conv_kernel(%arg0: i32, %arg1: memref<32x27xbf16, #tpu.memory_space<vmem>>, %arg2: memref<32x1xf32, #tpu.memory_space<vmem>>, %arg3: memref<1x67x1x24xbf16, #tpu.memory_space<vmem>>, %arg4: memref<1x65x32x16xbf16, #tpu.memory_space<vmem>>) attributes {dimension_semantics = [#tpu.dimension_semantics<parallel>], iteration_bounds = array<i64: 2>, scalar_prefetch = 0 : i64, scratch_operands = 0 : i64, tpu.core_type = #tpu.core_type<tc>, window_params = [{pipeline_mode = #tpu.pipeline_mode<synchronous>, transform_indices = @transform_0, window_bounds = array<i64: 32, 27>}, {pipeline_mode = #tpu.pipeline_mode<synchronous>, transform_indices = @transform_1, window_bounds = array<i64: 32, 1>}, {transform_indices = @transform_2, window_bounds = array<i64: 1, 67, 1, 24>}, {transform_indices = @transform_3, window_bounds = array<i64: 1, 65, 32, 16>}]} {
    %c0 = arith.constant 0 : index
    %c0_0 = arith.constant 0 : index
    %0 = vector.load %arg1[%c0, %c0_0] : memref<32x27xbf16, #tpu.memory_space<vmem>>, vector<32x27xbf16>
    %c0_1 = arith.constant 0 : index
    %c0_2 = arith.constant 0 : index
    %1 = vector.load %arg2[%c0_1, %c0_2] : memref<32x1xf32, #tpu.memory_space<vmem>>, vector<32x1xf32>
    %c0_i32 = arith.constant 0 : i32
    %c65_i32 = arith.constant 65 : i32
    %2 = arith.addi %c0_i32, %c65_i32 : i32
    %c1_i32 = arith.constant 1 : i32
    scf.for %arg5 = %c0_i32 to %2 step %c1_i32  : i32 {
      %c0_4 = arith.constant 0 : index
      %3 = arith.index_cast %arg5 : i32 to index
      %c0_5 = arith.constant 0 : index
      %c0_6 = arith.constant 0 : index
      %4 = vector.load %arg3[%c0_4, %3, %c0_5, %c0_6] : memref<1x67x1x24xbf16, #tpu.memory_space<vmem>>, vector<1x3x1x24xbf16>
      %5 = vector.shape_cast %4 : vector<1x3x1x24xbf16> to vector<3x1x24xbf16>
      %6 = vector.extract_strided_slice %5 {offsets = [0, 0, 0], sizes = [1, 1, 16], strides = [1, 1, 1]} : vector<3x1x24xbf16> to vector<1x1x16xbf16>
      %7 = vector.shape_cast %6 : vector<1x1x16xbf16> to vector<1x16xbf16>
      %8 = vector.extract_strided_slice %5 {offsets = [0, 0, 1], sizes = [1, 1, 16], strides = [1, 1, 1]} : vector<3x1x24xbf16> to vector<1x1x16xbf16>
      %9 = vector.shape_cast %8 : vector<1x1x16xbf16> to vector<1x16xbf16>
      %10 = vector.extract_strided_slice %5 {offsets = [0, 0, 2], sizes = [1, 1, 16], strides = [1, 1, 1]} : vector<3x1x24xbf16> to vector<1x1x16xbf16>
      %11 = vector.shape_cast %10 : vector<1x1x16xbf16> to vector<1x16xbf16>
      %12 = vector.extract_strided_slice %5 {offsets = [0, 0, 3], sizes = [1, 1, 16], strides = [1, 1, 1]} : vector<3x1x24xbf16> to vector<1x1x16xbf16>
      %13 = vector.shape_cast %12 : vector<1x1x16xbf16> to vector<1x16xbf16>
      %14 = vector.extract_strided_slice %5 {offsets = [0, 0, 4], sizes = [1, 1, 16], strides = [1, 1, 1]} : vector<3x1x24xbf16> to vector<1x1x16xbf16>
      %15 = vector.shape_cast %14 : vector<1x1x16xbf16> to vector<1x16xbf16>
      %16 = vector.extract_strided_slice %5 {offsets = [0, 0, 5], sizes = [1, 1, 16], strides = [1, 1, 1]} : vector<3x1x24xbf16> to vector<1x1x16xbf16>
      %17 = vector.shape_cast %16 : vector<1x1x16xbf16> to vector<1x16xbf16>
      %18 = vector.extract_strided_slice %5 {offsets = [0, 0, 6], sizes = [1, 1, 16], strides = [1, 1, 1]} : vector<3x1x24xbf16> to vector<1x1x16xbf16>
      %19 = vector.shape_cast %18 : vector<1x1x16xbf16> to vector<1x16xbf16>
      %20 = vector.extract_strided_slice %5 {offsets = [0, 0, 7], sizes = [1, 1, 16], strides = [1, 1, 1]} : vector<3x1x24xbf16> to vector<1x1x16xbf16>
      %21 = vector.shape_cast %20 : vector<1x1x16xbf16> to vector<1x16xbf16>
      %22 = vector.extract_strided_slice %5 {offsets = [0, 0, 8], sizes = [1, 1, 16], strides = [1, 1, 1]} : vector<3x1x24xbf16> to vector<1x1x16xbf16>
      %23 = vector.shape_cast %22 : vector<1x1x16xbf16> to vector<1x16xbf16>
      %24 = vector.extract_strided_slice %5 {offsets = [1, 0, 0], sizes = [1, 1, 16], strides = [1, 1, 1]} : vector<3x1x24xbf16> to vector<1x1x16xbf16>
      %25 = vector.shape_cast %24 : vector<1x1x16xbf16> to vector<1x16xbf16>
      %26 = vector.extract_strided_slice %5 {offsets = [1, 0, 1], sizes = [1, 1, 16], strides = [1, 1, 1]} : vector<3x1x24xbf16> to vector<1x1x16xbf16>
      %27 = vector.shape_cast %26 : vector<1x1x16xbf16> to vector<1x16xbf16>
      %28 = vector.extract_strided_slice %5 {offsets = [1, 0, 2], sizes = [1, 1, 16], strides = [1, 1, 1]} : vector<3x1x24xbf16> to vector<1x1x16xbf16>
      %29 = vector.shape_cast %28 : vector<1x1x16xbf16> to vector<1x16xbf16>
      %30 = vector.extract_strided_slice %5 {offsets = [1, 0, 3], sizes = [1, 1, 16], strides = [1, 1, 1]} : vector<3x1x24xbf16> to vector<1x1x16xbf16>
      %31 = vector.shape_cast %30 : vector<1x1x16xbf16> to vector<1x16xbf16>
      %32 = vector.extract_strided_slice %5 {offsets = [1, 0, 4], sizes = [1, 1, 16], strides = [1, 1, 1]} : vector<3x1x24xbf16> to vector<1x1x16xbf16>
      %33 = vector.shape_cast %32 : vector<1x1x16xbf16> to vector<1x16xbf16>
      %34 = vector.extract_strided_slice %5 {offsets = [1, 0, 5], sizes = [1, 1, 16], strides = [1, 1, 1]} : vector<3x1x24xbf16> to vector<1x1x16xbf16>
      %35 = vector.shape_cast %34 : vector<1x1x16xbf16> to vector<1x16xbf16>
      %36 = vector.extract_strided_slice %5 {offsets = [1, 0, 6], sizes = [1, 1, 16], strides = [1, 1, 1]} : vector<3x1x24xbf16> to vector<1x1x16xbf16>
      %37 = vector.shape_cast %36 : vector<1x1x16xbf16> to vector<1x16xbf16>
      %38 = vector.extract_strided_slice %5 {offsets = [1, 0, 7], sizes = [1, 1, 16], strides = [1, 1, 1]} : vector<3x1x24xbf16> to vector<1x1x16xbf16>
      %39 = vector.shape_cast %38 : vector<1x1x16xbf16> to vector<1x16xbf16>
      %40 = vector.extract_strided_slice %5 {offsets = [1, 0, 8], sizes = [1, 1, 16], strides = [1, 1, 1]} : vector<3x1x24xbf16> to vector<1x1x16xbf16>
      %41 = vector.shape_cast %40 : vector<1x1x16xbf16> to vector<1x16xbf16>
      %42 = vector.extract_strided_slice %5 {offsets = [2, 0, 0], sizes = [1, 1, 16], strides = [1, 1, 1]} : vector<3x1x24xbf16> to vector<1x1x16xbf16>
      %43 = vector.shape_cast %42 : vector<1x1x16xbf16> to vector<1x16xbf16>
      %44 = vector.extract_strided_slice %5 {offsets = [2, 0, 1], sizes = [1, 1, 16], strides = [1, 1, 1]} : vector<3x1x24xbf16> to vector<1x1x16xbf16>
      %45 = vector.shape_cast %44 : vector<1x1x16xbf16> to vector<1x16xbf16>
      %46 = vector.extract_strided_slice %5 {offsets = [2, 0, 2], sizes = [1, 1, 16], strides = [1, 1, 1]} : vector<3x1x24xbf16> to vector<1x1x16xbf16>
      %47 = vector.shape_cast %46 : vector<1x1x16xbf16> to vector<1x16xbf16>
      %48 = vector.extract_strided_slice %5 {offsets = [2, 0, 3], sizes = [1, 1, 16], strides = [1, 1, 1]} : vector<3x1x24xbf16> to vector<1x1x16xbf16>
      %49 = vector.shape_cast %48 : vector<1x1x16xbf16> to vector<1x16xbf16>
      %50 = vector.extract_strided_slice %5 {offsets = [2, 0, 4], sizes = [1, 1, 16], strides = [1, 1, 1]} : vector<3x1x24xbf16> to vector<1x1x16xbf16>
      %51 = vector.shape_cast %50 : vector<1x1x16xbf16> to vector<1x16xbf16>
      %52 = vector.extract_strided_slice %5 {offsets = [2, 0, 5], sizes = [1, 1, 16], strides = [1, 1, 1]} : vector<3x1x24xbf16> to vector<1x1x16xbf16>
      %53 = vector.shape_cast %52 : vector<1x1x16xbf16> to vector<1x16xbf16>
      %54 = vector.extract_strided_slice %5 {offsets = [2, 0, 6], sizes = [1, 1, 16], strides = [1, 1, 1]} : vector<3x1x24xbf16> to vector<1x1x16xbf16>
      %55 = vector.shape_cast %54 : vector<1x1x16xbf16> to vector<1x16xbf16>
      %56 = vector.extract_strided_slice %5 {offsets = [2, 0, 7], sizes = [1, 1, 16], strides = [1, 1, 1]} : vector<3x1x24xbf16> to vector<1x1x16xbf16>
      %57 = vector.shape_cast %56 : vector<1x1x16xbf16> to vector<1x16xbf16>
      %58 = vector.extract_strided_slice %5 {offsets = [2, 0, 8], sizes = [1, 1, 16], strides = [1, 1, 1]} : vector<3x1x24xbf16> to vector<1x1x16xbf16>
      %59 = vector.shape_cast %58 : vector<1x1x16xbf16> to vector<1x16xbf16>
      %60 = tpu.concatenate %7, %9, %11, %13, %15, %17, %19, %21, %23, %25, %27, %29, %31, %33, %35, %37 in 0 : vector<1x16xbf16>, vector<1x16xbf16>, vector<1x16xbf16>, vector<1x16xbf16>, vector<1x16xbf16>, vector<1x16xbf16>, vector<1x16xbf16>, vector<1x16xbf16>, vector<1x16xbf16>, vector<1x16xbf16>, vector<1x16xbf16>, vector<1x16xbf16>, vector<1x16xbf16>, vector<1x16xbf16>, vector<1x16xbf16>, vector<1x16xbf16> -> vector<16x16xbf16>
      %61 = tpu.concatenate %39, %41, %43, %45, %47, %49, %51, %53, %55, %57, %59 in 0 : vector<1x16xbf16>, vector<1x16xbf16>, vector<1x16xbf16>, vector<1x16xbf16>, vector<1x16xbf16>, vector<1x16xbf16>, vector<1x16xbf16>, vector<1x16xbf16>, vector<1x16xbf16>, vector<1x16xbf16>, vector<1x16xbf16> -> vector<11x16xbf16>
      %62 = tpu.concatenate %60, %61 in 0 : vector<16x16xbf16>, vector<11x16xbf16> -> vector<27x16xbf16>
      %cst = arith.constant dense<0.000000e+00> : vector<32x16xf32>
      %63 = tpu.matmul %0, %62, %cst {dimension_numbers = #tpu.dot_dimension_numbers<[1], [0], [0], [1], [0, 0, 1, 1], [], []>} : vector<32x27xbf16>, vector<27x16xbf16>, vector<32x16xf32> -> vector<32x16xf32>
      %64 = vector.broadcast %1 : vector<32x1xf32> to vector<32x16xf32>
      %65 = arith.addf %63, %64 : vector<32x16xf32>
      %cst_7 = arith.constant 0.000000e+00 : f32
      %66 = vector.broadcast %cst_7 : f32 to vector<32x16xf32>
      %67 = arith.cmpf oge, %65, %66 : vector<32x16xf32>
      %cst_8 = arith.constant 1.000000e-01 : f32
      %68 = vector.broadcast %cst_8 : f32 to vector<32x16xf32>
      %69 = arith.mulf %68, %65 : vector<32x16xf32>
      %70 = arith.select %67, %65, %69 : vector<32x16xi1>, vector<32x16xf32>
      %71 = vector.shape_cast %70 : vector<32x16xf32> to vector<1x32x16xf32>
      %72 = arith.truncf %71 : vector<1x32x16xf32> to vector<1x32x16xbf16>
      %c0_9 = arith.constant 0 : index
      %73 = arith.index_cast %arg5 : i32 to index
      %c0_10 = arith.constant 0 : index
      %c0_11 = arith.constant 0 : index
      %74 = vector.load %arg4[%c0_9, %73, %c0_10, %c0_11] : memref<1x65x32x16xbf16, #tpu.memory_space<vmem>>, vector<1x1x32x16xbf16>
      %75 = vector.shape_cast %74 : vector<1x1x32x16xbf16> to vector<1x32x16xbf16>
      %76 = vector.shape_cast %72 : vector<1x32x16xbf16> to vector<1x1x32x16xbf16>
      tpu.vector_store %arg4[%c0_9, %73, %c0_10, %c0_11], %76 {strides = array<i32>} : memref<1x65x32x16xbf16, #tpu.memory_space<vmem>>, vector<1x1x32x16xbf16>,
    }
    %c65_i32_3 = arith.constant 65 : i32
    return
  }
  func.func @transform_0(%arg0: i32) -> (i32, i32) {
    %c0_i32 = arith.constant 0 : i32
    %c0_i32_0 = arith.constant 0 : i32
    %c0_i32_1 = arith.constant 0 : i32
    return %c0_i32, %c0_i32_0 : i32, i32
  }
  func.func @transform_1(%arg0: i32) -> (i32, i32) {
    %c0_i32 = arith.constant 0 : i32
    %c0_i32_0 = arith.constant 0 : i32
    %c0_i32_1 = arith.constant 0 : i32
    return %c0_i32, %c0_i32_0 : i32, i32
  }
  func.func @transform_2(%arg0: i32) -> (i32, i32, i32, i32) {
    %c0_i32 = arith.constant 0 : i32
    %c0_i32_0 = arith.constant 0 : i32
    %c0_i32_1 = arith.constant 0 : i32
    %c0_i32_2 = arith.constant 0 : i32
    return %arg0, %c0_i32, %c0_i32_0, %c0_i32_1 : i32, i32, i32, i32
  }
  func.func @transform_3(%arg0: i32) -> (i32, i32, i32, i32) {
    %c0_i32 = arith.constant 0 : i32
    %c0_i32_0 = arith.constant 0 : i32
    %c0_i32_1 = arith.constant 0 : i32
    %c0_i32_2 = arith.constant 0 : i32
    return %arg0, %c0_i32, %c0_i32_0, %c0_i32_1 : i32, i32, i32, i32
  }
}

module attributes {stable_mosaic.version = 11 : i64} {
  func.func @_conv_kernel(%arg0: i32, %arg1: memref<32x864xbf16, #tpu.memory_space<vmem>>, %arg2: memref<32x1xf32, #tpu.memory_space<vmem>>, %arg3: memref<1x67x32x12xbf16, #tpu.memory_space<vmem>>, %arg4: memref<1x67x32x12xbf16, #tpu.memory_space<vmem>>, %arg5: memref<1x65x32x8xbf16, #tpu.memory_space<vmem>>) attributes {dimension_semantics = [#tpu.dimension_semantics<parallel>], iteration_bounds = array<i64: 2>, scalar_prefetch = 0 : i64, scratch_operands = 0 : i64, tpu.core_type = #tpu.core_type<tc>, window_params = [{pipeline_mode = #tpu.pipeline_mode<synchronous>, transform_indices = @transform_0, window_bounds = array<i64: 32, 864>}, {pipeline_mode = #tpu.pipeline_mode<synchronous>, transform_indices = @transform_1, window_bounds = array<i64: 32, 1>}, {transform_indices = @transform_2, window_bounds = array<i64: 1, 67, 32, 12>}, {transform_indices = @transform_3, window_bounds = array<i64: 1, 67, 32, 12>}, {transform_indices = @transform_4, window_bounds = array<i64: 1, 65, 32, 8>}]} {
    %c0 = arith.constant 0 : index
    %c0_0 = arith.constant 0 : index
    %0 = vector.load %arg1[%c0, %c0_0] : memref<32x864xbf16, #tpu.memory_space<vmem>>, vector<32x864xbf16>
    %c0_1 = arith.constant 0 : index
    %c0_2 = arith.constant 0 : index
    %1 = vector.load %arg2[%c0_1, %c0_2] : memref<32x1xf32, #tpu.memory_space<vmem>>, vector<32x1xf32>
    %c0_i32 = arith.constant 0 : i32
    %c65_i32 = arith.constant 65 : i32
    %2 = arith.addi %c0_i32, %c65_i32 : i32
    %c1_i32 = arith.constant 1 : i32
    scf.for %arg6 = %c0_i32 to %2 step %c1_i32  : i32 {
      %c0_4 = arith.constant 0 : index
      %3 = arith.index_cast %arg6 : i32 to index
      %c0_5 = arith.constant 0 : index
      %c0_6 = arith.constant 0 : index
      %4 = vector.load %arg3[%c0_4, %3, %c0_5, %c0_6] : memref<1x67x32x12xbf16, #tpu.memory_space<vmem>>, vector<1x3x32x12xbf16>
      %5 = vector.shape_cast %4 : vector<1x3x32x12xbf16> to vector<3x32x12xbf16>
      %c0_7 = arith.constant 0 : index
      %6 = arith.index_cast %arg6 : i32 to index
      %c0_8 = arith.constant 0 : index
      %c0_9 = arith.constant 0 : index
      %7 = vector.load %arg4[%c0_7, %6, %c0_8, %c0_9] : memref<1x67x32x12xbf16, #tpu.memory_space<vmem>>, vector<1x3x32x12xbf16>
      %8 = vector.shape_cast %7 : vector<1x3x32x12xbf16> to vector<3x32x12xbf16>
      %9 = vector.extract_strided_slice %5 {offsets = [0, 0, 0], sizes = [1, 32, 8], strides = [1, 1, 1]} : vector<3x32x12xbf16> to vector<1x32x8xbf16>
      %10 = vector.shape_cast %9 : vector<1x32x8xbf16> to vector<32x8xbf16>
      %11 = vector.extract_strided_slice %8 {offsets = [0, 0, 0], sizes = [1, 32, 8], strides = [1, 1, 1]} : vector<3x32x12xbf16> to vector<1x32x8xbf16>
      %12 = vector.shape_cast %11 : vector<1x32x8xbf16> to vector<32x8xbf16>
      %13 = vector.extract_strided_slice %5 {offsets = [0, 0, 1], sizes = [1, 32, 8], strides = [1, 1, 1]} : vector<3x32x12xbf16> to vector<1x32x8xbf16>
      %14 = vector.shape_cast %13 : vector<1x32x8xbf16> to vector<32x8xbf16>
      %15 = vector.extract_strided_slice %8 {offsets = [0, 0, 1], sizes = [1, 32, 8], strides = [1, 1, 1]} : vector<3x32x12xbf16> to vector<1x32x8xbf16>
      %16 = vector.shape_cast %15 : vector<1x32x8xbf16> to vector<32x8xbf16>
      %17 = vector.extract_strided_slice %5 {offsets = [0, 0, 2], sizes = [1, 32, 8], strides = [1, 1, 1]} : vector<3x32x12xbf16> to vector<1x32x8xbf16>
      %18 = vector.shape_cast %17 : vector<1x32x8xbf16> to vector<32x8xbf16>
      %19 = vector.extract_strided_slice %8 {offsets = [0, 0, 2], sizes = [1, 32, 8], strides = [1, 1, 1]} : vector<3x32x12xbf16> to vector<1x32x8xbf16>
      %20 = vector.shape_cast %19 : vector<1x32x8xbf16> to vector<32x8xbf16>
      %21 = vector.extract_strided_slice %5 {offsets = [0, 0, 3], sizes = [1, 32, 8], strides = [1, 1, 1]} : vector<3x32x12xbf16> to vector<1x32x8xbf16>
      %22 = vector.shape_cast %21 : vector<1x32x8xbf16> to vector<32x8xbf16>
      %23 = vector.extract_strided_slice %8 {offsets = [0, 0, 3], sizes = [1, 32, 8], strides = [1, 1, 1]} : vector<3x32x12xbf16> to vector<1x32x8xbf16>
      %24 = vector.shape_cast %23 : vector<1x32x8xbf16> to vector<32x8xbf16>
      %25 = vector.extract_strided_slice %5 {offsets = [0, 0, 4], sizes = [1, 32, 8], strides = [1, 1, 1]} : vector<3x32x12xbf16> to vector<1x32x8xbf16>
      %26 = vector.shape_cast %25 : vector<1x32x8xbf16> to vector<32x8xbf16>
      %27 = vector.extract_strided_slice %5 {offsets = [1, 0, 0], sizes = [1, 32, 8], strides = [1, 1, 1]} : vector<3x32x12xbf16> to vector<1x32x8xbf16>
      %28 = vector.shape_cast %27 : vector<1x32x8xbf16> to vector<32x8xbf16>
      %29 = vector.extract_strided_slice %8 {offsets = [1, 0, 0], sizes = [1, 32, 8], strides = [1, 1, 1]} : vector<3x32x12xbf16> to vector<1x32x8xbf16>
      %30 = vector.shape_cast %29 : vector<1x32x8xbf16> to vector<32x8xbf16>
      %31 = vector.extract_strided_slice %5 {offsets = [1, 0, 1], sizes = [1, 32, 8], strides = [1, 1, 1]} : vector<3x32x12xbf16> to vector<1x32x8xbf16>
      %32 = vector.shape_cast %31 : vector<1x32x8xbf16> to vector<32x8xbf16>
      %33 = vector.extract_strided_slice %8 {offsets = [1, 0, 1], sizes = [1, 32, 8], strides = [1, 1, 1]} : vector<3x32x12xbf16> to vector<1x32x8xbf16>
      %34 = vector.shape_cast %33 : vector<1x32x8xbf16> to vector<32x8xbf16>
      %35 = vector.extract_strided_slice %5 {offsets = [1, 0, 2], sizes = [1, 32, 8], strides = [1, 1, 1]} : vector<3x32x12xbf16> to vector<1x32x8xbf16>
      %36 = vector.shape_cast %35 : vector<1x32x8xbf16> to vector<32x8xbf16>
      %37 = vector.extract_strided_slice %8 {offsets = [1, 0, 2], sizes = [1, 32, 8], strides = [1, 1, 1]} : vector<3x32x12xbf16> to vector<1x32x8xbf16>
      %38 = vector.shape_cast %37 : vector<1x32x8xbf16> to vector<32x8xbf16>
      %39 = vector.extract_strided_slice %5 {offsets = [1, 0, 3], sizes = [1, 32, 8], strides = [1, 1, 1]} : vector<3x32x12xbf16> to vector<1x32x8xbf16>
      %40 = vector.shape_cast %39 : vector<1x32x8xbf16> to vector<32x8xbf16>
      %41 = vector.extract_strided_slice %8 {offsets = [1, 0, 3], sizes = [1, 32, 8], strides = [1, 1, 1]} : vector<3x32x12xbf16> to vector<1x32x8xbf16>
      %42 = vector.shape_cast %41 : vector<1x32x8xbf16> to vector<32x8xbf16>
      %43 = vector.extract_strided_slice %5 {offsets = [1, 0, 4], sizes = [1, 32, 8], strides = [1, 1, 1]} : vector<3x32x12xbf16> to vector<1x32x8xbf16>
      %44 = vector.shape_cast %43 : vector<1x32x8xbf16> to vector<32x8xbf16>
      %45 = vector.extract_strided_slice %5 {offsets = [2, 0, 0], sizes = [1, 32, 8], strides = [1, 1, 1]} : vector<3x32x12xbf16> to vector<1x32x8xbf16>
      %46 = vector.shape_cast %45 : vector<1x32x8xbf16> to vector<32x8xbf16>
      %47 = vector.extract_strided_slice %8 {offsets = [2, 0, 0], sizes = [1, 32, 8], strides = [1, 1, 1]} : vector<3x32x12xbf16> to vector<1x32x8xbf16>
      %48 = vector.shape_cast %47 : vector<1x32x8xbf16> to vector<32x8xbf16>
      %49 = vector.extract_strided_slice %5 {offsets = [2, 0, 1], sizes = [1, 32, 8], strides = [1, 1, 1]} : vector<3x32x12xbf16> to vector<1x32x8xbf16>
      %50 = vector.shape_cast %49 : vector<1x32x8xbf16> to vector<32x8xbf16>
      %51 = vector.extract_strided_slice %8 {offsets = [2, 0, 1], sizes = [1, 32, 8], strides = [1, 1, 1]} : vector<3x32x12xbf16> to vector<1x32x8xbf16>
      %52 = vector.shape_cast %51 : vector<1x32x8xbf16> to vector<32x8xbf16>
      %53 = vector.extract_strided_slice %5 {offsets = [2, 0, 2], sizes = [1, 32, 8], strides = [1, 1, 1]} : vector<3x32x12xbf16> to vector<1x32x8xbf16>
      %54 = vector.shape_cast %53 : vector<1x32x8xbf16> to vector<32x8xbf16>
      %55 = vector.extract_strided_slice %8 {offsets = [2, 0, 2], sizes = [1, 32, 8], strides = [1, 1, 1]} : vector<3x32x12xbf16> to vector<1x32x8xbf16>
      %56 = vector.shape_cast %55 : vector<1x32x8xbf16> to vector<32x8xbf16>
      %57 = vector.extract_strided_slice %5 {offsets = [2, 0, 3], sizes = [1, 32, 8], strides = [1, 1, 1]} : vector<3x32x12xbf16> to vector<1x32x8xbf16>
      %58 = vector.shape_cast %57 : vector<1x32x8xbf16> to vector<32x8xbf16>
      %59 = vector.extract_strided_slice %8 {offsets = [2, 0, 3], sizes = [1, 32, 8], strides = [1, 1, 1]} : vector<3x32x12xbf16> to vector<1x32x8xbf16>
      %60 = vector.shape_cast %59 : vector<1x32x8xbf16> to vector<32x8xbf16>
      %61 = vector.extract_strided_slice %5 {offsets = [2, 0, 4], sizes = [1, 32, 8], strides = [1, 1, 1]} : vector<3x32x12xbf16> to vector<1x32x8xbf16>
      %62 = vector.shape_cast %61 : vector<1x32x8xbf16> to vector<32x8xbf16>
      %63 = tpu.concatenate %10, %12, %14, %16, %18, %20, %22, %24, %26, %28, %30, %32, %34, %36, %38, %40 in 0 : vector<32x8xbf16>, vector<32x8xbf16>, vector<32x8xbf16>, vector<32x8xbf16>, vector<32x8xbf16>, vector<32x8xbf16>, vector<32x8xbf16>, vector<32x8xbf16>, vector<32x8xbf16>, vector<32x8xbf16>, vector<32x8xbf16>, vector<32x8xbf16>, vector<32x8xbf16>, vector<32x8xbf16>, vector<32x8xbf16>, vector<32x8xbf16> -> vector<512x8xbf16>
      %64 = tpu.concatenate %42, %44, %46, %48, %50, %52, %54, %56, %58, %60, %62 in 0 : vector<32x8xbf16>, vector<32x8xbf16>, vector<32x8xbf16>, vector<32x8xbf16>, vector<32x8xbf16>, vector<32x8xbf16>, vector<32x8xbf16>, vector<32x8xbf16>, vector<32x8xbf16>, vector<32x8xbf16>, vector<32x8xbf16> -> vector<352x8xbf16>
      %65 = tpu.concatenate %63, %64 in 0 : vector<512x8xbf16>, vector<352x8xbf16> -> vector<864x8xbf16>
      %cst = arith.constant dense<0.000000e+00> : vector<32x8xf32>
      %66 = tpu.matmul %0, %65, %cst {dimension_numbers = #tpu.dot_dimension_numbers<[1], [0], [0], [1], [0, 0, 1, 1], [], []>} : vector<32x864xbf16>, vector<864x8xbf16>, vector<32x8xf32> -> vector<32x8xf32>
      %67 = vector.broadcast %1 : vector<32x1xf32> to vector<32x8xf32>
      %68 = arith.addf %66, %67 : vector<32x8xf32>
      %cst_10 = arith.constant 0.000000e+00 : f32
      %69 = vector.broadcast %cst_10 : f32 to vector<32x8xf32>
      %70 = arith.cmpf oge, %68, %69 : vector<32x8xf32>
      %cst_11 = arith.constant 1.000000e-01 : f32
      %71 = vector.broadcast %cst_11 : f32 to vector<32x8xf32>
      %72 = arith.mulf %71, %68 : vector<32x8xf32>
      %73 = arith.select %70, %68, %72 : vector<32x8xi1>, vector<32x8xf32>
      %74 = vector.shape_cast %73 : vector<32x8xf32> to vector<1x32x8xf32>
      %75 = arith.truncf %74 : vector<1x32x8xf32> to vector<1x32x8xbf16>
      %c0_12 = arith.constant 0 : index
      %76 = arith.index_cast %arg6 : i32 to index
      %c0_13 = arith.constant 0 : index
      %c0_14 = arith.constant 0 : index
      %77 = vector.load %arg5[%c0_12, %76, %c0_13, %c0_14] : memref<1x65x32x8xbf16, #tpu.memory_space<vmem>>, vector<1x1x32x8xbf16>
      %78 = vector.shape_cast %77 : vector<1x1x32x8xbf16> to vector<1x32x8xbf16>
      %79 = vector.shape_cast %75 : vector<1x32x8xbf16> to vector<1x1x32x8xbf16>
      tpu.vector_store %arg5[%c0_12, %76, %c0_13, %c0_14], %79 {strides = array<i32>} : memref<1x65x32x8xbf16, #tpu.memory_space<vmem>>, vector<1x1x32x8xbf16>,
    }
    %c65_i32_3 = arith.constant 65 : i32
    return
  }
  func.func @transform_0(%arg0: i32) -> (i32, i32) {
    %c0_i32 = arith.constant 0 : i32
    %c0_i32_0 = arith.constant 0 : i32
    %c0_i32_1 = arith.constant 0 : i32
    return %c0_i32, %c0_i32_0 : i32, i32
  }
  func.func @transform_1(%arg0: i32) -> (i32, i32) {
    %c0_i32 = arith.constant 0 : i32
    %c0_i32_0 = arith.constant 0 : i32
    %c0_i32_1 = arith.constant 0 : i32
    return %c0_i32, %c0_i32_0 : i32, i32
  }
  func.func @transform_2(%arg0: i32) -> (i32, i32, i32, i32) {
    %c0_i32 = arith.constant 0 : i32
    %c0_i32_0 = arith.constant 0 : i32
    %c0_i32_1 = arith.constant 0 : i32
    %c0_i32_2 = arith.constant 0 : i32
    return %arg0, %c0_i32, %c0_i32_0, %c0_i32_1 : i32, i32, i32, i32
  }
  func.func @transform_3(%arg0: i32) -> (i32, i32, i32, i32) {
    %c0_i32 = arith.constant 0 : i32
    %c0_i32_0 = arith.constant 0 : i32
    %c0_i32_1 = arith.constant 0 : i32
    %c0_i32_2 = arith.constant 0 : i32
    return %arg0, %c0_i32, %c0_i32_0, %c0_i32_1 : i32, i32, i32, i32
  }
  func.func @transform_4(%arg0: i32) -> (i32, i32, i32, i32) {
    %c0_i32 = arith.constant 0 : i32
    %c0_i32_0 = arith.constant 0 : i32
    %c0_i32_1 = arith.constant 0 : i32
    %c0_i32_2 = arith.constant 0 : i32
    return %arg0, %c0_i32, %c0_i32_0, %c0_i32_1 : i32, i32, i32, i32
  }
}

module attributes {stable_mosaic.version = 11 : i64} {
  func.func @_conv_kernel(%arg0: i32, %arg1: memref<32x864xbf16, #tpu.memory_space<vmem>>, %arg2: memref<32x1xf32, #tpu.memory_space<vmem>>, %arg3: memref<1x67x32x8xbf16, #tpu.memory_space<vmem>>, %arg4: memref<1x67x32x8xbf16, #tpu.memory_space<vmem>>, %arg5: memref<1x65x32x4xbf16, #tpu.memory_space<vmem>>) attributes {dimension_semantics = [#tpu.dimension_semantics<parallel>], iteration_bounds = array<i64: 2>, scalar_prefetch = 0 : i64, scratch_operands = 0 : i64, tpu.core_type = #tpu.core_type<tc>, window_params = [{pipeline_mode = #tpu.pipeline_mode<synchronous>, transform_indices = @transform_0, window_bounds = array<i64: 32, 864>}, {pipeline_mode = #tpu.pipeline_mode<synchronous>, transform_indices = @transform_1, window_bounds = array<i64: 32, 1>}, {transform_indices = @transform_2, window_bounds = array<i64: 1, 67, 32, 8>}, {transform_indices = @transform_3, window_bounds = array<i64: 1, 67, 32, 8>}, {transform_indices = @transform_4, window_bounds = array<i64: 1, 65, 32, 4>}]} {
    %c0 = arith.constant 0 : index
    %c0_0 = arith.constant 0 : index
    %0 = vector.load %arg1[%c0, %c0_0] : memref<32x864xbf16, #tpu.memory_space<vmem>>, vector<32x864xbf16>
    %c0_1 = arith.constant 0 : index
    %c0_2 = arith.constant 0 : index
    %1 = vector.load %arg2[%c0_1, %c0_2] : memref<32x1xf32, #tpu.memory_space<vmem>>, vector<32x1xf32>
    %c0_i32 = arith.constant 0 : i32
    %c65_i32 = arith.constant 65 : i32
    %2 = arith.addi %c0_i32, %c65_i32 : i32
    %c1_i32 = arith.constant 1 : i32
    scf.for %arg6 = %c0_i32 to %2 step %c1_i32  : i32 {
      %c0_4 = arith.constant 0 : index
      %3 = arith.index_cast %arg6 : i32 to index
      %c0_5 = arith.constant 0 : index
      %c0_6 = arith.constant 0 : index
      %4 = vector.load %arg3[%c0_4, %3, %c0_5, %c0_6] : memref<1x67x32x8xbf16, #tpu.memory_space<vmem>>, vector<1x3x32x8xbf16>
      %5 = vector.shape_cast %4 : vector<1x3x32x8xbf16> to vector<3x32x8xbf16>
      %c0_7 = arith.constant 0 : index
      %6 = arith.index_cast %arg6 : i32 to index
      %c0_8 = arith.constant 0 : index
      %c0_9 = arith.constant 0 : index
      %7 = vector.load %arg4[%c0_7, %6, %c0_8, %c0_9] : memref<1x67x32x8xbf16, #tpu.memory_space<vmem>>, vector<1x3x32x8xbf16>
      %8 = vector.shape_cast %7 : vector<1x3x32x8xbf16> to vector<3x32x8xbf16>
      %9 = vector.extract_strided_slice %5 {offsets = [0, 0, 0], sizes = [1, 32, 4], strides = [1, 1, 1]} : vector<3x32x8xbf16> to vector<1x32x4xbf16>
      %10 = vector.shape_cast %9 : vector<1x32x4xbf16> to vector<32x4xbf16>
      %11 = vector.extract_strided_slice %8 {offsets = [0, 0, 0], sizes = [1, 32, 4], strides = [1, 1, 1]} : vector<3x32x8xbf16> to vector<1x32x4xbf16>
      %12 = vector.shape_cast %11 : vector<1x32x4xbf16> to vector<32x4xbf16>
      %13 = vector.extract_strided_slice %5 {offsets = [0, 0, 1], sizes = [1, 32, 4], strides = [1, 1, 1]} : vector<3x32x8xbf16> to vector<1x32x4xbf16>
      %14 = vector.shape_cast %13 : vector<1x32x4xbf16> to vector<32x4xbf16>
      %15 = vector.extract_strided_slice %8 {offsets = [0, 0, 1], sizes = [1, 32, 4], strides = [1, 1, 1]} : vector<3x32x8xbf16> to vector<1x32x4xbf16>
      %16 = vector.shape_cast %15 : vector<1x32x4xbf16> to vector<32x4xbf16>
      %17 = vector.extract_strided_slice %5 {offsets = [0, 0, 2], sizes = [1, 32, 4], strides = [1, 1, 1]} : vector<3x32x8xbf16> to vector<1x32x4xbf16>
      %18 = vector.shape_cast %17 : vector<1x32x4xbf16> to vector<32x4xbf16>
      %19 = vector.extract_strided_slice %8 {offsets = [0, 0, 2], sizes = [1, 32, 4], strides = [1, 1, 1]} : vector<3x32x8xbf16> to vector<1x32x4xbf16>
      %20 = vector.shape_cast %19 : vector<1x32x4xbf16> to vector<32x4xbf16>
      %21 = vector.extract_strided_slice %5 {offsets = [0, 0, 3], sizes = [1, 32, 4], strides = [1, 1, 1]} : vector<3x32x8xbf16> to vector<1x32x4xbf16>
      %22 = vector.shape_cast %21 : vector<1x32x4xbf16> to vector<32x4xbf16>
      %23 = vector.extract_strided_slice %8 {offsets = [0, 0, 3], sizes = [1, 32, 4], strides = [1, 1, 1]} : vector<3x32x8xbf16> to vector<1x32x4xbf16>
      %24 = vector.shape_cast %23 : vector<1x32x4xbf16> to vector<32x4xbf16>
      %25 = vector.extract_strided_slice %5 {offsets = [0, 0, 4], sizes = [1, 32, 4], strides = [1, 1, 1]} : vector<3x32x8xbf16> to vector<1x32x4xbf16>
      %26 = vector.shape_cast %25 : vector<1x32x4xbf16> to vector<32x4xbf16>
      %27 = vector.extract_strided_slice %5 {offsets = [1, 0, 0], sizes = [1, 32, 4], strides = [1, 1, 1]} : vector<3x32x8xbf16> to vector<1x32x4xbf16>
      %28 = vector.shape_cast %27 : vector<1x32x4xbf16> to vector<32x4xbf16>
      %29 = vector.extract_strided_slice %8 {offsets = [1, 0, 0], sizes = [1, 32, 4], strides = [1, 1, 1]} : vector<3x32x8xbf16> to vector<1x32x4xbf16>
      %30 = vector.shape_cast %29 : vector<1x32x4xbf16> to vector<32x4xbf16>
      %31 = vector.extract_strided_slice %5 {offsets = [1, 0, 1], sizes = [1, 32, 4], strides = [1, 1, 1]} : vector<3x32x8xbf16> to vector<1x32x4xbf16>
      %32 = vector.shape_cast %31 : vector<1x32x4xbf16> to vector<32x4xbf16>
      %33 = vector.extract_strided_slice %8 {offsets = [1, 0, 1], sizes = [1, 32, 4], strides = [1, 1, 1]} : vector<3x32x8xbf16> to vector<1x32x4xbf16>
      %34 = vector.shape_cast %33 : vector<1x32x4xbf16> to vector<32x4xbf16>
      %35 = vector.extract_strided_slice %5 {offsets = [1, 0, 2], sizes = [1, 32, 4], strides = [1, 1, 1]} : vector<3x32x8xbf16> to vector<1x32x4xbf16>
      %36 = vector.shape_cast %35 : vector<1x32x4xbf16> to vector<32x4xbf16>
      %37 = vector.extract_strided_slice %8 {offsets = [1, 0, 2], sizes = [1, 32, 4], strides = [1, 1, 1]} : vector<3x32x8xbf16> to vector<1x32x4xbf16>
      %38 = vector.shape_cast %37 : vector<1x32x4xbf16> to vector<32x4xbf16>
      %39 = vector.extract_strided_slice %5 {offsets = [1, 0, 3], sizes = [1, 32, 4], strides = [1, 1, 1]} : vector<3x32x8xbf16> to vector<1x32x4xbf16>
      %40 = vector.shape_cast %39 : vector<1x32x4xbf16> to vector<32x4xbf16>
      %41 = vector.extract_strided_slice %8 {offsets = [1, 0, 3], sizes = [1, 32, 4], strides = [1, 1, 1]} : vector<3x32x8xbf16> to vector<1x32x4xbf16>
      %42 = vector.shape_cast %41 : vector<1x32x4xbf16> to vector<32x4xbf16>
      %43 = vector.extract_strided_slice %5 {offsets = [1, 0, 4], sizes = [1, 32, 4], strides = [1, 1, 1]} : vector<3x32x8xbf16> to vector<1x32x4xbf16>
      %44 = vector.shape_cast %43 : vector<1x32x4xbf16> to vector<32x4xbf16>
      %45 = vector.extract_strided_slice %5 {offsets = [2, 0, 0], sizes = [1, 32, 4], strides = [1, 1, 1]} : vector<3x32x8xbf16> to vector<1x32x4xbf16>
      %46 = vector.shape_cast %45 : vector<1x32x4xbf16> to vector<32x4xbf16>
      %47 = vector.extract_strided_slice %8 {offsets = [2, 0, 0], sizes = [1, 32, 4], strides = [1, 1, 1]} : vector<3x32x8xbf16> to vector<1x32x4xbf16>
      %48 = vector.shape_cast %47 : vector<1x32x4xbf16> to vector<32x4xbf16>
      %49 = vector.extract_strided_slice %5 {offsets = [2, 0, 1], sizes = [1, 32, 4], strides = [1, 1, 1]} : vector<3x32x8xbf16> to vector<1x32x4xbf16>
      %50 = vector.shape_cast %49 : vector<1x32x4xbf16> to vector<32x4xbf16>
      %51 = vector.extract_strided_slice %8 {offsets = [2, 0, 1], sizes = [1, 32, 4], strides = [1, 1, 1]} : vector<3x32x8xbf16> to vector<1x32x4xbf16>
      %52 = vector.shape_cast %51 : vector<1x32x4xbf16> to vector<32x4xbf16>
      %53 = vector.extract_strided_slice %5 {offsets = [2, 0, 2], sizes = [1, 32, 4], strides = [1, 1, 1]} : vector<3x32x8xbf16> to vector<1x32x4xbf16>
      %54 = vector.shape_cast %53 : vector<1x32x4xbf16> to vector<32x4xbf16>
      %55 = vector.extract_strided_slice %8 {offsets = [2, 0, 2], sizes = [1, 32, 4], strides = [1, 1, 1]} : vector<3x32x8xbf16> to vector<1x32x4xbf16>
      %56 = vector.shape_cast %55 : vector<1x32x4xbf16> to vector<32x4xbf16>
      %57 = vector.extract_strided_slice %5 {offsets = [2, 0, 3], sizes = [1, 32, 4], strides = [1, 1, 1]} : vector<3x32x8xbf16> to vector<1x32x4xbf16>
      %58 = vector.shape_cast %57 : vector<1x32x4xbf16> to vector<32x4xbf16>
      %59 = vector.extract_strided_slice %8 {offsets = [2, 0, 3], sizes = [1, 32, 4], strides = [1, 1, 1]} : vector<3x32x8xbf16> to vector<1x32x4xbf16>
      %60 = vector.shape_cast %59 : vector<1x32x4xbf16> to vector<32x4xbf16>
      %61 = vector.extract_strided_slice %5 {offsets = [2, 0, 4], sizes = [1, 32, 4], strides = [1, 1, 1]} : vector<3x32x8xbf16> to vector<1x32x4xbf16>
      %62 = vector.shape_cast %61 : vector<1x32x4xbf16> to vector<32x4xbf16>
      %63 = tpu.concatenate %10, %12, %14, %16, %18, %20, %22, %24, %26, %28, %30, %32, %34, %36, %38, %40 in 0 : vector<32x4xbf16>, vector<32x4xbf16>, vector<32x4xbf16>, vector<32x4xbf16>, vector<32x4xbf16>, vector<32x4xbf16>, vector<32x4xbf16>, vector<32x4xbf16>, vector<32x4xbf16>, vector<32x4xbf16>, vector<32x4xbf16>, vector<32x4xbf16>, vector<32x4xbf16>, vector<32x4xbf16>, vector<32x4xbf16>, vector<32x4xbf16> -> vector<512x4xbf16>
      %64 = tpu.concatenate %42, %44, %46, %48, %50, %52, %54, %56, %58, %60, %62 in 0 : vector<32x4xbf16>, vector<32x4xbf16>, vector<32x4xbf16>, vector<32x4xbf16>, vector<32x4xbf16>, vector<32x4xbf16>, vector<32x4xbf16>, vector<32x4xbf16>, vector<32x4xbf16>, vector<32x4xbf16>, vector<32x4xbf16> -> vector<352x4xbf16>
      %65 = tpu.concatenate %63, %64 in 0 : vector<512x4xbf16>, vector<352x4xbf16> -> vector<864x4xbf16>
      %cst = arith.constant dense<0.000000e+00> : vector<32x4xf32>
      %66 = tpu.matmul %0, %65, %cst {dimension_numbers = #tpu.dot_dimension_numbers<[1], [0], [0], [1], [0, 0, 1, 1], [], []>} : vector<32x864xbf16>, vector<864x4xbf16>, vector<32x4xf32> -> vector<32x4xf32>
      %67 = vector.broadcast %1 : vector<32x1xf32> to vector<32x4xf32>
      %68 = arith.addf %66, %67 : vector<32x4xf32>
      %cst_10 = arith.constant 0.000000e+00 : f32
      %69 = vector.broadcast %cst_10 : f32 to vector<32x4xf32>
      %70 = arith.cmpf oge, %68, %69 : vector<32x4xf32>
      %cst_11 = arith.constant 1.000000e-01 : f32
      %71 = vector.broadcast %cst_11 : f32 to vector<32x4xf32>
      %72 = arith.mulf %71, %68 : vector<32x4xf32>
      %73 = arith.select %70, %68, %72 : vector<32x4xi1>, vector<32x4xf32>
      %74 = vector.shape_cast %73 : vector<32x4xf32> to vector<1x32x4xf32>
      %75 = arith.truncf %74 : vector<1x32x4xf32> to vector<1x32x4xbf16>
      %c0_12 = arith.constant 0 : index
      %76 = arith.index_cast %arg6 : i32 to index
      %c0_13 = arith.constant 0 : index
      %c0_14 = arith.constant 0 : index
      %77 = vector.load %arg5[%c0_12, %76, %c0_13, %c0_14] : memref<1x65x32x4xbf16, #tpu.memory_space<vmem>>, vector<1x1x32x4xbf16>
      %78 = vector.shape_cast %77 : vector<1x1x32x4xbf16> to vector<1x32x4xbf16>
      %79 = vector.shape_cast %75 : vector<1x32x4xbf16> to vector<1x1x32x4xbf16>
      tpu.vector_store %arg5[%c0_12, %76, %c0_13, %c0_14], %79 {strides = array<i32>} : memref<1x65x32x4xbf16, #tpu.memory_space<vmem>>, vector<1x1x32x4xbf16>,
    }
    %c65_i32_3 = arith.constant 65 : i32
    return
  }
  func.func @transform_0(%arg0: i32) -> (i32, i32) {
    %c0_i32 = arith.constant 0 : i32
    %c0_i32_0 = arith.constant 0 : i32
    %c0_i32_1 = arith.constant 0 : i32
    return %c0_i32, %c0_i32_0 : i32, i32
  }
  func.func @transform_1(%arg0: i32) -> (i32, i32) {
    %c0_i32 = arith.constant 0 : i32
    %c0_i32_0 = arith.constant 0 : i32
    %c0_i32_1 = arith.constant 0 : i32
    return %c0_i32, %c0_i32_0 : i32, i32
  }
  func.func @transform_2(%arg0: i32) -> (i32, i32, i32, i32) {
    %c0_i32 = arith.constant 0 : i32
    %c0_i32_0 = arith.constant 0 : i32
    %c0_i32_1 = arith.constant 0 : i32
    %c0_i32_2 = arith.constant 0 : i32
    return %arg0, %c0_i32, %c0_i32_0, %c0_i32_1 : i32, i32, i32, i32
  }
  func.func @transform_3(%arg0: i32) -> (i32, i32, i32, i32) {
    %c0_i32 = arith.constant 0 : i32
    %c0_i32_0 = arith.constant 0 : i32
    %c0_i32_1 = arith.constant 0 : i32
    %c0_i32_2 = arith.constant 0 : i32
    return %arg0, %c0_i32, %c0_i32_0, %c0_i32_1 : i32, i32, i32, i32
  }
  func.func @transform_4(%arg0: i32) -> (i32, i32, i32, i32) {
    %c0_i32 = arith.constant 0 : i32
    %c0_i32_0 = arith.constant 0 : i32
    %c0_i32_1 = arith.constant 0 : i32
    %c0_i32_2 = arith.constant 0 : i32
    return %arg0, %c0_i32, %c0_i32_0, %c0_i32_1 : i32, i32, i32, i32
  }
}

module attributes {stable_mosaic.version = 11 : i64} {
  func.func @_conv_kernel(%arg0: i32, %arg1: memref<32x864xbf16, #tpu.memory_space<vmem>>, %arg2: memref<32x1xf32, #tpu.memory_space<vmem>>, %arg3: memref<1x67x32x6xbf16, #tpu.memory_space<vmem>>, %arg4: memref<1x67x32x6xbf16, #tpu.memory_space<vmem>>, %arg5: memref<1x65x32x2xbf16, #tpu.memory_space<vmem>>) attributes {dimension_semantics = [#tpu.dimension_semantics<parallel>], iteration_bounds = array<i64: 2>, scalar_prefetch = 0 : i64, scratch_operands = 0 : i64, tpu.core_type = #tpu.core_type<tc>, window_params = [{pipeline_mode = #tpu.pipeline_mode<synchronous>, transform_indices = @transform_0, window_bounds = array<i64: 32, 864>}, {pipeline_mode = #tpu.pipeline_mode<synchronous>, transform_indices = @transform_1, window_bounds = array<i64: 32, 1>}, {transform_indices = @transform_2, window_bounds = array<i64: 1, 67, 32, 6>}, {transform_indices = @transform_3, window_bounds = array<i64: 1, 67, 32, 6>}, {transform_indices = @transform_4, window_bounds = array<i64: 1, 65, 32, 2>}]} {
    %c0 = arith.constant 0 : index
    %c0_0 = arith.constant 0 : index
    %0 = vector.load %arg1[%c0, %c0_0] : memref<32x864xbf16, #tpu.memory_space<vmem>>, vector<32x864xbf16>
    %c0_1 = arith.constant 0 : index
    %c0_2 = arith.constant 0 : index
    %1 = vector.load %arg2[%c0_1, %c0_2] : memref<32x1xf32, #tpu.memory_space<vmem>>, vector<32x1xf32>
    %c0_i32 = arith.constant 0 : i32
    %c65_i32 = arith.constant 65 : i32
    %2 = arith.addi %c0_i32, %c65_i32 : i32
    %c1_i32 = arith.constant 1 : i32
    scf.for %arg6 = %c0_i32 to %2 step %c1_i32  : i32 {
      %c0_4 = arith.constant 0 : index
      %3 = arith.index_cast %arg6 : i32 to index
      %c0_5 = arith.constant 0 : index
      %c0_6 = arith.constant 0 : index
      %4 = vector.load %arg3[%c0_4, %3, %c0_5, %c0_6] : memref<1x67x32x6xbf16, #tpu.memory_space<vmem>>, vector<1x3x32x6xbf16>
      %5 = vector.shape_cast %4 : vector<1x3x32x6xbf16> to vector<3x32x6xbf16>
      %c0_7 = arith.constant 0 : index
      %6 = arith.index_cast %arg6 : i32 to index
      %c0_8 = arith.constant 0 : index
      %c0_9 = arith.constant 0 : index
      %7 = vector.load %arg4[%c0_7, %6, %c0_8, %c0_9] : memref<1x67x32x6xbf16, #tpu.memory_space<vmem>>, vector<1x3x32x6xbf16>
      %8 = vector.shape_cast %7 : vector<1x3x32x6xbf16> to vector<3x32x6xbf16>
      %9 = vector.extract_strided_slice %5 {offsets = [0, 0, 0], sizes = [1, 32, 2], strides = [1, 1, 1]} : vector<3x32x6xbf16> to vector<1x32x2xbf16>
      %10 = vector.shape_cast %9 : vector<1x32x2xbf16> to vector<32x2xbf16>
      %11 = vector.extract_strided_slice %8 {offsets = [0, 0, 0], sizes = [1, 32, 2], strides = [1, 1, 1]} : vector<3x32x6xbf16> to vector<1x32x2xbf16>
      %12 = vector.shape_cast %11 : vector<1x32x2xbf16> to vector<32x2xbf16>
      %13 = vector.extract_strided_slice %5 {offsets = [0, 0, 1], sizes = [1, 32, 2], strides = [1, 1, 1]} : vector<3x32x6xbf16> to vector<1x32x2xbf16>
      %14 = vector.shape_cast %13 : vector<1x32x2xbf16> to vector<32x2xbf16>
      %15 = vector.extract_strided_slice %8 {offsets = [0, 0, 1], sizes = [1, 32, 2], strides = [1, 1, 1]} : vector<3x32x6xbf16> to vector<1x32x2xbf16>
      %16 = vector.shape_cast %15 : vector<1x32x2xbf16> to vector<32x2xbf16>
      %17 = vector.extract_strided_slice %5 {offsets = [0, 0, 2], sizes = [1, 32, 2], strides = [1, 1, 1]} : vector<3x32x6xbf16> to vector<1x32x2xbf16>
      %18 = vector.shape_cast %17 : vector<1x32x2xbf16> to vector<32x2xbf16>
      %19 = vector.extract_strided_slice %8 {offsets = [0, 0, 2], sizes = [1, 32, 2], strides = [1, 1, 1]} : vector<3x32x6xbf16> to vector<1x32x2xbf16>
      %20 = vector.shape_cast %19 : vector<1x32x2xbf16> to vector<32x2xbf16>
      %21 = vector.extract_strided_slice %5 {offsets = [0, 0, 3], sizes = [1, 32, 2], strides = [1, 1, 1]} : vector<3x32x6xbf16> to vector<1x32x2xbf16>
      %22 = vector.shape_cast %21 : vector<1x32x2xbf16> to vector<32x2xbf16>
      %23 = vector.extract_strided_slice %8 {offsets = [0, 0, 3], sizes = [1, 32, 2], strides = [1, 1, 1]} : vector<3x32x6xbf16> to vector<1x32x2xbf16>
      %24 = vector.shape_cast %23 : vector<1x32x2xbf16> to vector<32x2xbf16>
      %25 = vector.extract_strided_slice %5 {offsets = [0, 0, 4], sizes = [1, 32, 2], strides = [1, 1, 1]} : vector<3x32x6xbf16> to vector<1x32x2xbf16>
      %26 = vector.shape_cast %25 : vector<1x32x2xbf16> to vector<32x2xbf16>
      %27 = vector.extract_strided_slice %5 {offsets = [1, 0, 0], sizes = [1, 32, 2], strides = [1, 1, 1]} : vector<3x32x6xbf16> to vector<1x32x2xbf16>
      %28 = vector.shape_cast %27 : vector<1x32x2xbf16> to vector<32x2xbf16>
      %29 = vector.extract_strided_slice %8 {offsets = [1, 0, 0], sizes = [1, 32, 2], strides = [1, 1, 1]} : vector<3x32x6xbf16> to vector<1x32x2xbf16>
      %30 = vector.shape_cast %29 : vector<1x32x2xbf16> to vector<32x2xbf16>
      %31 = vector.extract_strided_slice %5 {offsets = [1, 0, 1], sizes = [1, 32, 2], strides = [1, 1, 1]} : vector<3x32x6xbf16> to vector<1x32x2xbf16>
      %32 = vector.shape_cast %31 : vector<1x32x2xbf16> to vector<32x2xbf16>
      %33 = vector.extract_strided_slice %8 {offsets = [1, 0, 1], sizes = [1, 32, 2], strides = [1, 1, 1]} : vector<3x32x6xbf16> to vector<1x32x2xbf16>
      %34 = vector.shape_cast %33 : vector<1x32x2xbf16> to vector<32x2xbf16>
      %35 = vector.extract_strided_slice %5 {offsets = [1, 0, 2], sizes = [1, 32, 2], strides = [1, 1, 1]} : vector<3x32x6xbf16> to vector<1x32x2xbf16>
      %36 = vector.shape_cast %35 : vector<1x32x2xbf16> to vector<32x2xbf16>
      %37 = vector.extract_strided_slice %8 {offsets = [1, 0, 2], sizes = [1, 32, 2], strides = [1, 1, 1]} : vector<3x32x6xbf16> to vector<1x32x2xbf16>
      %38 = vector.shape_cast %37 : vector<1x32x2xbf16> to vector<32x2xbf16>
      %39 = vector.extract_strided_slice %5 {offsets = [1, 0, 3], sizes = [1, 32, 2], strides = [1, 1, 1]} : vector<3x32x6xbf16> to vector<1x32x2xbf16>
      %40 = vector.shape_cast %39 : vector<1x32x2xbf16> to vector<32x2xbf16>
      %41 = vector.extract_strided_slice %8 {offsets = [1, 0, 3], sizes = [1, 32, 2], strides = [1, 1, 1]} : vector<3x32x6xbf16> to vector<1x32x2xbf16>
      %42 = vector.shape_cast %41 : vector<1x32x2xbf16> to vector<32x2xbf16>
      %43 = vector.extract_strided_slice %5 {offsets = [1, 0, 4], sizes = [1, 32, 2], strides = [1, 1, 1]} : vector<3x32x6xbf16> to vector<1x32x2xbf16>
      %44 = vector.shape_cast %43 : vector<1x32x2xbf16> to vector<32x2xbf16>
      %45 = vector.extract_strided_slice %5 {offsets = [2, 0, 0], sizes = [1, 32, 2], strides = [1, 1, 1]} : vector<3x32x6xbf16> to vector<1x32x2xbf16>
      %46 = vector.shape_cast %45 : vector<1x32x2xbf16> to vector<32x2xbf16>
      %47 = vector.extract_strided_slice %8 {offsets = [2, 0, 0], sizes = [1, 32, 2], strides = [1, 1, 1]} : vector<3x32x6xbf16> to vector<1x32x2xbf16>
      %48 = vector.shape_cast %47 : vector<1x32x2xbf16> to vector<32x2xbf16>
      %49 = vector.extract_strided_slice %5 {offsets = [2, 0, 1], sizes = [1, 32, 2], strides = [1, 1, 1]} : vector<3x32x6xbf16> to vector<1x32x2xbf16>
      %50 = vector.shape_cast %49 : vector<1x32x2xbf16> to vector<32x2xbf16>
      %51 = vector.extract_strided_slice %8 {offsets = [2, 0, 1], sizes = [1, 32, 2], strides = [1, 1, 1]} : vector<3x32x6xbf16> to vector<1x32x2xbf16>
      %52 = vector.shape_cast %51 : vector<1x32x2xbf16> to vector<32x2xbf16>
      %53 = vector.extract_strided_slice %5 {offsets = [2, 0, 2], sizes = [1, 32, 2], strides = [1, 1, 1]} : vector<3x32x6xbf16> to vector<1x32x2xbf16>
      %54 = vector.shape_cast %53 : vector<1x32x2xbf16> to vector<32x2xbf16>
      %55 = vector.extract_strided_slice %8 {offsets = [2, 0, 2], sizes = [1, 32, 2], strides = [1, 1, 1]} : vector<3x32x6xbf16> to vector<1x32x2xbf16>
      %56 = vector.shape_cast %55 : vector<1x32x2xbf16> to vector<32x2xbf16>
      %57 = vector.extract_strided_slice %5 {offsets = [2, 0, 3], sizes = [1, 32, 2], strides = [1, 1, 1]} : vector<3x32x6xbf16> to vector<1x32x2xbf16>
      %58 = vector.shape_cast %57 : vector<1x32x2xbf16> to vector<32x2xbf16>
      %59 = vector.extract_strided_slice %8 {offsets = [2, 0, 3], sizes = [1, 32, 2], strides = [1, 1, 1]} : vector<3x32x6xbf16> to vector<1x32x2xbf16>
      %60 = vector.shape_cast %59 : vector<1x32x2xbf16> to vector<32x2xbf16>
      %61 = vector.extract_strided_slice %5 {offsets = [2, 0, 4], sizes = [1, 32, 2], strides = [1, 1, 1]} : vector<3x32x6xbf16> to vector<1x32x2xbf16>
      %62 = vector.shape_cast %61 : vector<1x32x2xbf16> to vector<32x2xbf16>
      %63 = tpu.concatenate %10, %12, %14, %16, %18, %20, %22, %24, %26, %28, %30, %32, %34, %36, %38, %40 in 0 : vector<32x2xbf16>, vector<32x2xbf16>, vector<32x2xbf16>, vector<32x2xbf16>, vector<32x2xbf16>, vector<32x2xbf16>, vector<32x2xbf16>, vector<32x2xbf16>, vector<32x2xbf16>, vector<32x2xbf16>, vector<32x2xbf16>, vector<32x2xbf16>, vector<32x2xbf16>, vector<32x2xbf16>, vector<32x2xbf16>, vector<32x2xbf16> -> vector<512x2xbf16>
      %64 = tpu.concatenate %42, %44, %46, %48, %50, %52, %54, %56, %58, %60, %62 in 0 : vector<32x2xbf16>, vector<32x2xbf16>, vector<32x2xbf16>, vector<32x2xbf16>, vector<32x2xbf16>, vector<32x2xbf16>, vector<32x2xbf16>, vector<32x2xbf16>, vector<32x2xbf16>, vector<32x2xbf16>, vector<32x2xbf16> -> vector<352x2xbf16>
      %65 = tpu.concatenate %63, %64 in 0 : vector<512x2xbf16>, vector<352x2xbf16> -> vector<864x2xbf16>
      %cst = arith.constant dense<0.000000e+00> : vector<32x2xf32>
      %66 = tpu.matmul %0, %65, %cst {dimension_numbers = #tpu.dot_dimension_numbers<[1], [0], [0], [1], [0, 0, 1, 1], [], []>} : vector<32x864xbf16>, vector<864x2xbf16>, vector<32x2xf32> -> vector<32x2xf32>
      %67 = vector.broadcast %1 : vector<32x1xf32> to vector<32x2xf32>
      %68 = arith.addf %66, %67 : vector<32x2xf32>
      %cst_10 = arith.constant 0.000000e+00 : f32
      %69 = vector.broadcast %cst_10 : f32 to vector<32x2xf32>
      %70 = arith.cmpf oge, %68, %69 : vector<32x2xf32>
      %cst_11 = arith.constant 1.000000e-01 : f32
      %71 = vector.broadcast %cst_11 : f32 to vector<32x2xf32>
      %72 = arith.mulf %71, %68 : vector<32x2xf32>
      %73 = arith.select %70, %68, %72 : vector<32x2xi1>, vector<32x2xf32>
      %74 = vector.shape_cast %73 : vector<32x2xf32> to vector<1x32x2xf32>
      %75 = arith.truncf %74 : vector<1x32x2xf32> to vector<1x32x2xbf16>
      %c0_12 = arith.constant 0 : index
      %76 = arith.index_cast %arg6 : i32 to index
      %c0_13 = arith.constant 0 : index
      %c0_14 = arith.constant 0 : index
      %77 = vector.load %arg5[%c0_12, %76, %c0_13, %c0_14] : memref<1x65x32x2xbf16, #tpu.memory_space<vmem>>, vector<1x1x32x2xbf16>
      %78 = vector.shape_cast %77 : vector<1x1x32x2xbf16> to vector<1x32x2xbf16>
      %79 = vector.shape_cast %75 : vector<1x32x2xbf16> to vector<1x1x32x2xbf16>
      tpu.vector_store %arg5[%c0_12, %76, %c0_13, %c0_14], %79 {strides = array<i32>} : memref<1x65x32x2xbf16, #tpu.memory_space<vmem>>, vector<1x1x32x2xbf16>,
    }
    %c65_i32_3 = arith.constant 65 : i32
    return
  }
  func.func @transform_0(%arg0: i32) -> (i32, i32) {
    %c0_i32 = arith.constant 0 : i32
    %c0_i32_0 = arith.constant 0 : i32
    %c0_i32_1 = arith.constant 0 : i32
    return %c0_i32, %c0_i32_0 : i32, i32
  }
  func.func @transform_1(%arg0: i32) -> (i32, i32) {
    %c0_i32 = arith.constant 0 : i32
    %c0_i32_0 = arith.constant 0 : i32
    %c0_i32_1 = arith.constant 0 : i32
    return %c0_i32, %c0_i32_0 : i32, i32
  }
  func.func @transform_2(%arg0: i32) -> (i32, i32, i32, i32) {
    %c0_i32 = arith.constant 0 : i32
    %c0_i32_0 = arith.constant 0 : i32
    %c0_i32_1 = arith.constant 0 : i32
    %c0_i32_2 = arith.constant 0 : i32
    return %arg0, %c0_i32, %c0_i32_0, %c0_i32_1 : i32, i32, i32, i32
  }
  func.func @transform_3(%arg0: i32) -> (i32, i32, i32, i32) {
    %c0_i32 = arith.constant 0 : i32
    %c0_i32_0 = arith.constant 0 : i32
    %c0_i32_1 = arith.constant 0 : i32
    %c0_i32_2 = arith.constant 0 : i32
    return %arg0, %c0_i32, %c0_i32_0, %c0_i32_1 : i32, i32, i32, i32
  }
  func.func @transform_4(%arg0: i32) -> (i32, i32, i32, i32) {
    %c0_i32 = arith.constant 0 : i32
    %c0_i32_0 = arith.constant 0 : i32
    %c0_i32_1 = arith.constant 0 : i32
    %c0_i32_2 = arith.constant 0 : i32
    return %arg0, %c0_i32, %c0_i32_0, %c0_i32_1 : i32, i32, i32, i32
  }
}

module attributes {stable_mosaic.version = 11 : i64} {
  func.func @_conv_kernel(%arg0: i32, %arg1: memref<32x288xbf16, #tpu.memory_space<vmem>>, %arg2: memref<32x1xf32, #tpu.memory_space<vmem>>, %arg3: memref<1x67x32x4xbf16, #tpu.memory_space<vmem>>, %arg4: memref<1x65x32x2xbf16, #tpu.memory_space<vmem>>) attributes {dimension_semantics = [#tpu.dimension_semantics<parallel>], iteration_bounds = array<i64: 2>, scalar_prefetch = 0 : i64, scratch_operands = 0 : i64, tpu.core_type = #tpu.core_type<tc>, window_params = [{pipeline_mode = #tpu.pipeline_mode<synchronous>, transform_indices = @transform_0, window_bounds = array<i64: 32, 288>}, {pipeline_mode = #tpu.pipeline_mode<synchronous>, transform_indices = @transform_1, window_bounds = array<i64: 32, 1>}, {transform_indices = @transform_2, window_bounds = array<i64: 1, 67, 32, 4>}, {transform_indices = @transform_3, window_bounds = array<i64: 1, 65, 32, 2>}]} {
    %c0 = arith.constant 0 : index
    %c0_0 = arith.constant 0 : index
    %0 = vector.load %arg1[%c0, %c0_0] : memref<32x288xbf16, #tpu.memory_space<vmem>>, vector<32x288xbf16>
    %c0_1 = arith.constant 0 : index
    %c0_2 = arith.constant 0 : index
    %1 = vector.load %arg2[%c0_1, %c0_2] : memref<32x1xf32, #tpu.memory_space<vmem>>, vector<32x1xf32>
    %c0_i32 = arith.constant 0 : i32
    %c65_i32 = arith.constant 65 : i32
    %2 = arith.addi %c0_i32, %c65_i32 : i32
    %c1_i32 = arith.constant 1 : i32
    scf.for %arg5 = %c0_i32 to %2 step %c1_i32  : i32 {
      %c0_4 = arith.constant 0 : index
      %3 = arith.index_cast %arg5 : i32 to index
      %c0_5 = arith.constant 0 : index
      %c0_6 = arith.constant 0 : index
      %4 = vector.load %arg3[%c0_4, %3, %c0_5, %c0_6] : memref<1x67x32x4xbf16, #tpu.memory_space<vmem>>, vector<1x3x32x4xbf16>
      %5 = vector.shape_cast %4 : vector<1x3x32x4xbf16> to vector<3x32x4xbf16>
      %6 = vector.extract_strided_slice %5 {offsets = [0, 0, 0], sizes = [1, 32, 2], strides = [1, 1, 1]} : vector<3x32x4xbf16> to vector<1x32x2xbf16>
      %7 = vector.shape_cast %6 : vector<1x32x2xbf16> to vector<32x2xbf16>
      %8 = vector.extract_strided_slice %5 {offsets = [0, 0, 1], sizes = [1, 32, 2], strides = [1, 1, 1]} : vector<3x32x4xbf16> to vector<1x32x2xbf16>
      %9 = vector.shape_cast %8 : vector<1x32x2xbf16> to vector<32x2xbf16>
      %10 = vector.extract_strided_slice %5 {offsets = [0, 0, 2], sizes = [1, 32, 2], strides = [1, 1, 1]} : vector<3x32x4xbf16> to vector<1x32x2xbf16>
      %11 = vector.shape_cast %10 : vector<1x32x2xbf16> to vector<32x2xbf16>
      %12 = vector.extract_strided_slice %5 {offsets = [1, 0, 0], sizes = [1, 32, 2], strides = [1, 1, 1]} : vector<3x32x4xbf16> to vector<1x32x2xbf16>
      %13 = vector.shape_cast %12 : vector<1x32x2xbf16> to vector<32x2xbf16>
      %14 = vector.extract_strided_slice %5 {offsets = [1, 0, 1], sizes = [1, 32, 2], strides = [1, 1, 1]} : vector<3x32x4xbf16> to vector<1x32x2xbf16>
      %15 = vector.shape_cast %14 : vector<1x32x2xbf16> to vector<32x2xbf16>
      %16 = vector.extract_strided_slice %5 {offsets = [1, 0, 2], sizes = [1, 32, 2], strides = [1, 1, 1]} : vector<3x32x4xbf16> to vector<1x32x2xbf16>
      %17 = vector.shape_cast %16 : vector<1x32x2xbf16> to vector<32x2xbf16>
      %18 = vector.extract_strided_slice %5 {offsets = [2, 0, 0], sizes = [1, 32, 2], strides = [1, 1, 1]} : vector<3x32x4xbf16> to vector<1x32x2xbf16>
      %19 = vector.shape_cast %18 : vector<1x32x2xbf16> to vector<32x2xbf16>
      %20 = vector.extract_strided_slice %5 {offsets = [2, 0, 1], sizes = [1, 32, 2], strides = [1, 1, 1]} : vector<3x32x4xbf16> to vector<1x32x2xbf16>
      %21 = vector.shape_cast %20 : vector<1x32x2xbf16> to vector<32x2xbf16>
      %22 = vector.extract_strided_slice %5 {offsets = [2, 0, 2], sizes = [1, 32, 2], strides = [1, 1, 1]} : vector<3x32x4xbf16> to vector<1x32x2xbf16>
      %23 = vector.shape_cast %22 : vector<1x32x2xbf16> to vector<32x2xbf16>
      %24 = tpu.concatenate %7, %9, %11, %13, %15, %17, %19, %21, %23 in 0 : vector<32x2xbf16>, vector<32x2xbf16>, vector<32x2xbf16>, vector<32x2xbf16>, vector<32x2xbf16>, vector<32x2xbf16>, vector<32x2xbf16>, vector<32x2xbf16>, vector<32x2xbf16> -> vector<288x2xbf16>
      %cst = arith.constant dense<0.000000e+00> : vector<32x2xf32>
      %25 = tpu.matmul %0, %24, %cst {dimension_numbers = #tpu.dot_dimension_numbers<[1], [0], [0], [1], [0, 0, 1, 1], [], []>} : vector<32x288xbf16>, vector<288x2xbf16>, vector<32x2xf32> -> vector<32x2xf32>
      %26 = vector.broadcast %1 : vector<32x1xf32> to vector<32x2xf32>
      %27 = arith.addf %25, %26 : vector<32x2xf32>
      %cst_7 = arith.constant 0.000000e+00 : f32
      %28 = vector.broadcast %cst_7 : f32 to vector<32x2xf32>
      %29 = arith.cmpf oge, %27, %28 : vector<32x2xf32>
      %cst_8 = arith.constant 1.000000e-01 : f32
      %30 = vector.broadcast %cst_8 : f32 to vector<32x2xf32>
      %31 = arith.mulf %30, %27 : vector<32x2xf32>
      %32 = arith.select %29, %27, %31 : vector<32x2xi1>, vector<32x2xf32>
      %33 = vector.shape_cast %32 : vector<32x2xf32> to vector<1x32x2xf32>
      %34 = arith.truncf %33 : vector<1x32x2xf32> to vector<1x32x2xbf16>
      %c0_9 = arith.constant 0 : index
      %35 = arith.index_cast %arg5 : i32 to index
      %c0_10 = arith.constant 0 : index
      %c0_11 = arith.constant 0 : index
      %36 = vector.load %arg4[%c0_9, %35, %c0_10, %c0_11] : memref<1x65x32x2xbf16, #tpu.memory_space<vmem>>, vector<1x1x32x2xbf16>
      %37 = vector.shape_cast %36 : vector<1x1x32x2xbf16> to vector<1x32x2xbf16>
      %38 = vector.shape_cast %34 : vector<1x32x2xbf16> to vector<1x1x32x2xbf16>
      tpu.vector_store %arg4[%c0_9, %35, %c0_10, %c0_11], %38 {strides = array<i32>} : memref<1x65x32x2xbf16, #tpu.memory_space<vmem>>, vector<1x1x32x2xbf16>,
    }
    %c65_i32_3 = arith.constant 65 : i32
    return
  }
  func.func @transform_0(%arg0: i32) -> (i32, i32) {
    %c0_i32 = arith.constant 0 : i32
    %c0_i32_0 = arith.constant 0 : i32
    %c0_i32_1 = arith.constant 0 : i32
    return %c0_i32, %c0_i32_0 : i32, i32
  }
  func.func @transform_1(%arg0: i32) -> (i32, i32) {
    %c0_i32 = arith.constant 0 : i32
    %c0_i32_0 = arith.constant 0 : i32
    %c0_i32_1 = arith.constant 0 : i32
    return %c0_i32, %c0_i32_0 : i32, i32
  }
  func.func @transform_2(%arg0: i32) -> (i32, i32, i32, i32) {
    %c0_i32 = arith.constant 0 : i32
    %c0_i32_0 = arith.constant 0 : i32
    %c0_i32_1 = arith.constant 0 : i32
    %c0_i32_2 = arith.constant 0 : i32
    return %arg0, %c0_i32, %c0_i32_0, %c0_i32_1 : i32, i32, i32, i32
  }
  func.func @transform_3(%arg0: i32) -> (i32, i32, i32, i32) {
    %c0_i32 = arith.constant 0 : i32
    %c0_i32_0 = arith.constant 0 : i32
    %c0_i32_1 = arith.constant 0 : i32
    %c0_i32_2 = arith.constant 0 : i32
    return %arg0, %c0_i32, %c0_i32_0, %c0_i32_1 : i32, i32, i32, i32
  }
}

module attributes {stable_mosaic.version = 11 : i64} {
  func.func @_conv_kernel(%arg0: i32, %arg1: memref<1x288xbf16, #tpu.memory_space<vmem>>, %arg2: memref<1x1xf32, #tpu.memory_space<vmem>>, %arg3: memref<1x67x32x4xbf16, #tpu.memory_space<vmem>>, %arg4: memref<1x65x1x2xf32, #tpu.memory_space<vmem>>) attributes {dimension_semantics = [#tpu.dimension_semantics<parallel>], iteration_bounds = array<i64: 2>, scalar_prefetch = 0 : i64, scratch_operands = 0 : i64, tpu.core_type = #tpu.core_type<tc>, window_params = [{pipeline_mode = #tpu.pipeline_mode<synchronous>, transform_indices = @transform_0, window_bounds = array<i64: 1, 288>}, {pipeline_mode = #tpu.pipeline_mode<synchronous>, transform_indices = @transform_1, window_bounds = array<i64: 1, 1>}, {transform_indices = @transform_2, window_bounds = array<i64: 1, 67, 32, 4>}, {transform_indices = @transform_3, window_bounds = array<i64: 1, 65, 1, 2>}]} {
    %c0 = arith.constant 0 : index
    %c0_0 = arith.constant 0 : index
    %0 = vector.load %arg1[%c0, %c0_0] : memref<1x288xbf16, #tpu.memory_space<vmem>>, vector<1x288xbf16>
    %c0_1 = arith.constant 0 : index
    %c0_2 = arith.constant 0 : index
    %1 = vector.load %arg2[%c0_1, %c0_2] : memref<1x1xf32, #tpu.memory_space<vmem>>, vector<1x1xf32>
    %c0_i32 = arith.constant 0 : i32
    %c65_i32 = arith.constant 65 : i32
    %2 = arith.addi %c0_i32, %c65_i32 : i32
    %c1_i32 = arith.constant 1 : i32
    scf.for %arg5 = %c0_i32 to %2 step %c1_i32  : i32 {
      %c0_4 = arith.constant 0 : index
      %3 = arith.index_cast %arg5 : i32 to index
      %c0_5 = arith.constant 0 : index
      %c0_6 = arith.constant 0 : index
      %4 = vector.load %arg3[%c0_4, %3, %c0_5, %c0_6] : memref<1x67x32x4xbf16, #tpu.memory_space<vmem>>, vector<1x3x32x4xbf16>
      %5 = vector.shape_cast %4 : vector<1x3x32x4xbf16> to vector<3x32x4xbf16>
      %6 = vector.extract_strided_slice %5 {offsets = [0, 0, 0], sizes = [1, 32, 2], strides = [1, 1, 1]} : vector<3x32x4xbf16> to vector<1x32x2xbf16>
      %7 = vector.shape_cast %6 : vector<1x32x2xbf16> to vector<32x2xbf16>
      %8 = vector.extract_strided_slice %5 {offsets = [0, 0, 1], sizes = [1, 32, 2], strides = [1, 1, 1]} : vector<3x32x4xbf16> to vector<1x32x2xbf16>
      %9 = vector.shape_cast %8 : vector<1x32x2xbf16> to vector<32x2xbf16>
      %10 = vector.extract_strided_slice %5 {offsets = [0, 0, 2], sizes = [1, 32, 2], strides = [1, 1, 1]} : vector<3x32x4xbf16> to vector<1x32x2xbf16>
      %11 = vector.shape_cast %10 : vector<1x32x2xbf16> to vector<32x2xbf16>
      %12 = vector.extract_strided_slice %5 {offsets = [1, 0, 0], sizes = [1, 32, 2], strides = [1, 1, 1]} : vector<3x32x4xbf16> to vector<1x32x2xbf16>
      %13 = vector.shape_cast %12 : vector<1x32x2xbf16> to vector<32x2xbf16>
      %14 = vector.extract_strided_slice %5 {offsets = [1, 0, 1], sizes = [1, 32, 2], strides = [1, 1, 1]} : vector<3x32x4xbf16> to vector<1x32x2xbf16>
      %15 = vector.shape_cast %14 : vector<1x32x2xbf16> to vector<32x2xbf16>
      %16 = vector.extract_strided_slice %5 {offsets = [1, 0, 2], sizes = [1, 32, 2], strides = [1, 1, 1]} : vector<3x32x4xbf16> to vector<1x32x2xbf16>
      %17 = vector.shape_cast %16 : vector<1x32x2xbf16> to vector<32x2xbf16>
      %18 = vector.extract_strided_slice %5 {offsets = [2, 0, 0], sizes = [1, 32, 2], strides = [1, 1, 1]} : vector<3x32x4xbf16> to vector<1x32x2xbf16>
      %19 = vector.shape_cast %18 : vector<1x32x2xbf16> to vector<32x2xbf16>
      %20 = vector.extract_strided_slice %5 {offsets = [2, 0, 1], sizes = [1, 32, 2], strides = [1, 1, 1]} : vector<3x32x4xbf16> to vector<1x32x2xbf16>
      %21 = vector.shape_cast %20 : vector<1x32x2xbf16> to vector<32x2xbf16>
      %22 = vector.extract_strided_slice %5 {offsets = [2, 0, 2], sizes = [1, 32, 2], strides = [1, 1, 1]} : vector<3x32x4xbf16> to vector<1x32x2xbf16>
      %23 = vector.shape_cast %22 : vector<1x32x2xbf16> to vector<32x2xbf16>
      %24 = tpu.concatenate %7, %9, %11, %13, %15, %17, %19, %21, %23 in 0 : vector<32x2xbf16>, vector<32x2xbf16>, vector<32x2xbf16>, vector<32x2xbf16>, vector<32x2xbf16>, vector<32x2xbf16>, vector<32x2xbf16>, vector<32x2xbf16>, vector<32x2xbf16> -> vector<288x2xbf16>
      %cst = arith.constant dense<0.000000e+00> : vector<1x2xf32>
      %25 = tpu.matmul %0, %24, %cst {dimension_numbers = #tpu.dot_dimension_numbers<[1], [0], [0], [1], [0, 0, 1, 1], [], []>} : vector<1x288xbf16>, vector<288x2xbf16>, vector<1x2xf32> -> vector<1x2xf32>
      %26 = vector.broadcast %1 : vector<1x1xf32> to vector<1x2xf32>
      %27 = arith.addf %25, %26 : vector<1x2xf32>
      %28 = vector.shape_cast %27 : vector<1x2xf32> to vector<1x1x2xf32>
      %c0_7 = arith.constant 0 : index
      %29 = arith.index_cast %arg5 : i32 to index
      %c0_8 = arith.constant 0 : index
      %c0_9 = arith.constant 0 : index
      %30 = vector.load %arg4[%c0_7, %29, %c0_8, %c0_9] : memref<1x65x1x2xf32, #tpu.memory_space<vmem>>, vector<1x1x1x2xf32>
      %31 = vector.shape_cast %30 : vector<1x1x1x2xf32> to vector<1x1x2xf32>
      %32 = vector.shape_cast %28 : vector<1x1x2xf32> to vector<1x1x1x2xf32>
      tpu.vector_store %arg4[%c0_7, %29, %c0_8, %c0_9], %32 {strides = array<i32>} : memref<1x65x1x2xf32, #tpu.memory_space<vmem>>, vector<1x1x1x2xf32>,
    }
    %c65_i32_3 = arith.constant 65 : i32
    return
  }
  func.func @transform_0(%arg0: i32) -> (i32, i32) {
    %c0_i32 = arith.constant 0 : i32
    %c0_i32_0 = arith.constant 0 : i32
    %c0_i32_1 = arith.constant 0 : i32
    return %c0_i32, %c0_i32_0 : i32, i32
  }
  func.func @transform_1(%arg0: i32) -> (i32, i32) {
    %c0_i32 = arith.constant 0 : i32
    %c0_i32_0 = arith.constant 0 : i32
    %c0_i32_1 = arith.constant 0 : i32
    return %c0_i32, %c0_i32_0 : i32, i32
  }
  func.func @transform_2(%arg0: i32) -> (i32, i32, i32, i32) {
    %c0_i32 = arith.constant 0 : i32
    %c0_i32_0 = arith.constant 0 : i32
    %c0_i32_1 = arith.constant 0 : i32
    %c0_i32_2 = arith.constant 0 : i32
    return %arg0, %c0_i32, %c0_i32_0, %c0_i32_1 : i32, i32, i32, i32
  }
  func.func @transform_3(%arg0: i32) -> (i32, i32, i32, i32) {
    %c0_i32 = arith.constant 0 : i32
    %c0_i32_0 = arith.constant 0 : i32
    %c0_i32_1 = arith.constant 0 : i32
    %c0_i32_2 = arith.constant 0 : i32
    return %arg0, %c0_i32, %c0_i32_0, %c0_i32_1 : i32, i32, i32, i32
  }
}

</mosaic_0001>

<bundles_post_ra>
// kernel: _lambda_.8
= control target key start
LH: loop header
LB: loop body
LE: loop exit
PB: predicated region body
PF: predicated region fallthrough
CT: control target
= control target key end

     0   :  { %8 = vsyncpa [#allocation3], 0  ;;  %s1225_s0 = inlined_call_operand.hbm [shape: bf16[32,27], index: 0, kind: input, shape index: {}]   ;;  %s1226_s1 = inlined_call_operand.hbm [shape: f32[32,1], index: 1, kind: input, shape index: {}]   ;;  %s1227_s2 = inlined_call_operand.vmem [shape: bf16[2,67,1,24], index: 2, kind: input, shape index: {}]   ;;  %s1228_s3 = inlined_call_operand.vmem [shape: bf16[2,65,32,16], index: 3, kind: output, shape index: {}]  }
   0x1   :  { %9 = vsyncpa [#allocation5], 0  ;;  %s975_s12 = smov 0  }
   0x2 LB: > { %s931_s13 = smov [#allocation2]   ;;  %s981_s15 = sadd.s32 4294967295, %s925_s12   ;;  %s925_s12 = sphi %s975_s12, %s15_s12  }
   0x3   : > { %s126_s14 = sshll.u32 %s931_s13, 4  ;;  %p748_p0 = scmp.ge.s32.totalorder %s925_s12, 1  ;;  %s127_s14 = int_to_ptr.vmem [resolvable:$true] %s126_s14 }
   0x4   : > { %p114_p1 = scmp.lt.s32.totalorder %s925_s12, 3  ;;  %p1229_p3 = scmp.eq.s32.totalorder %s981_s15, 0 }
   0x5   : > { %s932_s17 = smov [#allocation4]   ;;  %s851_s22 = scalar_lea.hbm %s1225_s0, 256 }
   0x6   : > { %p985_p2 = pnand %p748_p0, %p114_p1  ;;  %s139_s18 = sshll.u32 %s932_s17, 4  ;;  %s998_s18 = int_to_ptr.vmem [resolvable:$true] %s139_s18 }
   0x7   : > { %p852_p6 = scmp.ne.s32.totalorder %s1225_s0, %s851_s22  ;;  %p858_p10 = scmp.lt.u32.totalorder %s851_s22, %s1225_s0 }
   0x8   : > { %s1231_s16 = scalar_select %p985_p2, 1, 0 }
   0x9   : > { %p795_p4 = pneg %p985_p2 }
   0xb   : > { %p994_p5 = pnand %p1229_p3, %p795_p4 }
   0xd   : > { %p853_p7 = pneg %p994_p5 }
   0xf   : > { %p854_p8 = pnand %p853_p7, %p852_p6 }
  0x11   : > { %p855_p9 = pneg %p854_p8 }
  0x13   : > { %p860_p11 = pnand %p858_p10, %p855_p9 }
  0x15   : > { %863 = shalt.err (!%p860_p11)
}
  0x16   : > { %s864_s27 = scalar_lea.vmem %s127_s14, 256  ;;  %p872_p1 = scmp.lt.s32.totalorder %s127_s14, %s127_s14 }
  0x17   : > { %p865_p12 = scmp.ne.s32.totalorder %s127_s14, %s864_s27  ;;  %p873_p4 = scmp.lt.s32.totalorder %s864_s27, %s864_s27 }
  0x19   : > { %p867_p13 = pnand %p865_p12, %p853_p7  ;;  %p874_p3 = por %p873_p4, %p872_p1 }
  0x1b   : > { %p868_p0 = pneg %p867_p13 }
  0x1d   : > { %p875_p2 = pnand %p874_p3, %p868_p0 }
  0x1f   : > { %878 = shalt.err (!%p875_p2)
}
  0x20   : > { %s933_s28 = smov 64   ;;  %s934_s29 = smov 4  }
  0x21   : > { %798 = dma.hbm_to_vmem [thread:$0]  (!%p994_p5), %s1225_s0, 256, %s127_s14, [#allocation3], %s933_s28, %s933_s28, %s934_s29  }
  0x22   : > { %s879_s7 = scalar_lea.hbm %s1226_s1, 512 }
  0x23   : > { %p880_p6 = scmp.ne.s32.totalorder %s1226_s1, %s879_s7  ;;  %p886_p8 = scmp.lt.u32.totalorder %s879_s7, %s1226_s1 }
  0x25   : > { %p882_p2 = pnand %p880_p6, %p853_p7 }
  0x27   : > { %p883_p3 = pneg %p882_p2 }
  0x29   : > { %p888_p9 = pnand %p886_p8, %p883_p3 }
  0x2b   : > { %891 = shalt.err (!%p888_p9)
}
  0x2c   : > { %s892_s13 = scalar_lea.vmem %s998_s18, 512  ;;  %p900_p13 = scmp.lt.s32.totalorder %s998_s18, %s998_s18 }
  0x2d   : > { %p893_p10 = scmp.ne.s32.totalorder %s998_s18, %s892_s13  ;;  %p901_p0 = scmp.lt.s32.totalorder %s892_s13, %s892_s13 }
  0x2f   : > { %p895_p11 = pnand %p893_p10, %p853_p7  ;;  %p902_p1 = por %p901_p0, %p900_p13 }
  0x31   : > { %p896_p12 = pneg %p895_p11 }
  0x33   : > { %p903_p4 = pnand %p902_p1, %p896_p12 }
  0x35   : > { %906 = shalt.err (!%p903_p4)
}
  0x36   : > { %s935_s14 = smov 128   ;;  %s936_s17 = smov 8  }
  0x37   : > { %801 = dma.hbm_to_vmem [thread:$0]  (!%p994_p5), %s1226_s1, 512, %s998_s18, [#allocation5], %s935_s14, %s935_s14, %s936_s17  }
  0x38   : > { %p1233_p6 = scmp.ne.s32.totalorder %s1231_s16, 0 }
  0x39   : > { %p1234_p7 = scmp.eq.s32.totalorder (!%p1233_p6), %s981_s15, 0 }
  0x3a   : > { %162 = sbr.rel (%p1233_p6) target bundleno = 564 (0x234), region = 32 }
  0x41   : > { %916 = dma.done.wait (%p1234_p7), [#allocation3], 256   ;;  %p1235_p2 = pmov %p1234_p7 }
  0x43   : > { %918 = vsyncadd (%p1235_p2), [#allocation3], 4294967040  ;;  %p1236_p3 = pmov %p1235_p2 }
  0x44   : > { %p1237_p8 = pmov %p1235_p2 }
  0x45   : > { %920 = dma.done.wait (%p1236_p3), [#allocation5], 512  }
  0x46   : > { %922 = vsyncadd (%p1237_p8), [#allocation5], 4294966784  ;;  %p189_p9 = scmp.lt.s32.totalorder %s981_s15, 1  ;;  %v1064_v0 = vld [vmem:[#allocation2] sm:$0xf]  ;;  %v1077_v4 = vld [vmem:[#allocation4] sm:$0xff] }
  0x47   : > { %v1066_v1 = vld [vmem:[#allocation2 + $0x4] sm:$0xf]  ;;  %v1068_v2 = vld [vmem:[#allocation2 + $0x8] sm:$0xf]  ;;  %v1075_v3 = vld [vmem:[#allocation2 + $0xc] sm:$0xf] }
  0x48   : > { %s1249_s15 = smov (!%p189_p9, %s981_s15), 1  ;;  %v1079_v5 = vld [vmem:[#allocation4 + $0x8] sm:$0xff]  ;;  %v1081_v6 = vld [vmem:[#allocation4 + $0x10] sm:$0xff]  ;;  %v1083_v7 = vld [vmem:[#allocation4 + $0x18] sm:$0xff] }
  0x49   : > { %s785_s18 = smul.u32 67, %s1249_s15 }
  0x4a   : > { %s786_s19 = smul.u32 1040, %s1249_s15  ;;  %s1085_s15 = smov 0  }
  0x4b   : > { %s1062_s23 = scalar_lea.vmem %s1227_s2, %s785_s18 }
  0x4c   : > { %s1073_s26 = scalar_lea.vmem %s1228_s3, %s786_s19 }
  0x4d LB: >> { %v221_v8 = vlaneseq  ;;  %v937_v9 = vmov 1966171168   ;;  %s213_s27 = scalar_lea.vmem %s1062_s23, %s929_s15  ;;  %s938_s28 = smov 7   ;;  %vm362_vm0 = vcmask 1040384   ;;  %vm363_vm1 = vsmask.f32 256  ;;  %s929_s15 = sphi %s1085_s15, %s212_s15  }
  0x4e   : >> { %v219_v10 = vunpack.c.l.s4 %v937_v9  ;;  %v216_v12 = vld [vmem:[%s213_s27 + $0x2] sm:$0x1]  ;;  %v1092_v15 = vld [vmem:[%s213_s27 + $0x1] sm:$0x1]  ;;  %s939_s29 = smov 5   ;;  %s940_s30 = smov 127   ;;  %vm1144_vm4 = vmand %vm362_vm0, %vm363_vm1 }
  0x4f   : >> { %v222_v11 = vshrl.u32 %v221_v8, 7  ;;  %v433_v14 = vcombine.low %v216_v12, %v216_v12  ;;  %v1112_v29 = vld [vmem:[%s213_s27] sm:$0x1]  ;;  %s941_s4 = smov 6   ;;  %s942_s5 = smov 4   ;;  %v310_v43 = vcombine.low %v1092_v15, %v1092_v15  ;;  %vm371_vm2 = vcmask 1041408  }
  0x50   : >> { %v220_v13 = vunpack.c.0.s8 %v219_v10  ;;  %v238_v34 = vcombine.low %v1112_v29, %v1112_v29  ;;  %s943_s6 = smov 3   ;;  %s944_s7 = smov 2   ;;  %vm372_vm3 = vsmask.f32 1280  ;;  %vm380_vm5 = vcmask 1042432  }
  0x51   : >> { %s945_s8 = smov 1   ;;  %s946_s9 = smov 126   ;;  %vm381_vm6 = vsmask.f32 2304  ;;  %vm1149_vm7 = vmand %vm371_vm2, %vm372_vm3  ;;  %vm389_vm9 = vcmask 1043456   ;;  %vm564_vm11 = vcmask 220160  }
  0x52   : >> { %v1094_v16 = vsub.s32 %v220_v13, %v222_v11  ;;  %s947_s10 = smov 125   ;;  %s948_s11 = smov 124   ;;  %vm1158_vm8 = vmand %vm380_vm5, %vm381_vm6  ;;  %vm390_vm10 = vsmask.f32 3328  ;;  %vm398_vm13 = vcmask 1044480   ;;  %vm416_vm3 = vcmask 1046528  }
  0x53   : >> { %s949_s13 = smov 123   ;;  %s950_s14 = smov 122   ;;  %vm1170_vm12 = vmand %vm389_vm9, %vm390_vm10  ;;  %vm399_vm14 = vsmask.f32 4352  ;;  %vm408_vm1 = vsmask.f32 5376 }
  0x54   : >> { %v440_v17 = vrot.slane %v433_v14, %v1094_v16  ;;  %v1099_v18 = vrot.slane %v1092_v15, %v1094_v16  ;;  %v447_v19 = vrot.slane %v216_v12, %v1094_v16  ;;  %v224_v32 = vrot.slane %v1112_v29, %v1094_v16  ;;  %s951_s17 = smov 121   ;;  %s952_s20 = smov 120   ;;  %vm1180_vm15 = vmand %vm398_vm13, %vm399_vm14 }
  0x55   : >> { %v245_v38 = vrot.slane %v238_v34, %v1094_v16  ;;  %v317_v47 = vrot.slane %v310_v43, %v1094_v16  ;;  %vm425_vm6 = vcmask 1047552   ;;  %s772_s21 = sshll.u32 %s929_s15, 4  ;;  %s212_s15 = sadd.s32 1, %s929_s15  }
  0x56   : >> { %v454_v20 = vrot.slane %v440_v17, %v1094_v16  ;;  %v471_v21 = vcombine.low %v447_v19, %v447_v19  ;;  %v461_v22 = vrot.slane %v447_v19, %v1094_v16  ;;  %v304_v23 = vrot.slane %v1099_v18, %v1094_v16  ;;  %s655_s18 = scalar_lea.vmem %s1073_s26, %s772_s21  ;;  %p209_p5 = scmp.ge.s32.totalorder %s212_s15, 65  }
  0x57   : >> { %v485_v27 = vcombine.low %v440_v17, %v440_v17  ;;  %v231_v36 = vrot.slane %v224_v32, %v1094_v16  ;;  %v252_v40 = vrot.slane %v245_v38, %v1094_v16  ;;  %v259_v41 = vcombine.low %v224_v32, %v224_v32 }
  0x58   : >> { %462 = vrot.lane.b32.xlu0 %v454_v20, %s938_s28  ;;  %v478_v24 = vrot.slane %v471_v21, %v1094_v16  ;;  %v1107_v25 = vshll.u32 %v461_v22, 16  ;;  %v1109_v26 = vshll.u32 %v304_v23, 16  ;;  %v499_v35 = vcombine.low %v461_v22, %v461_v22 }
  0x59   : >> { %v492_v31 = vrot.slane %v485_v27, %v1094_v16  ;;  %v504_v37 = vcombine.low %v454_v20, %v454_v20  ;;  %v233_v39 = vshll.u32 %v231_v36, 16  ;;  %v266_v44 = vrot.slane %v259_v41, %v1094_v16 }
  0x5a   : >> { %479 = vrot.lane.b32.xlu1 %v478_v24, %s939_s29  ;;  %v467_v28 = vrot.slane %v1107_v25, 7  ;;  %v481_v30 = vrot.slane %v1107_v25, 6  ;;  %v495_v33 = vrot.slane %v1107_v25, 5  ;;  %v273_v45 = vcombine.low %v245_v38, %v245_v38 }
  0x5b   : >> { %v255_v42 = vrot.slane %v233_v39, 7  ;;  %v269_v46 = vrot.slane %v233_v39, 6  ;;  %v283_v49 = vrot.slane %v233_v39, 5  ;;  %v324_v50 = vrot.slane %v317_v47, %v1094_v16 }
  0x5c   : >> { %429 = vrot.lane.b32.xlu0 %v1109_v26, %s940_s30  ;;  %v280_v48 = vrot.slane %v273_v45, %v1094_v16  ;;  %v332_v51 = vcombine.low %v1099_v18, %v1099_v18  ;;  %v287_v52 = vcombine.low %v231_v36, %v231_v36  ;;  %v347_v55 = vcombine.low %v317_v47, %v317_v47 }
  0x5d   : >> { %v325_v53 = vcombine.low %v324_v50, %v324_v50  ;;  %v328_v56 = vrot.slane %v1109_v26, 3  ;;  %v343_v59 = vrot.slane %v1109_v26, 2  ;;  %v358_v61 = vrot.slane %v1109_v26, 1 }
  0x5e   : >> { %468 = vrot.lane.b32.xlu1 %v467_v28, %s941_s4  ;;  %v339_v54 = vrot.slane %v332_v51, %v1094_v16  ;;  %v354_v58 = vrot.slane %v347_v55, %v1094_v16  ;;  %v756_v19 = vcombine.low %v1064_v0, %v1066_v1  ;;  %v502_v24 = vrot.slane %v1107_v25, 4 }
  0x5f   : >> { %v953_v27 = vmov 0   ;;  %v308_v47 = vrot.slane %v1109_v26, 4 }
  0x60   : >> { %482 = vrot.lane.b32.xlu0 %v481_v30, %s942_s5  ;;  %v340_v57 = vcombine.low %v339_v54, %v339_v54  ;;  %v355_v60 = vcombine.low %v354_v58, %v354_v58  ;;  %781 = vmatprep.mubr.msk.bf16.mxu0 %vm564_vm11, %v756_v19 }
  0x61   : >> { %847 = vset.pattern.permute.xlu1 %v953_v27  ;;  %846 = vset.pattern.permute.xlu0 %v953_v27 }
  0x62   : >> { %493 = vrot.lane.b32.xlu1 %v492_v31, %s943_s6 }
  0x64   : >> { %496 = vrot.lane.b32.xlu0 %v495_v33, %s944_s7 }
  0x66   : >> { %500 = vrot.lane.b32.xlu1 %v499_v35, %s945_s8 }
  0x68   : >> { %505 = vrot.lane.b32.xlu0 %v504_v37, %s940_s30 }
  0x6a   : >> { %235 = vrot.lane.b32.xlu1 %v233_v39, %s940_s30 }
  0x6c   : >> { %253 = vrot.lane.b32.xlu0 %v252_v40, %s946_s9 }
  0x6e   : >> { %256 = vrot.lane.b32.xlu1 %v255_v42, %s947_s10 }
  0x70   : >> { %267 = vrot.lane.b32.xlu0 %v266_v44, %s948_s11 }
  0x72   : >> { %270 = vrot.lane.b32.xlu1 %v269_v46, %s949_s13 }
  0x74   : >> { %281 = vrot.lane.b32.xlu0 %v280_v48, %s950_s14 }
  0x76   : >> { %284 = vrot.lane.b32.xlu1 %v283_v49, %s951_s17 }
  0x78   : >> { %288 = vrot.lane.b32.xlu0 %v287_v52, %s952_s20 }
  0x7a   : >> { %326 = vrot.lane.b32.xlu1 %v325_v53, %s940_s30 }
  0x7c   : >> { %329 = vrot.lane.b32.xlu0 %v328_v56, %s946_s9 }
  0x7e   : >> { %341 = vrot.lane.b32.xlu1 %v340_v57, %s947_s10 }
  0x80   : >> { %344 = vrot.lane.b32.xlu0 %v343_v59, %s948_s11 }
  0x82   : >> { %356 = vrot.lane.b32.xlu1 %v355_v60, %s949_s13 }
  0x84   : >> { %359 = vrot.lane.b32.xlu0 %v358_v61, %s950_s14 }
  0x88   : >> { %536 = vperm.xlu0 %846, %v1077_v4  }
  0x8c   : >> { %551 = vperm.xlu0 %846, %v1083_v7  }
  0xca   : >> { %v463_v62 = vpop.permute.xlu0 %462 }
  0xcc   : >> { %v480_v63 = vpop.permute.xlu1 %479 }
  0xce   : >> { %v430_v9 = vpop.permute.xlu0 %429 }
  0xcf   : >> { %v507_v11 = vsel %vm1144_vm4, %v1092_v15, %v430_v9 }
  0xd0   : >> { %v469_v12 = vpop.permute.xlu1 %468  ;;  %v510_v13 = vsel %vm362_vm0, %v507_v11, %v463_v62 }
  0xd1   : >> { %v512_v16 = vsel %vm1149_vm7, %v510_v13, %v469_v12  ;;  %v757_v12 = vcombine.low %v1068_v2, %v1075_v3 }
  0xd2   : >> { %v515_v17 = vsel %vm371_vm2, %v512_v16, %v480_v63  ;;  %v483_v18 = vpop.permute.xlu0 %482  ;;  %v954_v63 = vmov 65535  }
  0xd3   : >> { %v517_v15 = vsel %vm1158_vm8, %v515_v17, %v483_v18  ;;  %v571_v8 = vsel %vm398_vm13, 4294967295, %v954_v63 }
  0xd4   : >> { %v494_v20 = vpop.permute.xlu1 %493 }
  0xd5   : >> { %v520_v22 = vsel %vm380_vm5, %v517_v15, %v494_v20 }
  0xd6   : >> { %v497_v23 = vpop.permute.xlu0 %496 }
  0xd7   : >> { %v522_v28 = vsel %vm1170_vm12, %v520_v22, %v497_v23 }
  0xd8   : >> { %v501_v31 = vpop.permute.xlu1 %500 }
  0xd9   : >> { %v525_v32 = vsel %vm389_vm9, %v522_v28, %v501_v31 }
  0xda   : >> { %v506_v33 = vpop.permute.xlu0 %505  ;;  %v527_v25 = vsel %vm1180_vm15, %v525_v32, %v502_v24 }
  0xdb   : >> { %v530_v34 = vsel %vm398_vm13, %v527_v25, %v506_v33 }
  0xdc   : >> { %532 = vrot.lane.b32.xlu1 %v530_v34, %s951_s17  ;;  %v236_v35 = vpop.permute.xlu1 %235 }
  0xdd   : >> { %v365_v36 = vsel %vm1144_vm4, %v1112_v29, %v236_v35  ;;  %vm417_vm4 = vsmask.f32 6400 }
  0xde   : >> { %v254_v37 = vpop.permute.xlu0 %253 }
  0xdf   : >> { %v369_v38 = vsel %vm362_vm0, %v365_v36, %v254_v37  ;;  %vm407_vm0 = vcmask 1045504  }
  0xe0   : >> { %v257_v39 = vpop.permute.xlu1 %256  ;;  %541 = vperm.xlu1 %847, %v1079_v5   ;;  %v572_v9 = vsel %vm407_vm0, %v571_v8, 0 }
  0xe1   : >> { %v374_v40 = vsel %vm1149_vm7, %v369_v38, %v257_v39  ;;  %vm426_vm7 = vsmask.f32 7424 }
  0xe2   : >> { %v268_v41 = vpop.permute.xlu0 %267 }
  0xe3   : >> { %v378_v42 = vsel %vm371_vm2, %v374_v40, %v268_v41  ;;  %vm409_vm2 = vmand %vm407_vm0, %vm408_vm1 }
  0xe4   : >> { %v271_v43 = vpop.permute.xlu1 %270  ;;  %546 = vperm.xlu1 %847, %v1081_v6  }
  0xe5   : >> { %v383_v44 = vsel %vm1158_vm8, %v378_v42, %v271_v43  ;;  %vm427_vm8 = vmand %vm425_vm6, %vm426_vm7 }
  0xe6   : >> { %v282_v45 = vpop.permute.xlu0 %281 }
  0xe7   : >> { %v387_v29 = vsel %vm380_vm5, %v383_v44, %v282_v45  ;;  %vm418_vm5 = vmand %vm416_vm3, %vm417_vm4 }
  0xe8   : >> { %v285_v46 = vpop.permute.xlu1 %284 }
  0xe9   : >> { %v392_v48 = vsel %vm1170_vm12, %v387_v29, %v285_v46 }
  0xea   : >> { %v289_v49 = vpop.permute.xlu0 %288 }
  0xeb   : >> { %v396_v50 = vsel %vm389_vm9, %v392_v48, %v289_v49 }
  0xec   : >> { %v401_v51 = vsel %vm1180_vm15, %v396_v50, %v308_v47  ;;  %v327_v52 = vpop.permute.xlu1 %326 }
  0xed   : >> { %v405_v53 = vsel %vm398_vm13, %v401_v51, %v327_v52 }
  0xee   : >> { %v330_v54 = vpop.permute.xlu0 %329 }
  0xef   : >> { %v410_v26 = vsel %vm409_vm2, %v405_v53, %v330_v54 }
  0xf0   : >> { %v342_v55 = vpop.permute.xlu1 %341 }
  0xf1   : >> { %v414_v56 = vsel %vm407_vm0, %v410_v26, %v342_v55 }
  0xf2   : >> { %v345_v57 = vpop.permute.xlu0 %344 }
  0xf3   : >> { %v419_v58 = vsel %vm418_vm5, %v414_v56, %v345_v57 }
  0xf4   : >> { %v357_v59 = vpop.permute.xlu1 %356 }
  0xf5   : >> { %v423_v60 = vsel %vm416_vm3, %v419_v58, %v357_v59 }
  0xf6   : >> { %v360_v61 = vpop.permute.xlu0 %359 }
  0xf7   : >> { %v428_v62 = vsel %vm427_vm8, %v423_v60, %v360_v61 }
  0xf8   : >> { %777 = vmatprep.subr.bf16.mxu0 %v428_v62 }
  0xf9   : >> { %778 = vmatpush3.bf16.msra.mxu0 %v428_v62 }
 0x107   : >> { %v537_v14 = vpop.permute.xlu0 %536 }
 0x10b   : >> { %v552_v15 = vpop.permute.xlu0 %551 }
 0x14e   : >> { %v533_v10 = vpop.permute.xlu1 %532 }
 0x14f   : >> { %v574_v11 = vand.u32 %v572_v9, %v533_v10 }
 0x151   : >> { %779 = vmatprep.subr.bf16.mxu0 %v574_v11 }
 0x152   : >> { %780 = vmatpush3.bf16.msra.mxu0 %v574_v11 }
 0x155   : >> { %782 = vmatmul.mubr.msk.bf16.vlgmr.msra.gmra.mrb[0].mxu0 %vm564_vm11, %v757_v12  ;;  %vm656_vm11 = vcmask 125952  }
 0x15f   : >> { %v542_v13 = vpop.permute.xlu1 %541 }
 0x163   : >> { %v547_v16 = vpop.permute.xlu1 %546 }
 0x228   : >> { %v783_v17 = vpop.f32.mrb[0].mxu0 }
 0x229   : >> { %v619_v18 = vadd.f32 %v783_v17, %v547_v16  ;;  %v610_v19 = vpop.f32.mrb[1].mxu0 }
 0x22a   : >> { %v611_v20 = vadd.f32 %v610_v19, %v537_v14  ;;  %v784_v21 = vpop.f32.mrb[2].mxu0 }
 0x22b   : >> { %vm627_vm9 = vcmp.ge.f32.partialorder %v619_v18, 0.0  ;;  %v631_v22 = vmul.f32 0.1, %v619_v18  ;;  %v622_v23 = vadd.f32 %v784_v21, %v552_v15  ;;  %v613_v24 = vpop.f32.mrb[3].mxu0 }
 0x22c   : >> { %vm625_vm10 = vcmp.ge.f32.partialorder %v611_v20, 0.0  ;;  %v629_v27 = vmul.f32 0.1, %v611_v20  ;;  %v614_v28 = vadd.f32 %v613_v24, %v542_v13 }
 0x22d   : >> { %v635_v30 = vsel %vm627_vm9, %v619_v18, %v631_v22  ;;  %vm628_vm12 = vcmp.ge.f32.partialorder %v622_v23, 0.0  ;;  %v632_v31 = vmul.f32 0.1, %v622_v23  ;;  %211 = sbr.rel (!%p209_p5) target bundleno = 77 (0x4d), region = 80 }
 0x22e   : >> { %v770_v32 = vpack.c.bf16 %v635_v30, %v635_v30  ;;  %v633_v33 = vsel %vm625_vm10, %v611_v20, %v629_v27  ;;  %vm626_vm13 = vcmp.ge.f32.partialorder %v614_v28, 0.0  ;;  %v630_v25 = vmul.f32 0.1, %v614_v28 }
 0x22f   : >> { %v768_v34 = vpack.c.bf16 %v633_v33, %v633_v33  ;;  %v636_v35 = vsel %vm628_vm12, %v622_v23, %v632_v31 }
 0x230   : >> { %659 = vst.msk [vmem:[%s655_s18 + $0x8] sm:$0xf] %vm656_vm11, %v770_v32  ;;  %v771_v36 = vpack.c.bf16 %v636_v35, %v636_v35  ;;  %v634_v37 = vsel %vm626_vm13, %v614_v28, %v630_v25 }
 0x231   : >> { %657 = vst.msk [vmem:[%s655_s18] sm:$0xf] %vm656_vm11, %v768_v34  ;;  %v769_v38 = vpack.c.bf16 %v634_v37, %v634_v37 }
 0x232   : >> { %660 = vst.msk [vmem:[%s655_s18 + $0xc] sm:$0xf] %vm656_vm11, %v771_v36 }
 0x233   : >> { %658 = vst.msk [vmem:[%s655_s18 + $0x4] sm:$0xf] %vm656_vm11, %v769_v38 }
 0x234 PF: > { %s15_s12 = sadd.s32 1, %s925_s12  }
 0x235   : > { %p12_p10 = scmp.ge.s32.totalorder %s15_s12, 4  }
 0x237   :  { %14 = sbr.rel (!%p12_p10) target bundleno = 2 (0x2), region = 91 }
 0x23e   :  { %682 = vsyncpa [#allocation3], 1 }
 0x23f   :  { %684 = vsyncpa [#allocation3 + $0x1], 1 }
 0x240   :  { %685 = vsyncpa [#allocation5], 1 }

// kernel: _lambda_.7
= control target key start
LH: loop header
LB: loop body
LE: loop exit
PB: predicated region body
PF: predicated region fallthrough
CT: control target
= control target key end

     0   :  { %s850_s9 = smov 0   ;;  %s852_s10 = smov 0   ;;  %s1042_s0 = inlined_call_operand.vmem [shape: bf16[2,1,1,608], index: 0, kind: input, shape index: {}]   ;;  %s1043_s1 = inlined_call_operand.vmem [shape: bf16[128,256], index: 1, kind: input, shape index: {}]   ;;  %s1044_s2 = inlined_call_operand.vmem [shape: bf16[2,16,128], index: 2, kind: output, shape index: {}]  }
   0x1   :  { %s854_s11 = smov 0  }
   0x2 LB: > { %s24_s12 = sadd.s32 1, %s824_s10  ;;  %p675_p0 = scmp.ge.s32.totalorder %s828_s11, 1  ;;  %s828_s11 = sphi %s854_s11, %s12_s11   ;;  %s824_s10 = sphi %s852_s10, %s1056_s10   ;;  %s820_s9 = sphi %s850_s9, %s1055_s9  }
   0x3   : > { %p26_p1 = scmp.ge.s32.totalorder %s24_s12, 2  ;;  %p131_p2 = scmp.lt.s32.totalorder %s828_s11, 3 }
   0x5   : > { %s1058_s12 = smov (%p26_p1, %s24_s12), 0  ;;  %p132_p3 = pnand %p675_p0, %p131_p2 }
   0x6   : > { %p160_p4 = scmp.lt.s32.totalorder (!%p132_p3), %s820_s9, 1  ;;  %v184_v0 = vlaneseq (!%p132_p3)  ;;  %v830_v1 = vmov (!%p132_p3), 1966171168   ;;  %v778_v3 = vld [vmem:[%s1043_s1 + $0x4] ss:$8 sps:$4 sm:$0xff] (!%p132_p3)   ;;  %s831_s7 = smov (!%p132_p3), 64  }
   0x7   : > { %135 = sbr.rel (%p132_p3) target bundleno = 403 (0x193), region = 28  ;;  %v182_v2 = vunpack.c.l.s4 (!%p132_p3), %v830_v1  ;;  %v780_v4 = vld [vmem:[%s1043_s1] ss:$8 sps:$4 sm:$0xff] (!%p132_p3)   ;;  %v781_v6 = vld [vmem:[%s1043_s1 + $0x14] ss:$8 sps:$4 sm:$0xff] (!%p132_p3)   ;;  %511 = vmatprep.subr.bf16.mxu0 (!%p132_p3), %v778_v3  ;;  %s832_s16 = smov (!%p132_p3), 96  }
   0x8   : > { %v185_v5 = vshrl.u32 (!%p132_p3), %v184_v0, 7  ;;  %512 = vmatpush1.bf16.msra.mxu0 (!%p132_p3), %v780_v4  ;;  %v783_v8 = vld [vmem:[%s1043_s1 + $0x10] ss:$8 sps:$4 sm:$0xff] (!%p132_p3)   ;;  %v784_v9 = vld [vmem:[%s1043_s1 + $0x24] ss:$8 sps:$4 sm:$0xff] (!%p132_p3)   ;;  %s833_s17 = smov (!%p132_p3), 32  }
   0x9   : > { %v183_v7 = vunpack.c.0.s8 (!%p132_p3), %v182_v2  ;;  %513 = vmatprep.subr.bf16.mxu0 (!%p132_p3), %v781_v6  ;;  %v786_v11 = vld [vmem:[%s1043_s1 + $0x20] ss:$8 sps:$4 sm:$0xff] (!%p132_p3)   ;;  %v787_v16 = vld [vmem:[%s1043_s1 + $0x34] ss:$8 sps:$4 sm:$0xff] (!%p132_p3)   ;;  %v789_v25 = vld [vmem:[%s1043_s1 + $0x30] ss:$8 sps:$4 sm:$0xff] (!%p132_p3)  }
   0xa   : > { %v790_v28 = vld [vmem:[%s1043_s1 + $0x44] ss:$8 sps:$4 sm:$0xff] (!%p132_p3)   ;;  %v792_v39 = vld [vmem:[%s1043_s1 + $0x40] ss:$8 sps:$4 sm:$0xff] (!%p132_p3)   ;;  %v793_v41 = vld [vmem:[%s1043_s1 + $0x54] ss:$8 sps:$4 sm:$0xff] (!%p132_p3)  }
   0xb   : > { %v886_v10 = vsub.s32 (!%p132_p3), %v183_v7, %v185_v5  ;;  %v795_v51 = vld [vmem:[%s1043_s1 + $0x50] ss:$8 sps:$4 sm:$0xff] (!%p132_p3)   ;;  %v796_v52 = vld [vmem:[%s1043_s1 + $0x64] ss:$8 sps:$4 sm:$0xff] (!%p132_p3)   ;;  %v798_v60 = vld [vmem:[%s1043_s1 + $0x60] ss:$8 sps:$4 sm:$0xff] (!%p132_p3)  }
   0xc   : > { %514 = vmatpush1.bf16.msra.mxu0 (!%p132_p3), %v783_v8  ;;  %v799_v61 = vld [vmem:[%s1043_s1 + $0x74] ss:$8 sps:$4 sm:$0xff] (!%p132_p3)   ;;  %v834_v62 = vmov (!%p132_p3), 0   ;;  %v801_v4 = vld [vmem:[%s1043_s1 + $0x70] ss:$8 sps:$4 sm:$0xff] (!%p132_p3)   ;;  %vm352_vm0 = vcmask (!%p132_p3), 1040384  }
   0xd   : > { %515 = vmatprep.subr.bf16.mxu0 (!%p132_p3), %v784_v9  ;;  %543 = vmatprep.mubr.bf16.mxu0 (!%p132_p3), %v834_v62  ;;  %vm353_vm1 = vsmask.f32 (!%p132_p3), 256  ;;  %vm213_vm2 = vcmask (!%p132_p3), 785408   ;;  %vm361_vm3 = vcmask (!%p132_p3), 1041408   ;;  %vm362_vm4 = vsmask.f32 (!%p132_p3), 1280 }
   0xe   : > { %s1060_s9 = smov (!%p160_p4, %s820_s9), 1  ;;  %vm243_vm5 = vcmask 523264   ;;  %vm354_vm6 = vmand %vm352_vm0, %vm353_vm1  ;;  %vm251_vm7 = vcmask 261120   ;;  %vm369_vm8 = vcmask 1042432   ;;  %vm370_vm9 = vsmask.f32 2304 }
   0xf   : > { %s706_s19 = smul.u32 5, %s1060_s9  ;;  %vm970_vm10 = vmand %vm361_vm3, %vm362_vm4  ;;  %vm378_vm12 = vcmask 1043456   ;;  %vm379_vm13 = vsmask.f32 3328  ;;  %vm386_vm14 = vcmask 1044480   ;;  %vm394_vm1 = vcmask 1045504  }
  0x10   : > { %516 = vmatpush1.bf16.msra.mxu0 %v786_v11  ;;  %vm980_vm11 = vmand %vm369_vm8, %vm370_vm9  ;;  %vm387_vm15 = vsmask.f32 4352  ;;  %vm395_vm4 = vsmask.f32 5376  ;;  %vm403_vm9 = vsmask.f32 6400 }
  0x11   : > { %s167_s26 = scalar_lea.vmem %s1042_s0, %s706_s19  ;;  %517 = vmatprep.subr.bf16.mxu0 %v787_v16  ;;  %s698_s28 = sshll.u32 %s1060_s9, 3 }
  0x12   : > { %v894_v12 = vld [vmem:[%s167_s26] sm:$0x1f]  ;;  %s176_s3 = scalar_lea.vmem %s1044_s2, %s698_s28 }
  0x13   : > { %v216_v13 = vcombine.low %v894_v12, %v894_v12  ;;  %v900_v14 = vrot.slane %v894_v12, %v886_v10  ;;  %v306_v15 = vcombine.high %v894_v12, %v894_v12 }
  0x14   : > { %518 = vmatpush1.bf16.msra.mxu0 %v789_v25 }
  0x15   : > { %v223_v17 = vrot.slane %v216_v13, %v886_v10  ;;  %v188_v18 = vcombine.high %v900_v14, %v900_v14  ;;  %v912_v19 = vrot.slane %v900_v14, %v886_v10  ;;  %v313_v20 = vrot.slane %v306_v15, %v886_v10  ;;  %519 = vmatprep.subr.bf16.mxu0 %v790_v28 }
  0x16   : > { %v332_v56 = vcombine.low %v900_v14, %v900_v14 }
  0x17   : > { %v231_v21 = vrot.slane %v223_v17, %v886_v10  ;;  %v224_v22 = vcombine.high %v223_v17, %v223_v17  ;;  %v202_v23 = vrot.slane %v188_v18, %v886_v10  ;;  %v204_v24 = vshll.u32 %v912_v19, 16 }
  0x18   : > { %v254_v26 = vcombine.high %v912_v19, %v912_v19  ;;  %v266_v27 = vcombine.low %v223_v17, %v223_v17  ;;  %v320_v34 = vrot.slane %v313_v20, %v886_v10  ;;  %520 = vmatpush1.bf16.msra.mxu0 %v792_v39  ;;  %v339_v0 = vrot.slane %v332_v56, %v886_v10 }
  0x19   : > { %239 = vrot.lane.b32.xlu0 %v231_v21, %s831_s7  ;;  %v238_v29 = vrot.slane %v224_v22, %v886_v10  ;;  %v207_v30 = vshll.u32 %v202_v23, 16  ;;  %v245_v31 = vrot.slane %v204_v24, 7  ;;  %v286_v32 = vcombine.high %v202_v23, %v202_v23  ;;  %521 = vmatprep.subr.bf16.mxu0 %v793_v41 }
  0x1a   : > { %v257_v33 = vshll.u32 %v254_v26, 16  ;;  %v273_v38 = vrot.slane %v266_v27, %v886_v10  ;;  %v323_v50 = vshll.u32 %v320_v34, 16  ;;  %v340_v5 = vcombine.low %v339_v0, %v339_v0 }
  0x1b   : > { %241 = vrot.lane.b32.xlu1 %v238_v29, %s831_s7  ;;  %v736_v35 = vpack.i.bf16 %v207_v30, %v204_v24  ;;  %v246_v36 = vrot.slane %v207_v30, 7  ;;  %v255_v37 = vrot.slane %v207_v30, 6  ;;  %v278_v43 = vrot.slane %v207_v30, 5 }
  0x1c   : > { %v259_v40 = vrot.slane %v257_v33, 6  ;;  %v279_v44 = vrot.slane %v257_v33, 5  ;;  %v289_v45 = vshll.u32 %v286_v32, 16  ;;  %v274_v47 = vcombine.high %v273_v38, %v273_v38  ;;  %522 = vmatpush1.bf16.msra.mxu0 %v795_v51 }
  0x1d   : > { %737 = vrot.lane.b32.xlu0 %v736_v35, %s832_s16  ;;  %v741_v42 = vpack.i.bf16 %v246_v36, %v245_v31  ;;  %v287_v48 = vrot.slane %v257_v33, 4  ;;  %v298_v54 = vrot.slane %v257_v33, 3  ;;  %v325_v59 = vrot.slane %v323_v50, 2  ;;  %523 = vmatprep.subr.bf16.mxu0 %v796_v52 }
  0x1e   : > { %v746_v46 = vpack.i.bf16 %v259_v40, %v255_v37  ;;  %v291_v49 = vrot.slane %v289_v45, 4  ;;  %v751_v53 = vpack.i.bf16 %v279_v44, %v278_v43  ;;  %v299_v55 = vrot.slane %v289_v45, 3 }
  0x1f   : > { %742 = vrot.lane.b32.xlu1 %v741_v42, %s833_s17  ;;  %v321_v58 = vrot.slane %v289_v45, 2  ;;  %v344_v2 = vrot.slane %v289_v45, 1  ;;  %v345_v3 = vrot.slane %v323_v50, 1 }
  0x20   : > { %v756_v57 = vpack.i.bf16 %v291_v49, %v287_v48  ;;  %v761_v63 = vpack.i.bf16 %v299_v55, %v298_v54  ;;  %524 = vmatpush1.bf16.msra.mxu0 %v798_v60 }
  0x21   : > { %747 = vrot.lane.b32.xlu0 %v746_v46, %s832_s16  ;;  %v766_v1 = vpack.i.bf16 %v325_v59, %v321_v58  ;;  %525 = vmatprep.subr.bf16.mxu0 %v799_v61  ;;  %v771_v6 = vpack.i.bf16 %v345_v3, %v344_v2 }
  0x23   : > { %275 = vrot.lane.b32.xlu1 %v274_v47, %s831_s7 }
  0x24   : > { %526 = vmatpush1.bf16.msra.mxu0 %v801_v4 }
  0x25   : > { %752 = vrot.lane.b32.xlu0 %v751_v53, %s833_s17 }
  0x27   : > { %757 = vrot.lane.b32.xlu1 %v756_v57, %s832_s16 }
  0x29   : > { %762 = vrot.lane.b32.xlu0 %v761_v63, %s833_s17 }
  0x2b   : > { %767 = vrot.lane.b32.xlu1 %v766_v1, %s832_s16 }
  0x2d   : > { %341 = vrot.lane.b32.xlu0 %v340_v5, %s831_s7 }
  0x2f   : > { %772 = vrot.lane.b32.xlu1 %v771_v6, %s833_s17 }
  0x8b   : > { %v965_v7 = vpop.permute.xlu0 %239 }
  0x8d   : > { %v242_v8 = vpop.permute.xlu1 %241 }
  0x8e   : > { %v244_v18 = vsel %vm243_vm5, %v965_v7, %v242_v8 }
  0x8f   : > { %v738_v9 = vpop.permute.xlu0 %737 }
  0x90   : > { %v740_v10 = vunpack.i.h.bf16 %v738_v9  ;;  %v739_v11 = vunpack.i.l.bf16 %v738_v9 }
  0x91   : > { %v743_v13 = vpop.permute.xlu1 %742 }
  0x92   : > { %v214_v14 = vsel %vm213_vm2, %v739_v11, %v740_v10  ;;  %v745_v16 = vunpack.i.h.bf16 %v743_v13  ;;  %v744_v17 = vunpack.i.l.bf16 %v743_v13 }
  0x93   : > { %v355_v20 = vsel %vm354_vm6, %v894_v12, %v214_v14  ;;  %v748_v21 = vpop.permute.xlu0 %747  ;;  %vm402_vm6 = vcmask 1046528  }
  0x94   : > { %v359_v22 = vsel %vm352_vm0, %v355_v20, %v244_v18  ;;  %v252_v23 = vsel %vm251_vm7, %v744_v17, %v745_v16  ;;  %v750_v24 = vunpack.i.h.bf16 %v748_v21  ;;  %v749_v25 = vunpack.i.l.bf16 %v748_v21  ;;  %vm994_vm0 = vmand %vm378_vm12, %vm379_vm13 }
  0x95   : > { %v364_v27 = vsel %vm970_vm10, %v359_v22, %v252_v23  ;;  %v276_v28 = vpop.permute.xlu1 %275  ;;  %vm404_vm10 = vmand %vm402_vm6, %vm403_vm9 }
  0x96   : > { %v264_v12 = vsel %vm213_vm2, %v749_v25, %v750_v24  ;;  %v367_v29 = vsel %vm361_vm3, %v364_v27, %v912_v19  ;;  %v277_v30 = vsel %vm243_vm5, %v965_v7, %v276_v28  ;;  %vm1001_vm3 = vmand %vm386_vm14, %vm387_vm15 }
  0x97   : > { %v372_v31 = vsel %vm980_vm11, %v367_v29, %v264_v12  ;;  %v753_v32 = vpop.permute.xlu0 %752  ;;  %vm411_vm11 = vcmask 1047552  }
  0x98   : > { %v755_v34 = vunpack.i.h.bf16 %v753_v32  ;;  %v754_v35 = vunpack.i.l.bf16 %v753_v32  ;;  %v376_v37 = vsel %vm369_vm8, %v372_v31, %v277_v30  ;;  %vm1011_vm8 = vmand %vm394_vm1, %vm395_vm4 }
  0x99   : > { %v758_v36 = vpop.permute.xlu1 %757 }
  0x9a   : > { %v284_v38 = vsel %vm251_vm7, %v754_v35, %v755_v34  ;;  %v760_v40 = vunpack.i.h.bf16 %v758_v36  ;;  %v759_v41 = vunpack.i.l.bf16 %v758_v36 }
  0x9b   : > { %v381_v42 = vsel %vm994_vm0, %v376_v37, %v284_v38  ;;  %v763_v43 = vpop.permute.xlu0 %762 }
  0x9c   : > { %v296_v44 = vsel %vm213_vm2, %v759_v41, %v760_v40  ;;  %v384_v45 = vsel %vm378_vm12, %v381_v42, %v912_v19  ;;  %v765_v47 = vunpack.i.h.bf16 %v763_v43  ;;  %v764_v48 = vunpack.i.l.bf16 %v763_v43 }
  0x9d   : > { %v389_v49 = vsel %vm1001_vm3, %v384_v45, %v296_v44  ;;  %v768_v50 = vpop.permute.xlu1 %767  ;;  %vm412_vm12 = vsmask.f32 7424 }
  0x9e   : > { %v304_v51 = vsel %vm251_vm7, %v764_v48, %v765_v47  ;;  %v392_v52 = vsel %vm386_vm14, %v389_v49, %v244_v18  ;;  %v770_v53 = vunpack.i.h.bf16 %v768_v50  ;;  %v769_v54 = vunpack.i.l.bf16 %v768_v50  ;;  %vm413_vm13 = vmand %vm411_vm11, %vm412_vm12 }
  0x9f   : > { %v397_v55 = vsel %vm1011_vm8, %v392_v52, %v304_v51  ;;  %v342_v56 = vpop.permute.xlu0 %341 }
  0xa0   : > { %v330_v57 = vsel %vm213_vm2, %v769_v54, %v770_v53  ;;  %v400_v58 = vsel %vm394_vm1, %v397_v55, %v912_v19  ;;  %v343_v59 = vsel %vm243_vm5, %v965_v7, %v342_v56 }
  0xa1   : > { %v773_v60 = vpop.permute.xlu1 %772  ;;  %v405_v61 = vsel %vm404_vm10, %v400_v58, %v330_v57 }
  0xa2   : > { %v775_v62 = vunpack.i.h.bf16 %v773_v60  ;;  %v774_v63 = vunpack.i.l.bf16 %v773_v60  ;;  %v409_v1 = vsel %vm402_vm6, %v405_v61, %v343_v59 }
  0xa4   : > { %v350_v0 = vsel %vm251_vm7, %v774_v63, %v775_v62 }
  0xa5   : > { %v414_v2 = vsel %vm413_vm13, %v409_v1, %v350_v0 }
  0xa6   : > { %544 = vmatmul.mubr.bf16.vlgmr.msra.gmra.mrb[0].mxu0 %v414_v2 }
 0x179   : > { %v545_v3 = vpop.f32.mrb[0].mxu0 }
 0x17a   : > { %v554_v4 = vmul.f32 %v545_v3, %v545_v3  ;;  %v547_v5 = vpop.f32.mrb[1].mxu0 }
 0x17b   : > { %v556_v6 = vmul.f32 %v547_v5, %v547_v5  ;;  %v549_v19 = vpop.f32.mrb[2].mxu0 }
 0x17c   : > { %v555_v8 = vmul.f32 %v549_v19, %v549_v19  ;;  %v551_v9 = vpop.f32.mrb[3].mxu0 }
 0x17d   : > { %v558_v7 = vadd.f32 %v556_v6, %v554_v4  ;;  %v557_v10 = vmul.f32 %v551_v9, %v551_v9 }
 0x17f   : > { %802 = vrsqrt.f32 %v558_v7  ;;  %v559_v11 = vadd.f32 %v557_v10, %v555_v8  ;;  %vm562_vm2 = vcmp.eq.f32.partialorder %v558_v7, inf  ;;  %v565_v18 = vand.u32 2147483648, %v558_v7 }
 0x180   : > { %vm564_vm7 = vcmp.eq.f32.partialorder %v558_v7, 0.0 }
 0x181   : > { %804 = vrsqrt.f32 %v559_v11  ;;  %vm569_vm5 = vcmp.eq.f32.partialorder %v559_v11, inf  ;;  %v572_v20 = vand.u32 2147483648, %v559_v11  ;;  %vm571_vm14 = vcmp.eq.f32.partialorder %v559_v11, 0.0 }
 0x189   : > { %v803_v13 = vpop.eup %802 }
 0x18a   : > { %v561_v14 = vmul.f32 %v803_v13, %v558_v7 }
 0x18b   : > { %v805_v15 = vpop.eup %804 }
 0x18c   : > { %v563_v16 = vsel %vm562_vm2, %v558_v7, %v561_v14  ;;  %v568_v17 = vmul.f32 %v805_v15, %v559_v11 }
 0x18d   : > { %v566_v22 = vsel %vm564_vm7, %v565_v18, %v563_v16 }
 0x18e   : > { %v570_v21 = vsel %vm569_vm5, %v559_v11, %v568_v17 }
 0x18f   : > { %v573_v23 = vsel %vm571_vm14, %v572_v20, %v570_v21 }
 0x190   : > { %v704_v24 = vpack.c.bf16 %v573_v23, %v566_v22 }
 0x192   : > { %705 = vst [vmem:[%s176_s3] sm:$0xff] %v704_v24  }
 0x193 PF: > { %s12_s11 = sadd.s32 1, %s828_s11   ;;  %s1055_s9 = smov %s824_s10 }
 0x194   : > { %p9_p5 = scmp.ge.s32.totalorder %s12_s11, 4   ;;  %s1056_s10 = smov %s1058_s12 }
 0x196   :  { %11 = sbr.rel (!%p9_p5) target bundleno = 2 (0x2), region = 58 }

// kernel: _lambda_.9
= control target key start
LH: loop header
LB: loop body
LE: loop exit
PB: predicated region body
PF: predicated region fallthrough
CT: control target
= control target key end

     0   :  { %s1164_s15 = smov 0   ;;  %s1468_s0 = inlined_call_operand.vmem [shape: bf16[32,864], index: 0, kind: input, shape index: {}]   ;;  %s1469_s1 = inlined_call_operand.vmem [shape: f32[32,1], index: 1, kind: input, shape index: {}]   ;;  %s1470_s2 = inlined_call_operand.vmem [shape: bf16[2,67,32,12], index: 2, kind: input, shape index: {}]   ;;  %s1471_s3 = inlined_call_operand.vmem [shape: bf16[2,67,32,12], index: 3, kind: input, shape index: {}]   ;;  %s1472_s4 = inlined_call_operand.vmem [shape: bf16[2,65,32,8], index: 4, kind: output, shape index: {}]  }
   0x1 LB: > { %s914_s16 = sadd.s32 4294967295, %s1125_s15   ;;  %p918_p0 = scmp.ge.s32.totalorder %s1125_s15, 1  ;;  %s1125_s15 = sphi %s1164_s15, %s14_s15  }
   0x2   : > { %p172_p1 = scmp.lt.s32.totalorder %s1125_s15, 3 }
   0x4   : > { %p173_p2 = pnand %p918_p0, %p172_p1 }
   0x5   : > { %p203_p3 = scmp.lt.s32.totalorder (!%p173_p2), %s914_s16, 1  ;;  %v1175_v0 = vld [vmem:[%s1468_s0] sm:$0xff] (!%p173_p2)  ;;  %v1180_v1 = vld [vmem:[%s1468_s0 + $0x8] sm:$0xff] (!%p173_p2)  ;;  %v1185_v2 = vld [vmem:[%s1468_s0 + $0x10] sm:$0xff] (!%p173_p2)  ;;  %s1287_s20 = smov (!%p173_p2), 0  }
   0x6   : > { %176 = sbr.rel (%p173_p2) target bundleno = 522 (0x20a), region = 36  ;;  %v1190_v3 = vld [vmem:[%s1468_s0 + $0x18] sm:$0xf] (!%p173_p2)  ;;  %v1195_v4 = vld [vmem:[%s1468_s0 + $0x1c] sm:$0xff] (!%p173_p2)  ;;  %v1200_v5 = vld [vmem:[%s1468_s0 + $0x24] sm:$0xff] (!%p173_p2) }
   0x7   : > { %v1205_v6 = vld [vmem:[%s1468_s0 + $0x2c] sm:$0xff] (!%p173_p2)  ;;  %v1210_v7 = vld [vmem:[%s1468_s0 + $0x34] sm:$0xf] (!%p173_p2)  ;;  %v1215_v8 = vld [vmem:[%s1468_s0 + $0x38] sm:$0xff] (!%p173_p2) }
   0x8   : > { %v1220_v9 = vld [vmem:[%s1468_s0 + $0x40] sm:$0xff] (!%p173_p2)  ;;  %v1225_v10 = vld [vmem:[%s1468_s0 + $0x48] sm:$0xff] (!%p173_p2)  ;;  %v1230_v11 = vld [vmem:[%s1468_s0 + $0x50] sm:$0xf] (!%p173_p2) }
   0x9   : > { %v1235_v12 = vld [vmem:[%s1468_s0 + $0x54] sm:$0xff] (!%p173_p2)  ;;  %v1240_v13 = vld [vmem:[%s1468_s0 + $0x5c] sm:$0xff] (!%p173_p2)  ;;  %v1245_v14 = vld [vmem:[%s1468_s0 + $0x64] sm:$0xff] (!%p173_p2) }
   0xa   : > { %v1250_v15 = vld [vmem:[%s1468_s0 + $0x6c] sm:$0xf] (!%p173_p2)  ;;  %v1255_v16 = vld [vmem:[%s1469_s1] sm:$0xff] (!%p173_p2)  ;;  %v1275_v18 = vld [vmem:[%s1469_s1 + $0x10] sm:$0xff] (!%p173_p2) }
   0xb   : > { %v1260_v17 = vld [vmem:[%s1469_s1 + $0x8] sm:$0xff] (!%p173_p2)  ;;  %v1280_v19 = vld [vmem:[%s1469_s1 + $0x18] sm:$0xff] (!%p173_p2) }
   0xd   : > { %s1474_s16 = smov (!%p203_p3, %s914_s16), 1 }
   0xe   : > { %s1075_s17 = smul.u32 1072, %s1474_s16 }
   0xf   : > { %s1076_s24 = smul.u32 1040, %s1474_s16 }
  0x10   : > { %s1265_s7 = scalar_lea.vmem %s1470_s2, %s1075_s17  ;;  %s1270_s9 = scalar_lea.vmem %s1471_s3, %s1075_s17 }
  0x11   : > { %s1285_s19 = scalar_lea.vmem %s1472_s4, %s1076_s24 }
  0x12 LB: >> { %s1293_s17 = sshll.u32 %s1129_s20, 4  ;;  %s1131_s23 = smov 2   ;;  %v938_v32 = vcombine.high %v1175_v0, %v1195_v4  ;;  %v940_v33 = vcombine.high %v1180_v1, %v1200_v5  ;;  %v1138_v52 = vmov 0   ;;  %vm598_vm0 = vcmask 785408   ;;  %s1129_s20 = sphi %s1287_s20, %s244_s20  }
  0x13   : >> { %s1297_s21 = scalar_lea.vmem %s1270_s9, %s1293_s17  ;;  %s247_s22 = scalar_lea.vmem %s1265_s7, %s1293_s17  ;;  %1102 = vset.pattern.permute.xlu1 %v1138_v52  ;;  %1101 = vset.pattern.permute.xlu0 %v1138_v52  ;;  %vm831_vm2 = vcmask 60416  }
  0x14   : >> { %v1302_v20 = vld [vmem:[%s1297_s21 + $0x20] sm:$0xff]   ;;  %v1305_v22 = vld [vmem:[%s247_s22 + $0x28] sm:$0xff]   ;;  %v1307_v23 = vld [vmem:[%s247_s22 + $0x10] sm:$0xff]   ;;  %s1132_s24 = smov 127   ;;  %s1133_s25 = smov 3   ;;  %637 = vmatprep.mubr.bf16.mxu0 %v938_v32  ;;  %686 = vmatprep.mubr.bf16.mxu1 %v940_v33 }
  0x15   : >> { %v1104_v21 = vld [vmem:[%s247_s22 + $0x20] sm:$0xff]   ;;  %426 = vrot.lane.b32.xlu1 %v1302_v20, %s1131_s23  ;;  %v1311_v24 = vld [vmem:[%s247_s22 + $0x18] sm:$0xff]   ;;  %v1315_v25 = vld [vmem:[%s1297_s21 + $0x28] sm:$0xff]   ;;  %s1134_s26 = smov 1   ;;  %s1135_s27 = smov 126  }
  0x16   : >> { %422 = vrot.lane.b32.xlu0 %v1104_v21, %s1131_s23  ;;  %v1324_v26 = vld [vmem:[%s247_s22] sm:$0xff]   ;;  %v1327_v27 = vld [vmem:[%s247_s22 + $0x8] sm:$0xff]   ;;  %v1346_v30 = vld [vmem:[%s1297_s21 + $0x10] sm:$0xff]   ;;  %s1136_s28 = smov 125   ;;  %s1137_s29 = smov 124  }
  0x17   : >> { %v1333_v28 = vld [vmem:[%s1297_s21] sm:$0xff]   ;;  %v1338_v29 = vld [vmem:[%s1297_s21 + $0x8] sm:$0xff]   ;;  %v1356_v31 = vld [vmem:[%s1297_s21 + $0x18] sm:$0xff]   ;;  %s830_s30 = scalar_lea.vmem %s1285_s19, %s1293_s17  ;;  %s244_s20 = sadd.s32 1, %s1129_s20  }
  0x18   : >> { %p241_p4 = scmp.ge.s32.totalorder %s244_s20, 65  }
  0x19   : >> { %364 = vrot.lane.b32.xlu1 %v1307_v23, %s1132_s24 }
  0x1a   : >> { %424 = vrot.lane.b32.xlu0 %v1305_v22, %s1131_s23 }
  0x1d   : >> { %366 = vrot.lane.b32.xlu1 %v1311_v24, %s1132_s24 }
  0x1e   : >> { %428 = vrot.lane.b32.xlu0 %v1315_v25, %s1131_s23 }
  0x21   : >> { %404 = vrot.lane.b32.xlu1 %v1104_v21, %s1133_s25 }
  0x22   : >> { %430 = vrot.lane.b32.xlu0 %v1104_v21, %s1134_s26 }
  0x25   : >> { %406 = vrot.lane.b32.xlu1 %v1305_v22, %s1133_s25 }
  0x26   : >> { %432 = vrot.lane.b32.xlu0 %v1305_v22, %s1134_s26 }
  0x29   : >> { %418 = vrot.lane.b32.xlu1 %v1302_v20, %s1133_s25 }
  0x2a   : >> { %434 = vrot.lane.b32.xlu0 %v1302_v20, %s1134_s26 }
  0x2d   : >> { %436 = vrot.lane.b32.xlu1 %v1315_v25, %s1134_s26 }
  0x2e   : >> { %310 = vrot.lane.b32.xlu0 %v1324_v26, %s1135_s27 }
  0x31   : >> { %312 = vrot.lane.b32.xlu1 %v1327_v27, %s1135_s27 }
  0x32   : >> { %420 = vrot.lane.b32.xlu0 %v1315_v25, %s1133_s25 }
  0x35   : >> { %438 = vrot.lane.b32.xlu1 %v1104_v21, %s1132_s24 }
  0x36   : >> { %316 = vrot.lane.b32.xlu0 %v1333_v28, %s1135_s27 }
  0x39   : >> { %440 = vrot.lane.b32.xlu1 %v1305_v22, %s1132_s24 }
  0x3a   : >> { %318 = vrot.lane.b32.xlu0 %v1338_v29, %s1135_s27 }
  0x3d   : >> { %298 = vrot.lane.b32.xlu1 %v1324_v26, %s1132_s24 }
  0x3e   : >> { %322 = vrot.lane.b32.xlu0 %v1324_v26, %s1136_s28 }
  0x41   : >> { %370 = vrot.lane.b32.xlu1 %v1346_v30, %s1132_s24 }
  0x42   : >> { %324 = vrot.lane.b32.xlu0 %v1327_v27, %s1136_s28 }
  0x45   : >> { %334 = vrot.lane.b32.xlu1 %v1324_v26, %s1137_s29 }
  0x46   : >> { %300 = vrot.lane.b32.xlu0 %v1327_v27, %s1132_s24 }
  0x49   : >> { %372 = vrot.lane.b32.xlu1 %v1356_v31, %s1132_s24 }
  0x4a   : >> { %328 = vrot.lane.b32.xlu0 %v1333_v28, %s1136_s28 }
  0x4d   : >> { %336 = vrot.lane.b32.xlu1 %v1327_v27, %s1137_s29 }
  0x4e   : >> { %304 = vrot.lane.b32.xlu0 %v1333_v28, %s1132_s24 }
  0x51   : >> { %376 = vrot.lane.b32.xlu1 %v1307_v23, %s1135_s27 }
  0x52   : >> { %330 = vrot.lane.b32.xlu0 %v1338_v29, %s1136_s28 }
  0x55   : >> { %378 = vrot.lane.b32.xlu1 %v1311_v24, %s1135_s27 }
  0x56   : >> { %306 = vrot.lane.b32.xlu0 %v1338_v29, %s1132_s24 }
  0x59   : >> { %442 = vrot.lane.b32.xlu1 %v1346_v30, %s1136_s28 }
  0x5a   : >> { %382 = vrot.lane.b32.xlu0 %v1346_v30, %s1135_s27 }
  0x5d   : >> { %384 = vrot.lane.b32.xlu1 %v1356_v31, %s1135_s27 }
  0x5e   : >> { %444 = vrot.lane.b32.xlu0 %v1356_v31, %s1136_s28 }
  0x61   : >> { %390 = vrot.lane.b32.xlu1 %v1311_v24, %s1136_s28 }
  0x62   : >> { %388 = vrot.lane.b32.xlu0 %v1307_v23, %s1136_s28 }
  0x65   : >> { %474 = vrot.lane.b32.xlu1 %v1104_v21, %s1136_s28 }
  0x87   : >> { %v427_v34 = vpop.permute.xlu1 %426 }
  0x88   : >> { %v423_v35 = vpop.permute.xlu0 %422 }
  0x89   : >> { %458 = vrot.lane.b32.xlu0 %v423_v35, %s1136_s28 }
  0x8b   : >> { %v1389_v36 = vpop.permute.xlu1 %364 }
  0x8c   : >> { %v425_v37 = vpop.permute.xlu0 %424 }
  0x8d   : >> { %460 = vrot.lane.b32.xlu1 %v425_v37, %s1136_s28  ;;  %476 = vrot.lane.b32.xlu0 %v1305_v22, %s1136_s28 }
  0x8f   : >> { %v1394_v38 = vpop.permute.xlu1 %366 }
  0x90   : >> { %v429_v39 = vpop.permute.xlu0 %428 }
  0x91   : >> { %446 = vrot.lane.b32.xlu1 %v1389_v36, %s1136_s28  ;;  %462 = vrot.lane.b32.xlu0 %v427_v34, %s1136_s28  ;;  %v944_v34 = vcombine.low %v1215_v8, %v1235_v12 }
  0x93   : >> { %v405_v40 = vpop.permute.xlu1 %404 }
  0x94   : >> { %v431_v41 = vpop.permute.xlu0 %430 }
  0x95   : >> { %464 = vrot.lane.b32.xlu1 %v429_v39, %s1136_s28  ;;  %448 = vrot.lane.b32.xlu0 %v1394_v38, %s1136_s28  ;;  %v939_v39 = vcombine.low %v1180_v1, %v1200_v5 }
  0x97   : >> { %v407_v42 = vpop.permute.xlu1 %406 }
  0x98   : >> { %v433_v43 = vpop.permute.xlu0 %432 }
  0x99   : >> { %450 = vrot.lane.b32.xlu1 %v405_v40, %s1136_s28  ;;  %466 = vrot.lane.b32.xlu0 %v431_v41, %s1136_s28  ;;  %v947_v40 = vcombine.high %v1220_v9, %v1240_v13 }
  0x9b   : >> { %v419_v44 = vpop.permute.xlu1 %418 }
  0x9c   : >> { %v435_v45 = vpop.permute.xlu0 %434 }
  0x9d   : >> { %470 = vrot.lane.b32.xlu1 %v435_v45, %s1136_s28  ;;  %468 = vrot.lane.b32.xlu0 %v433_v43, %s1136_s28 }
  0x9f   : >> { %v437_v46 = vpop.permute.xlu1 %436 }
  0xa0   : >> { %v311_v47 = vpop.permute.xlu0 %310 }
  0xa1   : >> { %454 = vrot.lane.b32.xlu1 %v419_v44, %s1136_s28  ;;  %452 = vrot.lane.b32.xlu0 %v407_v42, %s1136_s28 }
  0xa2   : >> { %967 = vmatprep.subr.bf16.mxu0 %v311_v47 }
  0xa3   : >> { %v313_v48 = vpop.permute.xlu1 %312  ;;  %968 = vmatpush3.bf16.msra.mxu0 %v1324_v26 }
  0xa4   : >> { %v421_v49 = vpop.permute.xlu0 %420  ;;  %969 = vmatprep.subr.bf16.mxu0 %v313_v48 }
  0xa5   : >> { %478 = vrot.lane.b32.xlu1 %v1302_v20, %s1136_s28  ;;  %472 = vrot.lane.b32.xlu0 %v437_v46, %s1136_s28 }
  0xa7   : >> { %v439_v50 = vpop.permute.xlu1 %438  ;;  %970 = vmatpush3.bf16.msra.mxu0 %v1327_v27  ;;  %v937_v27 = vcombine.low %v1175_v0, %v1195_v4 }
  0xa8   : >> { %v317_v51 = vpop.permute.xlu0 %316 }
  0xa9   : >> { %480 = vrot.lane.b32.xlu1 %v1315_v25, %s1136_s28  ;;  %456 = vrot.lane.b32.xlu0 %v421_v49, %s1136_s28 }
  0xaa   : >> { %971 = vmatprep.subr.bf16.mxu0 %v317_v51 }
  0xab   : >> { %v441_v53 = vpop.permute.xlu1 %440  ;;  %972 = vmatpush3.bf16.msra.mxu0 %v1333_v28  ;;  %v945_v28 = vcombine.high %v1215_v8, %v1235_v12 }
  0xac   : >> { %v319_v54 = vpop.permute.xlu0 %318 }
  0xad   : >> { %482 = vrot.lane.b32.xlu0 %v439_v50, %s1136_s28  ;;  %484 = vrot.lane.b32.xlu1 %v441_v53, %s1136_s28 }
  0xae   : >> { %973 = vmatprep.subr.bf16.mxu0 %v319_v54 }
  0xaf   : >> { %v299_v55 = vpop.permute.xlu1 %298  ;;  %974 = vmatpush3.bf16.msra.mxu0 %v1338_v29 }
  0xb0   : >> { %v323_v56 = vpop.permute.xlu0 %322 }
  0xb1   : >> { %975 = vmatprep.subr.bf16.mxu0 %v323_v56  ;;  %515 = vperm.xlu1 %1102, %v1260_v17  }
  0xb2   : >> { %510 = vperm.xlu0 %1101, %v1255_v16  }
  0xb3   : >> { %v371_v57 = vpop.permute.xlu1 %370  ;;  %976 = vmatpush3.bf16.msra.mxu0 %v299_v55 }
  0xb4   : >> { %v325_v58 = vpop.permute.xlu0 %324  ;;  %995 = vmatprep.subr.bf16.mxu1 %v371_v57  ;;  %v941_v57 = vcombine.low %v1185_v2, %v1205_v6 }
  0xb5   : >> { %977 = vmatprep.subr.bf16.mxu0 %v325_v58  ;;  %520 = vperm.xlu1 %1102, %v1275_v18   ;;  %v949_v58 = vcombine.high %v1225_v10, %v1245_v14 }
  0xb6   : >> { %525 = vperm.xlu0 %1101, %v1280_v19  }
  0xb7   : >> { %v335_v59 = vpop.permute.xlu1 %334 }
  0xb8   : >> { %v301_v60 = vpop.permute.xlu0 %300  ;;  %996 = vmatpush3.bf16.msra.mxu1 %v335_v59 }
  0xb9   : >> { %978 = vmatpush3.bf16.msra.mxu0 %v301_v60 }
  0xbb   : >> { %v373_v61 = vpop.permute.xlu1 %372 }
  0xbc   : >> { %v329_v62 = vpop.permute.xlu0 %328  ;;  %997 = vmatprep.subr.bf16.mxu1 %v373_v61  ;;  %v948_v61 = vcombine.low %v1225_v10, %v1245_v14 }
  0xbd   : >> { %979 = vmatprep.subr.bf16.mxu0 %v329_v62  ;;  %v950_v62 = vcombine.low %v1230_v11, %v1250_v15 }
  0xbf   : >> { %v337_v63 = vpop.permute.xlu1 %336 }
  0xc0   : >> { %v305_v20 = vpop.permute.xlu0 %304  ;;  %998 = vmatpush3.bf16.msra.mxu1 %v337_v63 }
  0xc1   : >> { %980 = vmatpush3.bf16.msra.mxu0 %v305_v20 }
  0xc3   : >> { %v377_v21 = vpop.permute.xlu1 %376 }
  0xc4   : >> { %v331_v22 = vpop.permute.xlu0 %330  ;;  %999 = vmatprep.subr.bf16.mxu1 %v377_v21 }
  0xc5   : >> { %1000 = vmatpush3.bf16.msra.mxu1 %v1307_v23  ;;  %981 = vmatprep.subr.bf16.mxu0 %v331_v22 }
  0xc7   : >> { %v379_v25 = vpop.permute.xlu1 %378 }
  0xc8   : >> { %v307_v26 = vpop.permute.xlu0 %306  ;;  %1001 = vmatprep.subr.bf16.mxu1 %v379_v25 }
  0xc9   : >> { %1002 = vmatpush3.bf16.msra.mxu1 %v1311_v24  ;;  %982 = vmatpush3.bf16.msra.mxu0 %v307_v26  ;;  %v942_v24 = vcombine.high %v1185_v2, %v1205_v6 }
  0xcb   : >> { %v443_v29 = vpop.permute.xlu1 %442 }
  0xcc   : >> { %v383_v32 = vpop.permute.xlu0 %382  ;;  %638 = vmatmul.mubr.bf16.vlgmr.msra.gmra.mrb[0].mxu0 %v937_v27 }
  0xcd   : >> { %1003 = vmatprep.subr.bf16.mxu1 %v383_v32  ;;  %645 = vmatprep.mubr.bf16.mxu0 %v945_v28 }
  0xce   : >> { %1004 = vmatpush3.bf16.msra.mxu1 %v1346_v30 }
  0xcf   : >> { %v385_v23 = vpop.permute.xlu1 %384 }
  0xd0   : >> { %v445_v33 = vpop.permute.xlu0 %444  ;;  %1005 = vmatprep.subr.bf16.mxu1 %v385_v23 }
  0xd2   : >> { %1006 = vmatpush3.bf16.msra.mxu1 %v1356_v31  ;;  %v946_v31 = vcombine.low %v1220_v9, %v1240_v13 }
  0xd3   : >> { %v391_v37 = vpop.permute.xlu1 %390 }
  0xd4   : >> { %v389_v35 = vpop.permute.xlu0 %388  ;;  %646 = vmatmul.mubr.bf16.gmra.mrb[4].mxu0 %v944_v34 }
  0xd5   : >> { %1007 = vmatprep.subr.bf16.mxu1 %v389_v35  ;;  %735 = vmatprep.mubr.bf16.mxu0 %v942_v24 }
  0xd6   : >> { %1008 = vmatpush3.bf16.msra.mxu1 %v1389_v36  ;;  %v943_v36 = vcombine.low %v1190_v3, %v1210_v7 }
  0xd7   : >> { %1009 = vmatprep.subr.bf16.mxu1 %v391_v37  ;;  %v475_v30 = vpop.permute.xlu1 %474 }
  0xda   : >> { %1010 = vmatpush3.bf16.msra.mxu1 %v1394_v38 }
  0xdb   : >> { %1059 = vmatprep.subr.bf16.mxu1 %v475_v30 }
  0xdd   : >> { %687 = vmatmul.mubr.bf16.vlgmr.msra.gmra.mrb[0].mxu1 %v939_v39 }
  0xde   : >> { %1060 = vmatpush3.bf16.msra.mxu1 %v475_v30  ;;  %694 = vmatprep.mubr.bf16.mxu1 %v947_v40 }
  0xe5   : >> { %695 = vmatmul.mubr.bf16.gmra.mrb[4].mxu1 %v946_v31 }
  0xe6   : >> { %1071 = vmatprep.mubr.msk.bf16.mxu1 %vm598_vm0, %v943_v36 }
  0xfb   : >> { %v459_v41 = vpop.permute.xlu0 %458 }
  0xfc   : >> { %1023 = vmatprep.subr.bf16.mxu0 %v459_v41 }
  0xfd   : >> { %1024 = vmatpush3.bf16.msra.mxu0 %v443_v29 }
  0xff   : >> { %v461_v38 = vpop.permute.xlu1 %460  ;;  %v477_v42 = vpop.permute.xlu0 %476 }
 0x100   : >> { %1025 = vmatprep.subr.bf16.mxu0 %v461_v38  ;;  %1061 = vmatprep.subr.bf16.mxu1 %v477_v42 }
 0x101   : >> { %1026 = vmatpush3.bf16.msra.mxu0 %v445_v33  ;;  %1062 = vmatpush3.bf16.msra.mxu1 %v477_v42 }
 0x103   : >> { %v447_v43 = vpop.permute.xlu1 %446  ;;  %v463_v44 = vpop.permute.xlu0 %462 }
 0x104   : >> { %1027 = vmatprep.subr.bf16.mxu0 %v463_v44 }
 0x105   : >> { %1028 = vmatpush3.bf16.msra.mxu0 %v447_v43 }
 0x107   : >> { %v465_v45 = vpop.permute.xlu1 %464  ;;  %v449_v46 = vpop.permute.xlu0 %448 }
 0x108   : >> { %1029 = vmatprep.subr.bf16.mxu0 %v465_v45 }
 0x109   : >> { %1030 = vmatpush3.bf16.msra.mxu0 %v449_v46 }
 0x10b   : >> { %v451_v47 = vpop.permute.xlu1 %450  ;;  %v467_v48 = vpop.permute.xlu0 %466 }
 0x10c   : >> { %1031 = vmatprep.subr.bf16.mxu0 %v467_v48 }
 0x10d   : >> { %1032 = vmatpush3.bf16.msra.mxu0 %v451_v47 }
 0x10f   : >> { %v471_v49 = vpop.permute.xlu1 %470  ;;  %v469_v50 = vpop.permute.xlu0 %468 }
 0x110   : >> { %1033 = vmatprep.subr.bf16.mxu0 %v469_v50 }
 0x113   : >> { %v455_v51 = vpop.permute.xlu1 %454  ;;  %v453_v52 = vpop.permute.xlu0 %452 }
 0x114   : >> { %1034 = vmatpush3.bf16.msra.mxu0 %v453_v52 }
 0x115   : >> { %1035 = vmatprep.subr.bf16.mxu0 %v471_v49 }
 0x117   : >> { %v479_v53 = vpop.permute.xlu1 %478  ;;  %v473_v54 = vpop.permute.xlu0 %472 }
 0x118   : >> { %1036 = vmatpush3.bf16.msra.mxu0 %v455_v51  ;;  %1063 = vmatprep.subr.bf16.mxu1 %v479_v53 }
 0x119   : >> { %1037 = vmatprep.subr.bf16.mxu0 %v473_v54  ;;  %1064 = vmatpush3.bf16.msra.mxu1 %v479_v53 }
 0x11b   : >> { %v481_v55 = vpop.permute.xlu1 %480  ;;  %v457_v56 = vpop.permute.xlu0 %456 }
 0x11c   : >> { %1038 = vmatpush3.bf16.msra.mxu0 %v457_v56  ;;  %1065 = vmatprep.subr.bf16.mxu1 %v481_v55 }
 0x11d   : >> { %1066 = vmatpush3.bf16.msra.mxu1 %v481_v55 }
 0x11f   : >> { %736 = vmatmul.mubr.bf16.vlgmr.msra.gmra.mrb[8].mxu0 %v941_v57  ;;  %v483_v59 = vpop.permute.xlu0 %482  ;;  %v485_v60 = vpop.permute.xlu1 %484 }
 0x120   : >> { %1067 = vmatprep.subr.bf16.mxu1 %v483_v59  ;;  %743 = vmatprep.mubr.bf16.mxu0 %v949_v58 }
 0x121   : >> { %1068 = vmatpush3.bf16.msra.mxu1 %v483_v59 }
 0x122   : >> { %1069 = vmatprep.subr.bf16.mxu1 %v485_v60 }
 0x125   : >> { %1070 = vmatpush3.bf16.msra.mxu1 %v485_v60 }
 0x127   : >> { %744 = vmatmul.mubr.bf16.gmra.mrb[12].mxu0 %v948_v61 }
 0x128   : >> { %1072 = vmatmul.mubr.msk.bf16.vlgmr.msra.gmra.mrb[8].mxu1 %vm598_vm0, %v950_v62 }
 0x130   : >> { %v516_v24 = vpop.permute.xlu1 %515 }
 0x131   : >> { %v511_v34 = vpop.permute.xlu0 %510 }
 0x134   : >> { %v521_v42 = vpop.permute.xlu1 %520 }
 0x135   : >> { %v526_v44 = vpop.permute.xlu0 %525 }
 0x19f   : >> { %v983_v63 = vpop.f32.mrb[0].mxu0 }
 0x1a0   : >> { %v984_v20 = vpop.f32.mrb[1].mxu0 }
 0x1a1   : >> { %v985_v21 = vadd.f32 %v984_v20, %v983_v63  ;;  %v986_v22 = vpop.f32.mrb[2].mxu0 }
 0x1a2   : >> { %v987_v25 = vpop.f32.mrb[3].mxu0 }
 0x1a3   : >> { %v988_v26 = vadd.f32 %v987_v25, %v986_v22  ;;  %v640_v37 = vadd.f32 %v985_v21, %v511_v34 }
 0x1a5   : >> { %v643_v31 = vadd.f32 %v988_v26, %v516_v24 }
 0x1a7   : >> { %v989_v27 = vpop.f32.mrb[4].mxu0 }
 0x1a8   : >> { %v990_v28 = vpop.f32.mrb[5].mxu0 }
 0x1a9   : >> { %v991_v29 = vadd.f32 %v990_v28, %v989_v27  ;;  %v992_v32 = vpop.f32.mrb[6].mxu0 }
 0x1aa   : >> { %v993_v23 = vpop.f32.mrb[7].mxu0 }
 0x1ab   : >> { %v994_v33 = vadd.f32 %v993_v23, %v992_v32  ;;  %v648_v46 = vadd.f32 %v991_v29, %v521_v42 }
 0x1ad   : >> { %v651_v50 = vadd.f32 %v994_v33, %v526_v44 }
 0x1b0   : >> { %v1011_v35 = vpop.f32.mrb[0].mxu1 }
 0x1b1   : >> { %v1012_v30 = vpop.f32.mrb[1].mxu1 }
 0x1b2   : >> { %v1013_v39 = vadd.f32 %v1012_v30, %v1011_v35  ;;  %v1014_v40 = vpop.f32.mrb[2].mxu1 }
 0x1b3   : >> { %v1015_v36 = vpop.f32.mrb[3].mxu1 }
 0x1b4   : >> { %v1016_v41 = vadd.f32 %v1015_v36, %v1014_v40  ;;  %v689_v38 = vadd.f32 %v1013_v39, %v640_v37 }
 0x1b6   : >> { %v692_v43 = vadd.f32 %v1016_v41, %v643_v31 }
 0x1b8   : >> { %v1017_v45 = vpop.f32.mrb[4].mxu1 }
 0x1b9   : >> { %v1018_v47 = vpop.f32.mrb[5].mxu1 }
 0x1ba   : >> { %v1019_v48 = vadd.f32 %v1018_v47, %v1017_v45  ;;  %v1020_v49 = vpop.f32.mrb[6].mxu1 }
 0x1bb   : >> { %v1021_v51 = vpop.f32.mrb[7].mxu1 }
 0x1bc   : >> { %v697_v52 = vadd.f32 %v1019_v48, %v648_v46  ;;  %v1022_v53 = vadd.f32 %v1021_v51, %v1020_v49 }
 0x1be   : >> { %v700_v54 = vadd.f32 %v1022_v53, %v651_v50 }
 0x1f2   : >> { %v1039_v55 = vpop.f32.mrb[8].mxu0 }
 0x1f3   : >> { %v1040_v56 = vpop.f32.mrb[9].mxu0 }
 0x1f4   : >> { %v1041_v57 = vadd.f32 %v1040_v56, %v1039_v55  ;;  %v1042_v58 = vpop.f32.mrb[10].mxu0 }
 0x1f5   : >> { %v1043_v59 = vpop.f32.mrb[11].mxu0 }
 0x1f6   : >> { %v1044_v60 = vadd.f32 %v1043_v59, %v1042_v58  ;;  %v738_v61 = vadd.f32 %v1041_v57, %v689_v38 }
 0x1f8   : >> { %v741_v62 = vadd.f32 %v1044_v60, %v692_v43 }
 0x1fa   : >> { %v1045_v63 = vpop.f32.mrb[12].mxu0 }
 0x1fb   : >> { %v1046_v20 = vpop.f32.mrb[13].mxu0  ;;  %v1073_v21 = vpop.f32.mrb[8].mxu1 }
 0x1fc   : >> { %v1047_v22 = vadd.f32 %v1046_v20, %v1045_v63  ;;  %v1048_v25 = vpop.f32.mrb[14].mxu0  ;;  %v786_v26 = vpop.f32.mrb[9].mxu1 }
 0x1fd   : >> { %v787_v27 = vadd.f32 %v786_v26, %v738_v61  ;;  %v1049_v28 = vpop.f32.mrb[15].mxu0  ;;  %v1074_v29 = vpop.f32.mrb[10].mxu1 }
 0x1fe   : >> { %v746_v32 = vadd.f32 %v1047_v22, %v697_v52  ;;  %v1050_v23 = vadd.f32 %v1049_v28, %v1048_v25  ;;  %v789_v33 = vpop.f32.mrb[11].mxu1 }
 0x1ff   : >> { %vm801_vm1 = vcmp.ge.f32.partialorder %v787_v27, 0.0  ;;  %v805_v34 = vmul.f32 0.1, %v787_v27  ;;  %v790_v24 = vadd.f32 %v789_v33, %v741_v62 }
 0x200   : >> { %v795_v35 = vadd.f32 %v1073_v21, %v746_v32  ;;  %v749_v37 = vadd.f32 %v1050_v23, %v700_v54 }
 0x201   : >> { %v809_v30 = vsel %vm801_vm1, %v787_v27, %v805_v34  ;;  %vm802_vm3 = vcmp.ge.f32.partialorder %v790_v24, 0.0  ;;  %v806_v39 = vmul.f32 0.1, %v790_v24 }
 0x202   : >> { %vm803_vm4 = vcmp.ge.f32.partialorder %v795_v35, 0.0  ;;  %v807_v40 = vmul.f32 0.1, %v795_v35  ;;  %v962_v31 = vpack.c.bf16 %v809_v30, %v809_v30  ;;  %v798_v36 = vadd.f32 %v1074_v29, %v749_v37 }
 0x203   : >> { %v810_v41 = vsel %vm802_vm3, %v790_v24, %v806_v39  ;;  %243 = sbr.rel (!%p241_p4) target bundleno = 18 (0x12), region = 79 }
 0x204   : >> { %v811_v38 = vsel %vm803_vm4, %v795_v35, %v807_v40  ;;  %832 = vst.msk [vmem:[%s830_s30] sm:$0xf] %vm831_vm2, %v962_v31  ;;  %vm804_vm5 = vcmp.ge.f32.partialorder %v798_v36, 0.0  ;;  %v808_v42 = vmul.f32 0.1, %v798_v36  ;;  %v963_v43 = vpack.c.bf16 %v810_v41, %v810_v41 }
 0x205   : >> { %v964_v44 = vpack.c.bf16 %v811_v38, %v811_v38 }
 0x206   : >> { %v812_v45 = vsel %vm804_vm5, %v798_v36, %v808_v42  ;;  %833 = vst.msk [vmem:[%s830_s30 + $0x4] sm:$0xf] %vm831_vm2, %v963_v43 }
 0x207   : >> { %834 = vst.msk [vmem:[%s830_s30 + $0x8] sm:$0xf] %vm831_vm2, %v964_v44  ;;  %v965_v46 = vpack.c.bf16 %v812_v45, %v812_v45 }
 0x209   : >> { %835 = vst.msk [vmem:[%s830_s30 + $0xc] sm:$0xf] %vm831_vm2, %v965_v46 }
 0x20a PF: > { %s14_s15 = sadd.s32 1, %s1125_s15  }
 0x20b   : > { %p11_p5 = scmp.ge.s32.totalorder %s14_s15, 4  }
 0x20d   :  { %13 = sbr.rel (!%p11_p5) target bundleno = 1 (0x1), region = 90 }

// kernel: _lambda_.10
= control target key start
LH: loop header
LB: loop body
LE: loop exit
PB: predicated region body
PF: predicated region fallthrough
CT: control target
= control target key end

     0   :  { %s1164_s15 = smov 0   ;;  %s1468_s0 = inlined_call_operand.vmem [shape: bf16[32,864], index: 0, kind: input, shape index: {}]   ;;  %s1469_s1 = inlined_call_operand.vmem [shape: f32[32,1], index: 1, kind: input, shape index: {}]   ;;  %s1470_s2 = inlined_call_operand.vmem [shape: bf16[2,67,32,8], index: 2, kind: input, shape index: {}]   ;;  %s1471_s3 = inlined_call_operand.vmem [shape: bf16[2,67,32,8], index: 3, kind: input, shape index: {}]   ;;  %s1472_s4 = inlined_call_operand.vmem [shape: bf16[2,65,32,4], index: 4, kind: output, shape index: {}]  }
   0x1 LB: > { %s914_s16 = sadd.s32 4294967295, %s1125_s15   ;;  %p918_p0 = scmp.ge.s32.totalorder %s1125_s15, 1  ;;  %s1125_s15 = sphi %s1164_s15, %s14_s15  }
   0x2   : > { %p172_p1 = scmp.lt.s32.totalorder %s1125_s15, 3 }
   0x4   : > { %p173_p2 = pnand %p918_p0, %p172_p1 }
   0x5   : > { %p203_p3 = scmp.lt.s32.totalorder (!%p173_p2), %s914_s16, 1  ;;  %v1175_v0 = vld [vmem:[%s1468_s0] sm:$0xff] (!%p173_p2)  ;;  %v1180_v1 = vld [vmem:[%s1468_s0 + $0x8] sm:$0xff] (!%p173_p2)  ;;  %v1185_v2 = vld [vmem:[%s1468_s0 + $0x10] sm:$0xff] (!%p173_p2)  ;;  %s1287_s20 = smov (!%p173_p2), 0  }
   0x6   : > { %176 = sbr.rel (%p173_p2) target bundleno = 522 (0x20a), region = 36  ;;  %v1190_v3 = vld [vmem:[%s1468_s0 + $0x18] sm:$0xf] (!%p173_p2)  ;;  %v1195_v4 = vld [vmem:[%s1468_s0 + $0x1c] sm:$0xff] (!%p173_p2)  ;;  %v1200_v5 = vld [vmem:[%s1468_s0 + $0x24] sm:$0xff] (!%p173_p2) }
   0x7   : > { %v1205_v6 = vld [vmem:[%s1468_s0 + $0x2c] sm:$0xff] (!%p173_p2)  ;;  %v1210_v7 = vld [vmem:[%s1468_s0 + $0x34] sm:$0xf] (!%p173_p2)  ;;  %v1215_v8 = vld [vmem:[%s1468_s0 + $0x38] sm:$0xff] (!%p173_p2) }
   0x8   : > { %v1220_v9 = vld [vmem:[%s1468_s0 + $0x40] sm:$0xff] (!%p173_p2)  ;;  %v1225_v10 = vld [vmem:[%s1468_s0 + $0x48] sm:$0xff] (!%p173_p2)  ;;  %v1230_v11 = vld [vmem:[%s1468_s0 + $0x50] sm:$0xf] (!%p173_p2) }
   0x9   : > { %v1235_v12 = vld [vmem:[%s1468_s0 + $0x54] sm:$0xff] (!%p173_p2)  ;;  %v1240_v13 = vld [vmem:[%s1468_s0 + $0x5c] sm:$0xff] (!%p173_p2)  ;;  %v1245_v14 = vld [vmem:[%s1468_s0 + $0x64] sm:$0xff] (!%p173_p2) }
   0xa   : > { %v1250_v15 = vld [vmem:[%s1468_s0 + $0x6c] sm:$0xf] (!%p173_p2)  ;;  %v1255_v16 = vld [vmem:[%s1469_s1] sm:$0xff] (!%p173_p2)  ;;  %v1275_v18 = vld [vmem:[%s1469_s1 + $0x10] sm:$0xff] (!%p173_p2) }
   0xb   : > { %v1260_v17 = vld [vmem:[%s1469_s1 + $0x8] sm:$0xff] (!%p173_p2)  ;;  %v1280_v19 = vld [vmem:[%s1469_s1 + $0x18] sm:$0xff] (!%p173_p2) }
   0xd   : > { %s1474_s16 = smov (!%p203_p3, %s914_s16), 1 }
   0xe   : > { %s1075_s17 = smul.u32 1072, %s1474_s16 }
   0xf   : > { %s1076_s24 = smul.u32 1040, %s1474_s16 }
  0x10   : > { %s1265_s7 = scalar_lea.vmem %s1470_s2, %s1075_s17  ;;  %s1270_s9 = scalar_lea.vmem %s1471_s3, %s1075_s17 }
  0x11   : > { %s1285_s19 = scalar_lea.vmem %s1472_s4, %s1076_s24 }
  0x12 LB: >> { %s1293_s17 = sshll.u32 %s1129_s20, 4  ;;  %s1131_s23 = smov 2   ;;  %v938_v32 = vcombine.high %v1175_v0, %v1195_v4  ;;  %v940_v33 = vcombine.high %v1180_v1, %v1200_v5  ;;  %v1138_v52 = vmov 0   ;;  %vm598_vm0 = vcmask 785408   ;;  %s1129_s20 = sphi %s1287_s20, %s244_s20  }
  0x13   : >> { %s1297_s21 = scalar_lea.vmem %s1270_s9, %s1293_s17  ;;  %s247_s22 = scalar_lea.vmem %s1265_s7, %s1293_s17  ;;  %1102 = vset.pattern.permute.xlu1 %v1138_v52  ;;  %1101 = vset.pattern.permute.xlu0 %v1138_v52  ;;  %vm831_vm2 = vcmask 27648  }
  0x14   : >> { %v1302_v20 = vld [vmem:[%s1297_s21 + $0x20] sm:$0xff]   ;;  %v1305_v22 = vld [vmem:[%s247_s22 + $0x28] sm:$0xff]   ;;  %v1307_v23 = vld [vmem:[%s247_s22 + $0x10] sm:$0xff]   ;;  %s1132_s24 = smov 127   ;;  %s1133_s25 = smov 3   ;;  %637 = vmatprep.mubr.bf16.mxu0 %v938_v32  ;;  %686 = vmatprep.mubr.bf16.mxu1 %v940_v33 }
  0x15   : >> { %v1104_v21 = vld [vmem:[%s247_s22 + $0x20] sm:$0xff]   ;;  %426 = vrot.lane.b32.xlu1 %v1302_v20, %s1131_s23  ;;  %v1311_v24 = vld [vmem:[%s247_s22 + $0x18] sm:$0xff]   ;;  %v1315_v25 = vld [vmem:[%s1297_s21 + $0x28] sm:$0xff]   ;;  %s1134_s26 = smov 1   ;;  %s1135_s27 = smov 126  }
  0x16   : >> { %422 = vrot.lane.b32.xlu0 %v1104_v21, %s1131_s23  ;;  %v1324_v26 = vld [vmem:[%s247_s22] sm:$0xff]   ;;  %v1327_v27 = vld [vmem:[%s247_s22 + $0x8] sm:$0xff]   ;;  %v1346_v30 = vld [vmem:[%s1297_s21 + $0x10] sm:$0xff]   ;;  %s1136_s28 = smov 125   ;;  %s1137_s29 = smov 124  }
  0x17   : >> { %v1333_v28 = vld [vmem:[%s1297_s21] sm:$0xff]   ;;  %v1338_v29 = vld [vmem:[%s1297_s21 + $0x8] sm:$0xff]   ;;  %v1356_v31 = vld [vmem:[%s1297_s21 + $0x18] sm:$0xff]   ;;  %s830_s30 = scalar_lea.vmem %s1285_s19, %s1293_s17  ;;  %s244_s20 = sadd.s32 1, %s1129_s20  }
  0x18   : >> { %p241_p4 = scmp.ge.s32.totalorder %s244_s20, 65  }
  0x19   : >> { %364 = vrot.lane.b32.xlu1 %v1307_v23, %s1132_s24 }
  0x1a   : >> { %424 = vrot.lane.b32.xlu0 %v1305_v22, %s1131_s23 }
  0x1d   : >> { %366 = vrot.lane.b32.xlu1 %v1311_v24, %s1132_s24 }
  0x1e   : >> { %428 = vrot.lane.b32.xlu0 %v1315_v25, %s1131_s23 }
  0x21   : >> { %404 = vrot.lane.b32.xlu1 %v1104_v21, %s1133_s25 }
  0x22   : >> { %430 = vrot.lane.b32.xlu0 %v1104_v21, %s1134_s26 }
  0x25   : >> { %406 = vrot.lane.b32.xlu1 %v1305_v22, %s1133_s25 }
  0x26   : >> { %432 = vrot.lane.b32.xlu0 %v1305_v22, %s1134_s26 }
  0x29   : >> { %418 = vrot.lane.b32.xlu1 %v1302_v20, %s1133_s25 }
  0x2a   : >> { %434 = vrot.lane.b32.xlu0 %v1302_v20, %s1134_s26 }
  0x2d   : >> { %436 = vrot.lane.b32.xlu1 %v1315_v25, %s1134_s26 }
  0x2e   : >> { %310 = vrot.lane.b32.xlu0 %v1324_v26, %s1135_s27 }
  0x31   : >> { %312 = vrot.lane.b32.xlu1 %v1327_v27, %s1135_s27 }
  0x32   : >> { %420 = vrot.lane.b32.xlu0 %v1315_v25, %s1133_s25 }
  0x35   : >> { %438 = vrot.lane.b32.xlu1 %v1104_v21, %s1132_s24 }
  0x36   : >> { %316 = vrot.lane.b32.xlu0 %v1333_v28, %s1135_s27 }
  0x39   : >> { %440 = vrot.lane.b32.xlu1 %v1305_v22, %s1132_s24 }
  0x3a   : >> { %318 = vrot.lane.b32.xlu0 %v1338_v29, %s1135_s27 }
  0x3d   : >> { %298 = vrot.lane.b32.xlu1 %v1324_v26, %s1132_s24 }
  0x3e   : >> { %322 = vrot.lane.b32.xlu0 %v1324_v26, %s1136_s28 }
  0x41   : >> { %370 = vrot.lane.b32.xlu1 %v1346_v30, %s1132_s24 }
  0x42   : >> { %324 = vrot.lane.b32.xlu0 %v1327_v27, %s1136_s28 }
  0x45   : >> { %334 = vrot.lane.b32.xlu1 %v1324_v26, %s1137_s29 }
  0x46   : >> { %300 = vrot.lane.b32.xlu0 %v1327_v27, %s1132_s24 }
  0x49   : >> { %372 = vrot.lane.b32.xlu1 %v1356_v31, %s1132_s24 }
  0x4a   : >> { %328 = vrot.lane.b32.xlu0 %v1333_v28, %s1136_s28 }
  0x4d   : >> { %336 = vrot.lane.b32.xlu1 %v1327_v27, %s1137_s29 }
  0x4e   : >> { %304 = vrot.lane.b32.xlu0 %v1333_v28, %s1132_s24 }
  0x51   : >> { %376 = vrot.lane.b32.xlu1 %v1307_v23, %s1135_s27 }
  0x52   : >> { %330 = vrot.lane.b32.xlu0 %v1338_v29, %s1136_s28 }
  0x55   : >> { %378 = vrot.lane.b32.xlu1 %v1311_v24, %s1135_s27 }
  0x56   : >> { %306 = vrot.lane.b32.xlu0 %v1338_v29, %s1132_s24 }
  0x59   : >> { %442 = vrot.lane.b32.xlu1 %v1346_v30, %s1136_s28 }
  0x5a   : >> { %382 = vrot.lane.b32.xlu0 %v1346_v30, %s1135_s27 }
  0x5d   : >> { %384 = vrot.lane.b32.xlu1 %v1356_v31, %s1135_s27 }
  0x5e   : >> { %444 = vrot.lane.b32.xlu0 %v1356_v31, %s1136_s28 }
  0x61   : >> { %390 = vrot.lane.b32.xlu1 %v1311_v24, %s1136_s28 }
  0x62   : >> { %388 = vrot.lane.b32.xlu0 %v1307_v23, %s1136_s28 }
  0x65   : >> { %474 = vrot.lane.b32.xlu1 %v1104_v21, %s1136_s28 }
  0x87   : >> { %v427_v34 = vpop.permute.xlu1 %426 }
  0x88   : >> { %v423_v35 = vpop.permute.xlu0 %422 }
  0x89   : >> { %458 = vrot.lane.b32.xlu0 %v423_v35, %s1136_s28 }
  0x8b   : >> { %v1389_v36 = vpop.permute.xlu1 %364 }
  0x8c   : >> { %v425_v37 = vpop.permute.xlu0 %424 }
  0x8d   : >> { %460 = vrot.lane.b32.xlu1 %v425_v37, %s1136_s28  ;;  %476 = vrot.lane.b32.xlu0 %v1305_v22, %s1136_s28 }
  0x8f   : >> { %v1394_v38 = vpop.permute.xlu1 %366 }
  0x90   : >> { %v429_v39 = vpop.permute.xlu0 %428 }
  0x91   : >> { %446 = vrot.lane.b32.xlu1 %v1389_v36, %s1136_s28  ;;  %462 = vrot.lane.b32.xlu0 %v427_v34, %s1136_s28  ;;  %v944_v34 = vcombine.low %v1215_v8, %v1235_v12 }
  0x93   : >> { %v405_v40 = vpop.permute.xlu1 %404 }
  0x94   : >> { %v431_v41 = vpop.permute.xlu0 %430 }
  0x95   : >> { %464 = vrot.lane.b32.xlu1 %v429_v39, %s1136_s28  ;;  %448 = vrot.lane.b32.xlu0 %v1394_v38, %s1136_s28  ;;  %v939_v39 = vcombine.low %v1180_v1, %v1200_v5 }
  0x97   : >> { %v407_v42 = vpop.permute.xlu1 %406 }
  0x98   : >> { %v433_v43 = vpop.permute.xlu0 %432 }
  0x99   : >> { %450 = vrot.lane.b32.xlu1 %v405_v40, %s1136_s28  ;;  %466 = vrot.lane.b32.xlu0 %v431_v41, %s1136_s28  ;;  %v947_v40 = vcombine.high %v1220_v9, %v1240_v13 }
  0x9b   : >> { %v419_v44 = vpop.permute.xlu1 %418 }
  0x9c   : >> { %v435_v45 = vpop.permute.xlu0 %434 }
  0x9d   : >> { %470 = vrot.lane.b32.xlu1 %v435_v45, %s1136_s28  ;;  %468 = vrot.lane.b32.xlu0 %v433_v43, %s1136_s28 }
  0x9f   : >> { %v437_v46 = vpop.permute.xlu1 %436 }
  0xa0   : >> { %v311_v47 = vpop.permute.xlu0 %310 }
  0xa1   : >> { %454 = vrot.lane.b32.xlu1 %v419_v44, %s1136_s28  ;;  %452 = vrot.lane.b32.xlu0 %v407_v42, %s1136_s28 }
  0xa2   : >> { %967 = vmatprep.subr.bf16.mxu0 %v311_v47 }
  0xa3   : >> { %v313_v48 = vpop.permute.xlu1 %312  ;;  %968 = vmatpush3.bf16.msra.mxu0 %v1324_v26 }
  0xa4   : >> { %v421_v49 = vpop.permute.xlu0 %420  ;;  %969 = vmatprep.subr.bf16.mxu0 %v313_v48 }
  0xa5   : >> { %478 = vrot.lane.b32.xlu1 %v1302_v20, %s1136_s28  ;;  %472 = vrot.lane.b32.xlu0 %v437_v46, %s1136_s28 }
  0xa7   : >> { %v439_v50 = vpop.permute.xlu1 %438  ;;  %970 = vmatpush3.bf16.msra.mxu0 %v1327_v27  ;;  %v937_v27 = vcombine.low %v1175_v0, %v1195_v4 }
  0xa8   : >> { %v317_v51 = vpop.permute.xlu0 %316 }
  0xa9   : >> { %480 = vrot.lane.b32.xlu1 %v1315_v25, %s1136_s28  ;;  %456 = vrot.lane.b32.xlu0 %v421_v49, %s1136_s28 }
  0xaa   : >> { %971 = vmatprep.subr.bf16.mxu0 %v317_v51 }
  0xab   : >> { %v441_v53 = vpop.permute.xlu1 %440  ;;  %972 = vmatpush3.bf16.msra.mxu0 %v1333_v28  ;;  %v945_v28 = vcombine.high %v1215_v8, %v1235_v12 }
  0xac   : >> { %v319_v54 = vpop.permute.xlu0 %318 }
  0xad   : >> { %482 = vrot.lane.b32.xlu0 %v439_v50, %s1136_s28  ;;  %484 = vrot.lane.b32.xlu1 %v441_v53, %s1136_s28 }
  0xae   : >> { %973 = vmatprep.subr.bf16.mxu0 %v319_v54 }
  0xaf   : >> { %v299_v55 = vpop.permute.xlu1 %298  ;;  %974 = vmatpush3.bf16.msra.mxu0 %v1338_v29 }
  0xb0   : >> { %v323_v56 = vpop.permute.xlu0 %322 }
  0xb1   : >> { %975 = vmatprep.subr.bf16.mxu0 %v323_v56  ;;  %515 = vperm.xlu1 %1102, %v1260_v17  }
  0xb2   : >> { %510 = vperm.xlu0 %1101, %v1255_v16  }
  0xb3   : >> { %v371_v57 = vpop.permute.xlu1 %370  ;;  %976 = vmatpush3.bf16.msra.mxu0 %v299_v55 }
  0xb4   : >> { %v325_v58 = vpop.permute.xlu0 %324  ;;  %995 = vmatprep.subr.bf16.mxu1 %v371_v57  ;;  %v941_v57 = vcombine.low %v1185_v2, %v1205_v6 }
  0xb5   : >> { %977 = vmatprep.subr.bf16.mxu0 %v325_v58  ;;  %520 = vperm.xlu1 %1102, %v1275_v18   ;;  %v949_v58 = vcombine.high %v1225_v10, %v1245_v14 }
  0xb6   : >> { %525 = vperm.xlu0 %1101, %v1280_v19  }
  0xb7   : >> { %v335_v59 = vpop.permute.xlu1 %334 }
  0xb8   : >> { %v301_v60 = vpop.permute.xlu0 %300  ;;  %996 = vmatpush3.bf16.msra.mxu1 %v335_v59 }
  0xb9   : >> { %978 = vmatpush3.bf16.msra.mxu0 %v301_v60 }
  0xbb   : >> { %v373_v61 = vpop.permute.xlu1 %372 }
  0xbc   : >> { %v329_v62 = vpop.permute.xlu0 %328  ;;  %997 = vmatprep.subr.bf16.mxu1 %v373_v61  ;;  %v948_v61 = vcombine.low %v1225_v10, %v1245_v14 }
  0xbd   : >> { %979 = vmatprep.subr.bf16.mxu0 %v329_v62  ;;  %v950_v62 = vcombine.low %v1230_v11, %v1250_v15 }
  0xbf   : >> { %v337_v63 = vpop.permute.xlu1 %336 }
  0xc0   : >> { %v305_v20 = vpop.permute.xlu0 %304  ;;  %998 = vmatpush3.bf16.msra.mxu1 %v337_v63 }
  0xc1   : >> { %980 = vmatpush3.bf16.msra.mxu0 %v305_v20 }
  0xc3   : >> { %v377_v21 = vpop.permute.xlu1 %376 }
  0xc4   : >> { %v331_v22 = vpop.permute.xlu0 %330  ;;  %999 = vmatprep.subr.bf16.mxu1 %v377_v21 }
  0xc5   : >> { %1000 = vmatpush3.bf16.msra.mxu1 %v1307_v23  ;;  %981 = vmatprep.subr.bf16.mxu0 %v331_v22 }
  0xc7   : >> { %v379_v25 = vpop.permute.xlu1 %378 }
  0xc8   : >> { %v307_v26 = vpop.permute.xlu0 %306  ;;  %1001 = vmatprep.subr.bf16.mxu1 %v379_v25 }
  0xc9   : >> { %1002 = vmatpush3.bf16.msra.mxu1 %v1311_v24  ;;  %982 = vmatpush3.bf16.msra.mxu0 %v307_v26  ;;  %v942_v24 = vcombine.high %v1185_v2, %v1205_v6 }
  0xcb   : >> { %v443_v29 = vpop.permute.xlu1 %442 }
  0xcc   : >> { %v383_v32 = vpop.permute.xlu0 %382  ;;  %638 = vmatmul.mubr.bf16.vlgmr.msra.gmra.mrb[0].mxu0 %v937_v27 }
  0xcd   : >> { %1003 = vmatprep.subr.bf16.mxu1 %v383_v32  ;;  %645 = vmatprep.mubr.bf16.mxu0 %v945_v28 }
  0xce   : >> { %1004 = vmatpush3.bf16.msra.mxu1 %v1346_v30 }
  0xcf   : >> { %v385_v23 = vpop.permute.xlu1 %384 }
  0xd0   : >> { %v445_v33 = vpop.permute.xlu0 %444  ;;  %1005 = vmatprep.subr.bf16.mxu1 %v385_v23 }
  0xd2   : >> { %1006 = vmatpush3.bf16.msra.mxu1 %v1356_v31  ;;  %v946_v31 = vcombine.low %v1220_v9, %v1240_v13 }
  0xd3   : >> { %v391_v37 = vpop.permute.xlu1 %390 }
  0xd4   : >> { %v389_v35 = vpop.permute.xlu0 %388  ;;  %646 = vmatmul.mubr.bf16.gmra.mrb[4].mxu0 %v944_v34 }
  0xd5   : >> { %1007 = vmatprep.subr.bf16.mxu1 %v389_v35  ;;  %735 = vmatprep.mubr.bf16.mxu0 %v942_v24 }
  0xd6   : >> { %1008 = vmatpush3.bf16.msra.mxu1 %v1389_v36  ;;  %v943_v36 = vcombine.low %v1190_v3, %v1210_v7 }
  0xd7   : >> { %1009 = vmatprep.subr.bf16.mxu1 %v391_v37  ;;  %v475_v30 = vpop.permute.xlu1 %474 }
  0xda   : >> { %1010 = vmatpush3.bf16.msra.mxu1 %v1394_v38 }
  0xdb   : >> { %1059 = vmatprep.subr.bf16.mxu1 %v475_v30 }
  0xdd   : >> { %687 = vmatmul.mubr.bf16.vlgmr.msra.gmra.mrb[0].mxu1 %v939_v39 }
  0xde   : >> { %1060 = vmatpush3.bf16.msra.mxu1 %v475_v30  ;;  %694 = vmatprep.mubr.bf16.mxu1 %v947_v40 }
  0xe5   : >> { %695 = vmatmul.mubr.bf16.gmra.mrb[4].mxu1 %v946_v31 }
  0xe6   : >> { %1071 = vmatprep.mubr.msk.bf16.mxu1 %vm598_vm0, %v943_v36 }
  0xfb   : >> { %v459_v41 = vpop.permute.xlu0 %458 }
  0xfc   : >> { %1023 = vmatprep.subr.bf16.mxu0 %v459_v41 }
  0xfd   : >> { %1024 = vmatpush3.bf16.msra.mxu0 %v443_v29 }
  0xff   : >> { %v461_v38 = vpop.permute.xlu1 %460  ;;  %v477_v42 = vpop.permute.xlu0 %476 }
 0x100   : >> { %1025 = vmatprep.subr.bf16.mxu0 %v461_v38  ;;  %1061 = vmatprep.subr.bf16.mxu1 %v477_v42 }
 0x101   : >> { %1026 = vmatpush3.bf16.msra.mxu0 %v445_v33  ;;  %1062 = vmatpush3.bf16.msra.mxu1 %v477_v42 }
 0x103   : >> { %v447_v43 = vpop.permute.xlu1 %446  ;;  %v463_v44 = vpop.permute.xlu0 %462 }
 0x104   : >> { %1027 = vmatprep.subr.bf16.mxu0 %v463_v44 }
 0x105   : >> { %1028 = vmatpush3.bf16.msra.mxu0 %v447_v43 }
 0x107   : >> { %v465_v45 = vpop.permute.xlu1 %464  ;;  %v449_v46 = vpop.permute.xlu0 %448 }
 0x108   : >> { %1029 = vmatprep.subr.bf16.mxu0 %v465_v45 }
 0x109   : >> { %1030 = vmatpush3.bf16.msra.mxu0 %v449_v46 }
 0x10b   : >> { %v451_v47 = vpop.permute.xlu1 %450  ;;  %v467_v48 = vpop.permute.xlu0 %466 }
 0x10c   : >> { %1031 = vmatprep.subr.bf16.mxu0 %v467_v48 }
 0x10d   : >> { %1032 = vmatpush3.bf16.msra.mxu0 %v451_v47 }
 0x10f   : >> { %v471_v49 = vpop.permute.xlu1 %470  ;;  %v469_v50 = vpop.permute.xlu0 %468 }
 0x110   : >> { %1033 = vmatprep.subr.bf16.mxu0 %v469_v50 }
 0x113   : >> { %v455_v51 = vpop.permute.xlu1 %454  ;;  %v453_v52 = vpop.permute.xlu0 %452 }
 0x114   : >> { %1034 = vmatpush3.bf16.msra.mxu0 %v453_v52 }
 0x115   : >> { %1035 = vmatprep.subr.bf16.mxu0 %v471_v49 }
 0x117   : >> { %v479_v53 = vpop.permute.xlu1 %478  ;;  %v473_v54 = vpop.permute.xlu0 %472 }
 0x118   : >> { %1036 = vmatpush3.bf16.msra.mxu0 %v455_v51  ;;  %1063 = vmatprep.subr.bf16.mxu1 %v479_v53 }
 0x119   : >> { %1037 = vmatprep.subr.bf16.mxu0 %v473_v54  ;;  %1064 = vmatpush3.bf16.msra.mxu1 %v479_v53 }
 0x11b   : >> { %v481_v55 = vpop.permute.xlu1 %480  ;;  %v457_v56 = vpop.permute.xlu0 %456 }
 0x11c   : >> { %1038 = vmatpush3.bf16.msra.mxu0 %v457_v56  ;;  %1065 = vmatprep.subr.bf16.mxu1 %v481_v55 }
 0x11d   : >> { %1066 = vmatpush3.bf16.msra.mxu1 %v481_v55 }
 0x11f   : >> { %736 = vmatmul.mubr.bf16.vlgmr.msra.gmra.mrb[8].mxu0 %v941_v57  ;;  %v483_v59 = vpop.permute.xlu0 %482  ;;  %v485_v60 = vpop.permute.xlu1 %484 }
 0x120   : >> { %1067 = vmatprep.subr.bf16.mxu1 %v483_v59  ;;  %743 = vmatprep.mubr.bf16.mxu0 %v949_v58 }
 0x121   : >> { %1068 = vmatpush3.bf16.msra.mxu1 %v483_v59 }
 0x122   : >> { %1069 = vmatprep.subr.bf16.mxu1 %v485_v60 }
 0x125   : >> { %1070 = vmatpush3.bf16.msra.mxu1 %v485_v60 }
 0x127   : >> { %744 = vmatmul.mubr.bf16.gmra.mrb[12].mxu0 %v948_v61 }
 0x128   : >> { %1072 = vmatmul.mubr.msk.bf16.vlgmr.msra.gmra.mrb[8].mxu1 %vm598_vm0, %v950_v62 }
 0x130   : >> { %v516_v24 = vpop.permute.xlu1 %515 }
 0x131   : >> { %v511_v34 = vpop.permute.xlu0 %510 }
 0x134   : >> { %v521_v42 = vpop.permute.xlu1 %520 }
 0x135   : >> { %v526_v44 = vpop.permute.xlu0 %525 }
 0x19f   : >> { %v983_v63 = vpop.f32.mrb[0].mxu0 }
 0x1a0   : >> { %v984_v20 = vpop.f32.mrb[1].mxu0 }
 0x1a1   : >> { %v985_v21 = vadd.f32 %v984_v20, %v983_v63  ;;  %v986_v22 = vpop.f32.mrb[2].mxu0 }
 0x1a2   : >> { %v987_v25 = vpop.f32.mrb[3].mxu0 }
 0x1a3   : >> { %v988_v26 = vadd.f32 %v987_v25, %v986_v22  ;;  %v640_v37 = vadd.f32 %v985_v21, %v511_v34 }
 0x1a5   : >> { %v643_v31 = vadd.f32 %v988_v26, %v516_v24 }
 0x1a7   : >> { %v989_v27 = vpop.f32.mrb[4].mxu0 }
 0x1a8   : >> { %v990_v28 = vpop.f32.mrb[5].mxu0 }
 0x1a9   : >> { %v991_v29 = vadd.f32 %v990_v28, %v989_v27  ;;  %v992_v32 = vpop.f32.mrb[6].mxu0 }
 0x1aa   : >> { %v993_v23 = vpop.f32.mrb[7].mxu0 }
 0x1ab   : >> { %v994_v33 = vadd.f32 %v993_v23, %v992_v32  ;;  %v648_v46 = vadd.f32 %v991_v29, %v521_v42 }
 0x1ad   : >> { %v651_v50 = vadd.f32 %v994_v33, %v526_v44 }
 0x1b0   : >> { %v1011_v35 = vpop.f32.mrb[0].mxu1 }
 0x1b1   : >> { %v1012_v30 = vpop.f32.mrb[1].mxu1 }
 0x1b2   : >> { %v1013_v39 = vadd.f32 %v1012_v30, %v1011_v35  ;;  %v1014_v40 = vpop.f32.mrb[2].mxu1 }
 0x1b3   : >> { %v1015_v36 = vpop.f32.mrb[3].mxu1 }
 0x1b4   : >> { %v1016_v41 = vadd.f32 %v1015_v36, %v1014_v40  ;;  %v689_v38 = vadd.f32 %v1013_v39, %v640_v37 }
 0x1b6   : >> { %v692_v43 = vadd.f32 %v1016_v41, %v643_v31 }
 0x1b8   : >> { %v1017_v45 = vpop.f32.mrb[4].mxu1 }
 0x1b9   : >> { %v1018_v47 = vpop.f32.mrb[5].mxu1 }
 0x1ba   : >> { %v1019_v48 = vadd.f32 %v1018_v47, %v1017_v45  ;;  %v1020_v49 = vpop.f32.mrb[6].mxu1 }
 0x1bb   : >> { %v1021_v51 = vpop.f32.mrb[7].mxu1 }
 0x1bc   : >> { %v697_v52 = vadd.f32 %v1019_v48, %v648_v46  ;;  %v1022_v53 = vadd.f32 %v1021_v51, %v1020_v49 }
 0x1be   : >> { %v700_v54 = vadd.f32 %v1022_v53, %v651_v50 }
 0x1f2   : >> { %v1039_v55 = vpop.f32.mrb[8].mxu0 }
 0x1f3   : >> { %v1040_v56 = vpop.f32.mrb[9].mxu0 }
 0x1f4   : >> { %v1041_v57 = vadd.f32 %v1040_v56, %v1039_v55  ;;  %v1042_v58 = vpop.f32.mrb[10].mxu0 }
 0x1f5   : >> { %v1043_v59 = vpop.f32.mrb[11].mxu0 }
 0x1f6   : >> { %v1044_v60 = vadd.f32 %v1043_v59, %v1042_v58  ;;  %v738_v61 = vadd.f32 %v1041_v57, %v689_v38 }
 0x1f8   : >> { %v741_v62 = vadd.f32 %v1044_v60, %v692_v43 }
 0x1fa   : >> { %v1045_v63 = vpop.f32.mrb[12].mxu0 }
 0x1fb   : >> { %v1046_v20 = vpop.f32.mrb[13].mxu0  ;;  %v1073_v21 = vpop.f32.mrb[8].mxu1 }
 0x1fc   : >> { %v1047_v22 = vadd.f32 %v1046_v20, %v1045_v63  ;;  %v1048_v25 = vpop.f32.mrb[14].mxu0  ;;  %v786_v26 = vpop.f32.mrb[9].mxu1 }
 0x1fd   : >> { %v787_v27 = vadd.f32 %v786_v26, %v738_v61  ;;  %v1049_v28 = vpop.f32.mrb[15].mxu0  ;;  %v1074_v29 = vpop.f32.mrb[10].mxu1 }
 0x1fe   : >> { %v746_v32 = vadd.f32 %v1047_v22, %v697_v52  ;;  %v1050_v23 = vadd.f32 %v1049_v28, %v1048_v25  ;;  %v789_v33 = vpop.f32.mrb[11].mxu1 }
 0x1ff   : >> { %vm801_vm1 = vcmp.ge.f32.partialorder %v787_v27, 0.0  ;;  %v805_v34 = vmul.f32 0.1, %v787_v27  ;;  %v790_v24 = vadd.f32 %v789_v33, %v741_v62 }
 0x200   : >> { %v795_v35 = vadd.f32 %v1073_v21, %v746_v32  ;;  %v749_v37 = vadd.f32 %v1050_v23, %v700_v54 }
 0x201   : >> { %v809_v30 = vsel %vm801_vm1, %v787_v27, %v805_v34  ;;  %vm802_vm3 = vcmp.ge.f32.partialorder %v790_v24, 0.0  ;;  %v806_v39 = vmul.f32 0.1, %v790_v24 }
 0x202   : >> { %vm803_vm4 = vcmp.ge.f32.partialorder %v795_v35, 0.0  ;;  %v807_v40 = vmul.f32 0.1, %v795_v35  ;;  %v962_v31 = vpack.c.bf16 %v809_v30, %v809_v30  ;;  %v798_v36 = vadd.f32 %v1074_v29, %v749_v37 }
 0x203   : >> { %v810_v41 = vsel %vm802_vm3, %v790_v24, %v806_v39  ;;  %243 = sbr.rel (!%p241_p4) target bundleno = 18 (0x12), region = 79 }
 0x204   : >> { %v811_v38 = vsel %vm803_vm4, %v795_v35, %v807_v40  ;;  %832 = vst.msk [vmem:[%s830_s30] sm:$0xf] %vm831_vm2, %v962_v31  ;;  %vm804_vm5 = vcmp.ge.f32.partialorder %v798_v36, 0.0  ;;  %v808_v42 = vmul.f32 0.1, %v798_v36  ;;  %v963_v43 = vpack.c.bf16 %v810_v41, %v810_v41 }
 0x205   : >> { %v964_v44 = vpack.c.bf16 %v811_v38, %v811_v38 }
 0x206   : >> { %v812_v45 = vsel %vm804_vm5, %v798_v36, %v808_v42  ;;  %833 = vst.msk [vmem:[%s830_s30 + $0x4] sm:$0xf] %vm831_vm2, %v963_v43 }
 0x207   : >> { %834 = vst.msk [vmem:[%s830_s30 + $0x8] sm:$0xf] %vm831_vm2, %v964_v44  ;;  %v965_v46 = vpack.c.bf16 %v812_v45, %v812_v45 }
 0x209   : >> { %835 = vst.msk [vmem:[%s830_s30 + $0xc] sm:$0xf] %vm831_vm2, %v965_v46 }
 0x20a PF: > { %s14_s15 = sadd.s32 1, %s1125_s15  }
 0x20b   : > { %p11_p5 = scmp.ge.s32.totalorder %s14_s15, 4  }
 0x20d   :  { %13 = sbr.rel (!%p11_p5) target bundleno = 1 (0x1), region = 90 }

// kernel: _lambda_.11
= control target key start
LH: loop header
LB: loop body
LE: loop exit
PB: predicated region body
PF: predicated region fallthrough
CT: control target
= control target key end

     0   :  { %s1164_s15 = smov 0   ;;  %s1468_s0 = inlined_call_operand.vmem [shape: bf16[32,864], index: 0, kind: input, shape index: {}]   ;;  %s1469_s1 = inlined_call_operand.vmem [shape: f32[32,1], index: 1, kind: input, shape index: {}]   ;;  %s1470_s2 = inlined_call_operand.vmem [shape: bf16[2,67,32,6], index: 2, kind: input, shape index: {}]   ;;  %s1471_s3 = inlined_call_operand.vmem [shape: bf16[2,67,32,6], index: 3, kind: input, shape index: {}]   ;;  %s1472_s4 = inlined_call_operand.vmem [shape: bf16[2,65,32,2], index: 4, kind: output, shape index: {}]  }
   0x1 LB: > { %s914_s16 = sadd.s32 4294967295, %s1125_s15   ;;  %p918_p0 = scmp.ge.s32.totalorder %s1125_s15, 1  ;;  %s1125_s15 = sphi %s1164_s15, %s14_s15  }
   0x2   : > { %p172_p1 = scmp.lt.s32.totalorder %s1125_s15, 3 }
   0x4   : > { %p173_p2 = pnand %p918_p0, %p172_p1 }
   0x5   : > { %p203_p3 = scmp.lt.s32.totalorder (!%p173_p2), %s914_s16, 1  ;;  %v1175_v0 = vld [vmem:[%s1468_s0] sm:$0xff] (!%p173_p2)  ;;  %v1180_v1 = vld [vmem:[%s1468_s0 + $0x8] sm:$0xff] (!%p173_p2)  ;;  %v1185_v2 = vld [vmem:[%s1468_s0 + $0x10] sm:$0xff] (!%p173_p2)  ;;  %s1287_s20 = smov (!%p173_p2), 0  }
   0x6   : > { %176 = sbr.rel (%p173_p2) target bundleno = 522 (0x20a), region = 36  ;;  %v1190_v3 = vld [vmem:[%s1468_s0 + $0x18] sm:$0xf] (!%p173_p2)  ;;  %v1195_v4 = vld [vmem:[%s1468_s0 + $0x1c] sm:$0xff] (!%p173_p2)  ;;  %v1200_v5 = vld [vmem:[%s1468_s0 + $0x24] sm:$0xff] (!%p173_p2) }
   0x7   : > { %v1205_v6 = vld [vmem:[%s1468_s0 + $0x2c] sm:$0xff] (!%p173_p2)  ;;  %v1210_v7 = vld [vmem:[%s1468_s0 + $0x34] sm:$0xf] (!%p173_p2)  ;;  %v1215_v8 = vld [vmem:[%s1468_s0 + $0x38] sm:$0xff] (!%p173_p2) }
   0x8   : > { %v1220_v9 = vld [vmem:[%s1468_s0 + $0x40] sm:$0xff] (!%p173_p2)  ;;  %v1225_v10 = vld [vmem:[%s1468_s0 + $0x48] sm:$0xff] (!%p173_p2)  ;;  %v1230_v11 = vld [vmem:[%s1468_s0 + $0x50] sm:$0xf] (!%p173_p2) }
   0x9   : > { %v1235_v12 = vld [vmem:[%s1468_s0 + $0x54] sm:$0xff] (!%p173_p2)  ;;  %v1240_v13 = vld [vmem:[%s1468_s0 + $0x5c] sm:$0xff] (!%p173_p2)  ;;  %v1245_v14 = vld [vmem:[%s1468_s0 + $0x64] sm:$0xff] (!%p173_p2) }
   0xa   : > { %v1250_v15 = vld [vmem:[%s1468_s0 + $0x6c] sm:$0xf] (!%p173_p2)  ;;  %v1255_v16 = vld [vmem:[%s1469_s1] sm:$0xff] (!%p173_p2)  ;;  %v1275_v18 = vld [vmem:[%s1469_s1 + $0x10] sm:$0xff] (!%p173_p2) }
   0xb   : > { %v1260_v17 = vld [vmem:[%s1469_s1 + $0x8] sm:$0xff] (!%p173_p2)  ;;  %v1280_v19 = vld [vmem:[%s1469_s1 + $0x18] sm:$0xff] (!%p173_p2) }
   0xd   : > { %s1474_s16 = smov (!%p203_p3, %s914_s16), 1 }
   0xe   : > { %s1075_s17 = smul.u32 1072, %s1474_s16 }
   0xf   : > { %s1076_s24 = smul.u32 1040, %s1474_s16 }
  0x10   : > { %s1265_s7 = scalar_lea.vmem %s1470_s2, %s1075_s17  ;;  %s1270_s9 = scalar_lea.vmem %s1471_s3, %s1075_s17 }
  0x11   : > { %s1285_s19 = scalar_lea.vmem %s1472_s4, %s1076_s24 }
  0x12 LB: >> { %s1293_s17 = sshll.u32 %s1129_s20, 4  ;;  %s1131_s23 = smov 2   ;;  %v938_v32 = vcombine.high %v1175_v0, %v1195_v4  ;;  %v940_v33 = vcombine.high %v1180_v1, %v1200_v5  ;;  %v1138_v52 = vmov 0   ;;  %vm598_vm0 = vcmask 785408   ;;  %s1129_s20 = sphi %s1287_s20, %s244_s20  }
  0x13   : >> { %s1297_s21 = scalar_lea.vmem %s1270_s9, %s1293_s17  ;;  %s247_s22 = scalar_lea.vmem %s1265_s7, %s1293_s17  ;;  %1102 = vset.pattern.permute.xlu1 %v1138_v52  ;;  %1101 = vset.pattern.permute.xlu0 %v1138_v52  ;;  %vm831_vm2 = vcmask 11264  }
  0x14   : >> { %v1302_v20 = vld [vmem:[%s1297_s21 + $0x20] sm:$0xff]   ;;  %v1305_v22 = vld [vmem:[%s247_s22 + $0x28] sm:$0xff]   ;;  %v1307_v23 = vld [vmem:[%s247_s22 + $0x10] sm:$0xff]   ;;  %s1132_s24 = smov 127   ;;  %s1133_s25 = smov 3   ;;  %637 = vmatprep.mubr.bf16.mxu0 %v938_v32  ;;  %686 = vmatprep.mubr.bf16.mxu1 %v940_v33 }
  0x15   : >> { %v1104_v21 = vld [vmem:[%s247_s22 + $0x20] sm:$0xff]   ;;  %426 = vrot.lane.b32.xlu1 %v1302_v20, %s1131_s23  ;;  %v1311_v24 = vld [vmem:[%s247_s22 + $0x18] sm:$0xff]   ;;  %v1315_v25 = vld [vmem:[%s1297_s21 + $0x28] sm:$0xff]   ;;  %s1134_s26 = smov 1   ;;  %s1135_s27 = smov 126  }
  0x16   : >> { %422 = vrot.lane.b32.xlu0 %v1104_v21, %s1131_s23  ;;  %v1324_v26 = vld [vmem:[%s247_s22] sm:$0xff]   ;;  %v1327_v27 = vld [vmem:[%s247_s22 + $0x8] sm:$0xff]   ;;  %v1346_v30 = vld [vmem:[%s1297_s21 + $0x10] sm:$0xff]   ;;  %s1136_s28 = smov 125   ;;  %s1137_s29 = smov 124  }
  0x17   : >> { %v1333_v28 = vld [vmem:[%s1297_s21] sm:$0xff]   ;;  %v1338_v29 = vld [vmem:[%s1297_s21 + $0x8] sm:$0xff]   ;;  %v1356_v31 = vld [vmem:[%s1297_s21 + $0x18] sm:$0xff]   ;;  %s830_s30 = scalar_lea.vmem %s1285_s19, %s1293_s17  ;;  %s244_s20 = sadd.s32 1, %s1129_s20  }
  0x18   : >> { %p241_p4 = scmp.ge.s32.totalorder %s244_s20, 65  }
  0x19   : >> { %364 = vrot.lane.b32.xlu1 %v1307_v23, %s1132_s24 }
  0x1a   : >> { %424 = vrot.lane.b32.xlu0 %v1305_v22, %s1131_s23 }
  0x1d   : >> { %366 = vrot.lane.b32.xlu1 %v1311_v24, %s1132_s24 }
  0x1e   : >> { %428 = vrot.lane.b32.xlu0 %v1315_v25, %s1131_s23 }
  0x21   : >> { %404 = vrot.lane.b32.xlu1 %v1104_v21, %s1133_s25 }
  0x22   : >> { %430 = vrot.lane.b32.xlu0 %v1104_v21, %s1134_s26 }
  0x25   : >> { %406 = vrot.lane.b32.xlu1 %v1305_v22, %s1133_s25 }
  0x26   : >> { %432 = vrot.lane.b32.xlu0 %v1305_v22, %s1134_s26 }
  0x29   : >> { %418 = vrot.lane.b32.xlu1 %v1302_v20, %s1133_s25 }
  0x2a   : >> { %434 = vrot.lane.b32.xlu0 %v1302_v20, %s1134_s26 }
  0x2d   : >> { %436 = vrot.lane.b32.xlu1 %v1315_v25, %s1134_s26 }
  0x2e   : >> { %310 = vrot.lane.b32.xlu0 %v1324_v26, %s1135_s27 }
  0x31   : >> { %312 = vrot.lane.b32.xlu1 %v1327_v27, %s1135_s27 }
  0x32   : >> { %420 = vrot.lane.b32.xlu0 %v1315_v25, %s1133_s25 }
  0x35   : >> { %438 = vrot.lane.b32.xlu1 %v1104_v21, %s1132_s24 }
  0x36   : >> { %316 = vrot.lane.b32.xlu0 %v1333_v28, %s1135_s27 }
  0x39   : >> { %440 = vrot.lane.b32.xlu1 %v1305_v22, %s1132_s24 }
  0x3a   : >> { %318 = vrot.lane.b32.xlu0 %v1338_v29, %s1135_s27 }
  0x3d   : >> { %298 = vrot.lane.b32.xlu1 %v1324_v26, %s1132_s24 }
  0x3e   : >> { %322 = vrot.lane.b32.xlu0 %v1324_v26, %s1136_s28 }
  0x41   : >> { %370 = vrot.lane.b32.xlu1 %v1346_v30, %s1132_s24 }
  0x42   : >> { %324 = vrot.lane.b32.xlu0 %v1327_v27, %s1136_s28 }
  0x45   : >> { %334 = vrot.lane.b32.xlu1 %v1324_v26, %s1137_s29 }
  0x46   : >> { %300 = vrot.lane.b32.xlu0 %v1327_v27, %s1132_s24 }
  0x49   : >> { %372 = vrot.lane.b32.xlu1 %v1356_v31, %s1132_s24 }
  0x4a   : >> { %328 = vrot.lane.b32.xlu0 %v1333_v28, %s1136_s28 }
  0x4d   : >> { %336 = vrot.lane.b32.xlu1 %v1327_v27, %s1137_s29 }
  0x4e   : >> { %304 = vrot.lane.b32.xlu0 %v1333_v28, %s1132_s24 }
  0x51   : >> { %376 = vrot.lane.b32.xlu1 %v1307_v23, %s1135_s27 }
  0x52   : >> { %330 = vrot.lane.b32.xlu0 %v1338_v29, %s1136_s28 }
  0x55   : >> { %378 = vrot.lane.b32.xlu1 %v1311_v24, %s1135_s27 }
  0x56   : >> { %306 = vrot.lane.b32.xlu0 %v1338_v29, %s1132_s24 }
  0x59   : >> { %442 = vrot.lane.b32.xlu1 %v1346_v30, %s1136_s28 }
  0x5a   : >> { %382 = vrot.lane.b32.xlu0 %v1346_v30, %s1135_s27 }
  0x5d   : >> { %384 = vrot.lane.b32.xlu1 %v1356_v31, %s1135_s27 }
  0x5e   : >> { %444 = vrot.lane.b32.xlu0 %v1356_v31, %s1136_s28 }
  0x61   : >> { %390 = vrot.lane.b32.xlu1 %v1311_v24, %s1136_s28 }
  0x62   : >> { %388 = vrot.lane.b32.xlu0 %v1307_v23, %s1136_s28 }
  0x65   : >> { %474 = vrot.lane.b32.xlu1 %v1104_v21, %s1136_s28 }
  0x87   : >> { %v427_v34 = vpop.permute.xlu1 %426 }
  0x88   : >> { %v423_v35 = vpop.permute.xlu0 %422 }
  0x89   : >> { %458 = vrot.lane.b32.xlu0 %v423_v35, %s1136_s28 }
  0x8b   : >> { %v1389_v36 = vpop.permute.xlu1 %364 }
  0x8c   : >> { %v425_v37 = vpop.permute.xlu0 %424 }
  0x8d   : >> { %460 = vrot.lane.b32.xlu1 %v425_v37, %s1136_s28  ;;  %476 = vrot.lane.b32.xlu0 %v1305_v22, %s1136_s28 }
  0x8f   : >> { %v1394_v38 = vpop.permute.xlu1 %366 }
  0x90   : >> { %v429_v39 = vpop.permute.xlu0 %428 }
  0x91   : >> { %446 = vrot.lane.b32.xlu1 %v1389_v36, %s1136_s28  ;;  %462 = vrot.lane.b32.xlu0 %v427_v34, %s1136_s28  ;;  %v944_v34 = vcombine.low %v1215_v8, %v1235_v12 }
  0x93   : >> { %v405_v40 = vpop.permute.xlu1 %404 }
  0x94   : >> { %v431_v41 = vpop.permute.xlu0 %430 }
  0x95   : >> { %464 = vrot.lane.b32.xlu1 %v429_v39, %s1136_s28  ;;  %448 = vrot.lane.b32.xlu0 %v1394_v38, %s1136_s28  ;;  %v939_v39 = vcombine.low %v1180_v1, %v1200_v5 }
  0x97   : >> { %v407_v42 = vpop.permute.xlu1 %406 }
  0x98   : >> { %v433_v43 = vpop.permute.xlu0 %432 }
  0x99   : >> { %450 = vrot.lane.b32.xlu1 %v405_v40, %s1136_s28  ;;  %466 = vrot.lane.b32.xlu0 %v431_v41, %s1136_s28  ;;  %v947_v40 = vcombine.high %v1220_v9, %v1240_v13 }
  0x9b   : >> { %v419_v44 = vpop.permute.xlu1 %418 }
  0x9c   : >> { %v435_v45 = vpop.permute.xlu0 %434 }
  0x9d   : >> { %470 = vrot.lane.b32.xlu1 %v435_v45, %s1136_s28  ;;  %468 = vrot.lane.b32.xlu0 %v433_v43, %s1136_s28 }
  0x9f   : >> { %v437_v46 = vpop.permute.xlu1 %436 }
  0xa0   : >> { %v311_v47 = vpop.permute.xlu0 %310 }
  0xa1   : >> { %454 = vrot.lane.b32.xlu1 %v419_v44, %s1136_s28  ;;  %452 = vrot.lane.b32.xlu0 %v407_v42, %s1136_s28 }
  0xa2   : >> { %967 = vmatprep.subr.bf16.mxu0 %v311_v47 }
  0xa3   : >> { %v313_v48 = vpop.permute.xlu1 %312  ;;  %968 = vmatpush3.bf16.msra.mxu0 %v1324_v26 }
  0xa4   : >> { %v421_v49 = vpop.permute.xlu0 %420  ;;  %969 = vmatprep.subr.bf16.mxu0 %v313_v48 }
  0xa5   : >> { %478 = vrot.lane.b32.xlu1 %v1302_v20, %s1136_s28  ;;  %472 = vrot.lane.b32.xlu0 %v437_v46, %s1136_s28 }
  0xa7   : >> { %v439_v50 = vpop.permute.xlu1 %438  ;;  %970 = vmatpush3.bf16.msra.mxu0 %v1327_v27  ;;  %v937_v27 = vcombine.low %v1175_v0, %v1195_v4 }
  0xa8   : >> { %v317_v51 = vpop.permute.xlu0 %316 }
  0xa9   : >> { %480 = vrot.lane.b32.xlu1 %v1315_v25, %s1136_s28  ;;  %456 = vrot.lane.b32.xlu0 %v421_v49, %s1136_s28 }
  0xaa   : >> { %971 = vmatprep.subr.bf16.mxu0 %v317_v51 }
  0xab   : >> { %v441_v53 = vpop.permute.xlu1 %440  ;;  %972 = vmatpush3.bf16.msra.mxu0 %v1333_v28  ;;  %v945_v28 = vcombine.high %v1215_v8, %v1235_v12 }
  0xac   : >> { %v319_v54 = vpop.permute.xlu0 %318 }
  0xad   : >> { %482 = vrot.lane.b32.xlu0 %v439_v50, %s1136_s28  ;;  %484 = vrot.lane.b32.xlu1 %v441_v53, %s1136_s28 }
  0xae   : >> { %973 = vmatprep.subr.bf16.mxu0 %v319_v54 }
  0xaf   : >> { %v299_v55 = vpop.permute.xlu1 %298  ;;  %974 = vmatpush3.bf16.msra.mxu0 %v1338_v29 }
  0xb0   : >> { %v323_v56 = vpop.permute.xlu0 %322 }
  0xb1   : >> { %975 = vmatprep.subr.bf16.mxu0 %v323_v56  ;;  %515 = vperm.xlu1 %1102, %v1260_v17  }
  0xb2   : >> { %510 = vperm.xlu0 %1101, %v1255_v16  }
  0xb3   : >> { %v371_v57 = vpop.permute.xlu1 %370  ;;  %976 = vmatpush3.bf16.msra.mxu0 %v299_v55 }
  0xb4   : >> { %v325_v58 = vpop.permute.xlu0 %324  ;;  %995 = vmatprep.subr.bf16.mxu1 %v371_v57  ;;  %v941_v57 = vcombine.low %v1185_v2, %v1205_v6 }
  0xb5   : >> { %977 = vmatprep.subr.bf16.mxu0 %v325_v58  ;;  %520 = vperm.xlu1 %1102, %v1275_v18   ;;  %v949_v58 = vcombine.high %v1225_v10, %v1245_v14 }
  0xb6   : >> { %525 = vperm.xlu0 %1101, %v1280_v19  }
  0xb7   : >> { %v335_v59 = vpop.permute.xlu1 %334 }
  0xb8   : >> { %v301_v60 = vpop.permute.xlu0 %300  ;;  %996 = vmatpush3.bf16.msra.mxu1 %v335_v59 }
  0xb9   : >> { %978 = vmatpush3.bf16.msra.mxu0 %v301_v60 }
  0xbb   : >> { %v373_v61 = vpop.permute.xlu1 %372 }
  0xbc   : >> { %v329_v62 = vpop.permute.xlu0 %328  ;;  %997 = vmatprep.subr.bf16.mxu1 %v373_v61  ;;  %v948_v61 = vcombine.low %v1225_v10, %v1245_v14 }
  0xbd   : >> { %979 = vmatprep.subr.bf16.mxu0 %v329_v62  ;;  %v950_v62 = vcombine.low %v1230_v11, %v1250_v15 }
  0xbf   : >> { %v337_v63 = vpop.permute.xlu1 %336 }
  0xc0   : >> { %v305_v20 = vpop.permute.xlu0 %304  ;;  %998 = vmatpush3.bf16.msra.mxu1 %v337_v63 }
  0xc1   : >> { %980 = vmatpush3.bf16.msra.mxu0 %v305_v20 }
  0xc3   : >> { %v377_v21 = vpop.permute.xlu1 %376 }
  0xc4   : >> { %v331_v22 = vpop.permute.xlu0 %330  ;;  %999 = vmatprep.subr.bf16.mxu1 %v377_v21 }
  0xc5   : >> { %1000 = vmatpush3.bf16.msra.mxu1 %v1307_v23  ;;  %981 = vmatprep.subr.bf16.mxu0 %v331_v22 }
  0xc7   : >> { %v379_v25 = vpop.permute.xlu1 %378 }
  0xc8   : >> { %v307_v26 = vpop.permute.xlu0 %306  ;;  %1001 = vmatprep.subr.bf16.mxu1 %v379_v25 }
  0xc9   : >> { %1002 = vmatpush3.bf16.msra.mxu1 %v1311_v24  ;;  %982 = vmatpush3.bf16.msra.mxu0 %v307_v26  ;;  %v942_v24 = vcombine.high %v1185_v2, %v1205_v6 }
  0xcb   : >> { %v443_v29 = vpop.permute.xlu1 %442 }
  0xcc   : >> { %v383_v32 = vpop.permute.xlu0 %382  ;;  %638 = vmatmul.mubr.bf16.vlgmr.msra.gmra.mrb[0].mxu0 %v937_v27 }
  0xcd   : >> { %1003 = vmatprep.subr.bf16.mxu1 %v383_v32  ;;  %645 = vmatprep.mubr.bf16.mxu0 %v945_v28 }
  0xce   : >> { %1004 = vmatpush3.bf16.msra.mxu1 %v1346_v30 }
  0xcf   : >> { %v385_v23 = vpop.permute.xlu1 %384 }
  0xd0   : >> { %v445_v33 = vpop.permute.xlu0 %444  ;;  %1005 = vmatprep.subr.bf16.mxu1 %v385_v23 }
  0xd2   : >> { %1006 = vmatpush3.bf16.msra.mxu1 %v1356_v31  ;;  %v946_v31 = vcombine.low %v1220_v9, %v1240_v13 }
  0xd3   : >> { %v391_v37 = vpop.permute.xlu1 %390 }
  0xd4   : >> { %v389_v35 = vpop.permute.xlu0 %388  ;;  %646 = vmatmul.mubr.bf16.gmra.mrb[4].mxu0 %v944_v34 }
  0xd5   : >> { %1007 = vmatprep.subr.bf16.mxu1 %v389_v35  ;;  %735 = vmatprep.mubr.bf16.mxu0 %v942_v24 }
  0xd6   : >> { %1008 = vmatpush3.bf16.msra.mxu1 %v1389_v36  ;;  %v943_v36 = vcombine.low %v1190_v3, %v1210_v7 }
  0xd7   : >> { %1009 = vmatprep.subr.bf16.mxu1 %v391_v37  ;;  %v475_v30 = vpop.permute.xlu1 %474 }
  0xda   : >> { %1010 = vmatpush3.bf16.msra.mxu1 %v1394_v38 }
  0xdb   : >> { %1059 = vmatprep.subr.bf16.mxu1 %v475_v30 }
  0xdd   : >> { %687 = vmatmul.mubr.bf16.vlgmr.msra.gmra.mrb[0].mxu1 %v939_v39 }
  0xde   : >> { %1060 = vmatpush3.bf16.msra.mxu1 %v475_v30  ;;  %694 = vmatprep.mubr.bf16.mxu1 %v947_v40 }
  0xe5   : >> { %695 = vmatmul.mubr.bf16.gmra.mrb[4].mxu1 %v946_v31 }
  0xe6   : >> { %1071 = vmatprep.mubr.msk.bf16.mxu1 %vm598_vm0, %v943_v36 }
  0xfb   : >> { %v459_v41 = vpop.permute.xlu0 %458 }
  0xfc   : >> { %1023 = vmatprep.subr.bf16.mxu0 %v459_v41 }
  0xfd   : >> { %1024 = vmatpush3.bf16.msra.mxu0 %v443_v29 }
  0xff   : >> { %v461_v38 = vpop.permute.xlu1 %460  ;;  %v477_v42 = vpop.permute.xlu0 %476 }
 0x100   : >> { %1025 = vmatprep.subr.bf16.mxu0 %v461_v38  ;;  %1061 = vmatprep.subr.bf16.mxu1 %v477_v42 }
 0x101   : >> { %1026 = vmatpush3.bf16.msra.mxu0 %v445_v33  ;;  %1062 = vmatpush3.bf16.msra.mxu1 %v477_v42 }
 0x103   : >> { %v447_v43 = vpop.permute.xlu1 %446  ;;  %v463_v44 = vpop.permute.xlu0 %462 }
 0x104   : >> { %1027 = vmatprep.subr.bf16.mxu0 %v463_v44 }
 0x105   : >> { %1028 = vmatpush3.bf16.msra.mxu0 %v447_v43 }
 0x107   : >> { %v465_v45 = vpop.permute.xlu1 %464  ;;  %v449_v46 = vpop.permute.xlu0 %448 }
 0x108   : >> { %1029 = vmatprep.subr.bf16.mxu0 %v465_v45 }
 0x109   : >> { %1030 = vmatpush3.bf16.msra.mxu0 %v449_v46 }
 0x10b   : >> { %v451_v47 = vpop.permute.xlu1 %450  ;;  %v467_v48 = vpop.permute.xlu0 %466 }
 0x10c   : >> { %1031 = vmatprep.subr.bf16.mxu0 %v467_v48 }
 0x10d   : >> { %1032 = vmatpush3.bf16.msra.mxu0 %v451_v47 }
 0x10f   : >> { %v471_v49 = vpop.permute.xlu1 %470  ;;  %v469_v50 = vpop.permute.xlu0 %468 }
 0x110   : >> { %1033 = vmatprep.subr.bf16.mxu0 %v469_v50 }
 0x113   : >> { %v455_v51 = vpop.permute.xlu1 %454  ;;  %v453_v52 = vpop.permute.xlu0 %452 }
 0x114   : >> { %1034 = vmatpush3.bf16.msra.mxu0 %v453_v52 }
 0x115   : >> { %1035 = vmatprep.subr.bf16.mxu0 %v471_v49 }
 0x117   : >> { %v479_v53 = vpop.permute.xlu1 %478  ;;  %v473_v54 = vpop.permute.xlu0 %472 }
 0x118   : >> { %1036 = vmatpush3.bf16.msra.mxu0 %v455_v51  ;;  %1063 = vmatprep.subr.bf16.mxu1 %v479_v53 }
 0x119   : >> { %1037 = vmatprep.subr.bf16.mxu0 %v473_v54  ;;  %1064 = vmatpush3.bf16.msra.mxu1 %v479_v53 }
 0x11b   : >> { %v481_v55 = vpop.permute.xlu1 %480  ;;  %v457_v56 = vpop.permute.xlu0 %456 }
 0x11c   : >> { %1038 = vmatpush3.bf16.msra.mxu0 %v457_v56  ;;  %1065 = vmatprep.subr.bf16.mxu1 %v481_v55 }
 0x11d   : >> { %1066 = vmatpush3.bf16.msra.mxu1 %v481_v55 }
 0x11f   : >> { %736 = vmatmul.mubr.bf16.vlgmr.msra.gmra.mrb[8].mxu0 %v941_v57  ;;  %v483_v59 = vpop.permute.xlu0 %482  ;;  %v485_v60 = vpop.permute.xlu1 %484 }
 0x120   : >> { %1067 = vmatprep.subr.bf16.mxu1 %v483_v59  ;;  %743 = vmatprep.mubr.bf16.mxu0 %v949_v58 }
 0x121   : >> { %1068 = vmatpush3.bf16.msra.mxu1 %v483_v59 }
 0x122   : >> { %1069 = vmatprep.subr.bf16.mxu1 %v485_v60 }
 0x125   : >> { %1070 = vmatpush3.bf16.msra.mxu1 %v485_v60 }
 0x127   : >> { %744 = vmatmul.mubr.bf16.gmra.mrb[12].mxu0 %v948_v61 }
 0x128   : >> { %1072 = vmatmul.mubr.msk.bf16.vlgmr.msra.gmra.mrb[8].mxu1 %vm598_vm0, %v950_v62 }
 0x130   : >> { %v516_v24 = vpop.permute.xlu1 %515 }
 0x131   : >> { %v511_v34 = vpop.permute.xlu0 %510 }
 0x134   : >> { %v521_v42 = vpop.permute.xlu1 %520 }
 0x135   : >> { %v526_v44 = vpop.permute.xlu0 %525 }
 0x19f   : >> { %v983_v63 = vpop.f32.mrb[0].mxu0 }
 0x1a0   : >> { %v984_v20 = vpop.f32.mrb[1].mxu0 }
 0x1a1   : >> { %v985_v21 = vadd.f32 %v984_v20, %v983_v63  ;;  %v986_v22 = vpop.f32.mrb[2].mxu0 }
 0x1a2   : >> { %v987_v25 = vpop.f32.mrb[3].mxu0 }
 0x1a3   : >> { %v988_v26 = vadd.f32 %v987_v25, %v986_v22  ;;  %v640_v37 = vadd.f32 %v985_v21, %v511_v34 }
 0x1a5   : >> { %v643_v31 = vadd.f32 %v988_v26, %v516_v24 }
 0x1a7   : >> { %v989_v27 = vpop.f32.mrb[4].mxu0 }
 0x1a8   : >> { %v990_v28 = vpop.f32.mrb[5].mxu0 }
 0x1a9   : >> { %v991_v29 = vadd.f32 %v990_v28, %v989_v27  ;;  %v992_v32 = vpop.f32.mrb[6].mxu0 }
 0x1aa   : >> { %v993_v23 = vpop.f32.mrb[7].mxu0 }
 0x1ab   : >> { %v994_v33 = vadd.f32 %v993_v23, %v992_v32  ;;  %v648_v46 = vadd.f32 %v991_v29, %v521_v42 }
 0x1ad   : >> { %v651_v50 = vadd.f32 %v994_v33, %v526_v44 }
 0x1b0   : >> { %v1011_v35 = vpop.f32.mrb[0].mxu1 }
 0x1b1   : >> { %v1012_v30 = vpop.f32.mrb[1].mxu1 }
 0x1b2   : >> { %v1013_v39 = vadd.f32 %v1012_v30, %v1011_v35  ;;  %v1014_v40 = vpop.f32.mrb[2].mxu1 }
 0x1b3   : >> { %v1015_v36 = vpop.f32.mrb[3].mxu1 }
 0x1b4   : >> { %v1016_v41 = vadd.f32 %v1015_v36, %v1014_v40  ;;  %v689_v38 = vadd.f32 %v1013_v39, %v640_v37 }
 0x1b6   : >> { %v692_v43 = vadd.f32 %v1016_v41, %v643_v31 }
 0x1b8   : >> { %v1017_v45 = vpop.f32.mrb[4].mxu1 }
 0x1b9   : >> { %v1018_v47 = vpop.f32.mrb[5].mxu1 }
 0x1ba   : >> { %v1019_v48 = vadd.f32 %v1018_v47, %v1017_v45  ;;  %v1020_v49 = vpop.f32.mrb[6].mxu1 }
 0x1bb   : >> { %v1021_v51 = vpop.f32.mrb[7].mxu1 }
 0x1bc   : >> { %v697_v52 = vadd.f32 %v1019_v48, %v648_v46  ;;  %v1022_v53 = vadd.f32 %v1021_v51, %v1020_v49 }
 0x1be   : >> { %v700_v54 = vadd.f32 %v1022_v53, %v651_v50 }
 0x1f2   : >> { %v1039_v55 = vpop.f32.mrb[8].mxu0 }
 0x1f3   : >> { %v1040_v56 = vpop.f32.mrb[9].mxu0 }
 0x1f4   : >> { %v1041_v57 = vadd.f32 %v1040_v56, %v1039_v55  ;;  %v1042_v58 = vpop.f32.mrb[10].mxu0 }
 0x1f5   : >> { %v1043_v59 = vpop.f32.mrb[11].mxu0 }
 0x1f6   : >> { %v1044_v60 = vadd.f32 %v1043_v59, %v1042_v58  ;;  %v738_v61 = vadd.f32 %v1041_v57, %v689_v38 }
 0x1f8   : >> { %v741_v62 = vadd.f32 %v1044_v60, %v692_v43 }
 0x1fa   : >> { %v1045_v63 = vpop.f32.mrb[12].mxu0 }
 0x1fb   : >> { %v1046_v20 = vpop.f32.mrb[13].mxu0  ;;  %v1073_v21 = vpop.f32.mrb[8].mxu1 }
 0x1fc   : >> { %v1047_v22 = vadd.f32 %v1046_v20, %v1045_v63  ;;  %v1048_v25 = vpop.f32.mrb[14].mxu0  ;;  %v786_v26 = vpop.f32.mrb[9].mxu1 }
 0x1fd   : >> { %v787_v27 = vadd.f32 %v786_v26, %v738_v61  ;;  %v1049_v28 = vpop.f32.mrb[15].mxu0  ;;  %v1074_v29 = vpop.f32.mrb[10].mxu1 }
 0x1fe   : >> { %v746_v32 = vadd.f32 %v1047_v22, %v697_v52  ;;  %v1050_v23 = vadd.f32 %v1049_v28, %v1048_v25  ;;  %v789_v33 = vpop.f32.mrb[11].mxu1 }
 0x1ff   : >> { %vm801_vm1 = vcmp.ge.f32.partialorder %v787_v27, 0.0  ;;  %v805_v34 = vmul.f32 0.1, %v787_v27  ;;  %v790_v24 = vadd.f32 %v789_v33, %v741_v62 }
 0x200   : >> { %v795_v35 = vadd.f32 %v1073_v21, %v746_v32  ;;  %v749_v37 = vadd.f32 %v1050_v23, %v700_v54 }
 0x201   : >> { %v809_v30 = vsel %vm801_vm1, %v787_v27, %v805_v34  ;;  %vm802_vm3 = vcmp.ge.f32.partialorder %v790_v24, 0.0  ;;  %v806_v39 = vmul.f32 0.1, %v790_v24 }
 0x202   : >> { %vm803_vm4 = vcmp.ge.f32.partialorder %v795_v35, 0.0  ;;  %v807_v40 = vmul.f32 0.1, %v795_v35  ;;  %v962_v31 = vpack.c.bf16 %v809_v30, %v809_v30  ;;  %v798_v36 = vadd.f32 %v1074_v29, %v749_v37 }
 0x203   : >> { %v810_v41 = vsel %vm802_vm3, %v790_v24, %v806_v39  ;;  %243 = sbr.rel (!%p241_p4) target bundleno = 18 (0x12), region = 79 }
 0x204   : >> { %v811_v38 = vsel %vm803_vm4, %v795_v35, %v807_v40  ;;  %832 = vst.msk [vmem:[%s830_s30] sm:$0xf] %vm831_vm2, %v962_v31  ;;  %vm804_vm5 = vcmp.ge.f32.partialorder %v798_v36, 0.0  ;;  %v808_v42 = vmul.f32 0.1, %v798_v36  ;;  %v963_v43 = vpack.c.bf16 %v810_v41, %v810_v41 }
 0x205   : >> { %v964_v44 = vpack.c.bf16 %v811_v38, %v811_v38 }
 0x206   : >> { %v812_v45 = vsel %vm804_vm5, %v798_v36, %v808_v42  ;;  %833 = vst.msk [vmem:[%s830_s30 + $0x4] sm:$0xf] %vm831_vm2, %v963_v43 }
 0x207   : >> { %834 = vst.msk [vmem:[%s830_s30 + $0x8] sm:$0xf] %vm831_vm2, %v964_v44  ;;  %v965_v46 = vpack.c.bf16 %v812_v45, %v812_v45 }
 0x209   : >> { %835 = vst.msk [vmem:[%s830_s30 + $0xc] sm:$0xf] %vm831_vm2, %v965_v46 }
 0x20a PF: > { %s14_s15 = sadd.s32 1, %s1125_s15  }
 0x20b   : > { %p11_p5 = scmp.ge.s32.totalorder %s14_s15, 4  }
 0x20d   :  { %13 = sbr.rel (!%p11_p5) target bundleno = 1 (0x1), region = 90 }

// kernel: _lambda_.12
= control target key start
LH: loop header
LB: loop body
LE: loop exit
PB: predicated region body
PF: predicated region fallthrough
CT: control target
= control target key end

     0   :  { %s675_s12 = smov 0   ;;  %s798_s0 = inlined_call_operand.vmem [shape: bf16[32,288], index: 0, kind: input, shape index: {}]   ;;  %s799_s1 = inlined_call_operand.vmem [shape: f32[32,1], index: 1, kind: input, shape index: {}]   ;;  %s800_s2 = inlined_call_operand.vmem [shape: bf16[2,67,32,4], index: 2, kind: input, shape index: {}]   ;;  %s801_s3 = inlined_call_operand.vmem [shape: bf16[2,65,32,2], index: 3, kind: output, shape index: {}]  }
   0x1 LB: > { %s531_s13 = sadd.s32 4294967295, %s646_s12   ;;  %p535_p0 = scmp.ge.s32.totalorder %s646_s12, 1  ;;  %s646_s12 = sphi %s675_s12, %s13_s12  }
   0x2   : > { %p137_p1 = scmp.lt.s32.totalorder %s646_s12, 3 }
   0x4   : > { %p138_p2 = pnand %p535_p0, %p137_p1 }
   0x5   : > { %p161_p3 = scmp.lt.s32.totalorder (!%p138_p2), %s531_s13, 1  ;;  %v686_v0 = vld [vmem:[%s798_s0] sm:$0xff] (!%p138_p2)  ;;  %v691_v1 = vld [vmem:[%s798_s0 + $0x8] sm:$0xf] (!%p138_p2)  ;;  %v696_v2 = vld [vmem:[%s798_s0 + $0xc] sm:$0xff] (!%p138_p2)  ;;  %s753_s21 = smov (!%p138_p2), 0  }
   0x6   : > { %141 = sbr.rel (%p138_p2) target bundleno = 403 (0x193), region = 32  ;;  %v701_v3 = vld [vmem:[%s798_s0 + $0x14] sm:$0xf] (!%p138_p2)  ;;  %v706_v4 = vld [vmem:[%s798_s0 + $0x18] sm:$0xff] (!%p138_p2)  ;;  %v711_v5 = vld [vmem:[%s798_s0 + $0x20] sm:$0xf] (!%p138_p2) }
   0x7   : > { %v716_v6 = vld [vmem:[%s798_s0 + $0x24] sm:$0xff] (!%p138_p2)  ;;  %v721_v7 = vld [vmem:[%s798_s0 + $0x2c] sm:$0xf] (!%p138_p2)  ;;  %v736_v10 = vld [vmem:[%s799_s1 + $0x10] sm:$0xff] (!%p138_p2) }
   0x8   : > { %v726_v8 = vld [vmem:[%s799_s1] sm:$0xff] (!%p138_p2)  ;;  %v731_v9 = vld [vmem:[%s799_s1 + $0x8] sm:$0xff] (!%p138_p2)  ;;  %v741_v11 = vld [vmem:[%s799_s1 + $0x18] sm:$0xff] (!%p138_p2) }
   0xd   : > { %s803_s13 = smov (!%p161_p3, %s531_s13), 1 }
   0xe   : > { %s607_s11 = smul.u32 1072, %s803_s13 }
   0xf   : > { %s608_s14 = smul.u32 1040, %s803_s13 }
  0x10   : > { %s746_s17 = scalar_lea.vmem %s800_s2, %s607_s11 }
  0x11   : > { %s751_s20 = scalar_lea.vmem %s801_s3, %s608_s14 }
  0x12 LB: >> { %s561_s13 = sshll.u32 %s650_s21, 4  ;;  %s652_s23 = smov 127   ;;  %v547_v18 = vcombine.high %v686_v0, %v696_v2  ;;  %v548_v19 = vcombine.low %v691_v1, %v701_v3  ;;  %vm327_vm0 = vcmask 261120   ;;  %v654_v20 = vmov 0   ;;  %s650_s21 = sphi %s753_s21, %s189_s21  }
  0x13   : >> { %s192_s22 = scalar_lea.vmem %s746_s17, %s561_s13  ;;  %s653_s24 = smov 126   ;;  %628 = vset.pattern.permute.xlu0 %v654_v20  ;;  %629 = vset.pattern.permute.xlu1 %v654_v20  ;;  %v551_v33 = vcombine.low %v711_v5, %v721_v7  ;;  %v546_v34 = vcombine.low %v686_v0, %v696_v2  ;;  %v550_v35 = vcombine.high %v706_v4, %v716_v6  ;;  %vm462_vm2 = vcmask 11264  }
  0x14   : >> { %v630_v12 = vld [vmem:[%s192_s22 + $0x10] sm:$0xff]   ;;  %v762_v13 = vld [vmem:[%s192_s22 + $0x18] sm:$0xff]   ;;  %v632_v14 = vld [vmem:[%s192_s22] sm:$0xff]   ;;  %366 = vmatprep.mubr.bf16.mxu0 %v547_v18  ;;  %603 = vmatprep.mubr.msk.bf16.mxu1 %vm327_vm0, %v548_v19  ;;  %v549_v36 = vcombine.low %v706_v4, %v716_v6  ;;  %s461_s25 = scalar_lea.vmem %s751_s20, %s561_s13  ;;  %s189_s21 = sadd.s32 1, %s650_s21  }
  0x15   : >> { %241 = vrot.lane.b32.xlu0 %v630_v12, %s652_s23  ;;  %247 = vrot.lane.b32.xlu1 %v630_v12, %s653_s24  ;;  %v633_v15 = vld [vmem:[%s192_s22 + $0x8] sm:$0xff]   ;;  %v634_v16 = vld [vmem:[%s192_s22 + $0x20] sm:$0xff]   ;;  %p186_p4 = scmp.ge.s32.totalorder %s189_s21, 65  }
  0x16   : >> { %v635_v17 = vld [vmem:[%s192_s22 + $0x28] sm:$0xff]  }
  0x19   : >> { %243 = vrot.lane.b32.xlu0 %v762_v13, %s652_s23  ;;  %217 = vrot.lane.b32.xlu1 %v632_v14, %s652_s23 }
  0x1d   : >> { %249 = vrot.lane.b32.xlu0 %v762_v13, %s653_s24  ;;  %219 = vrot.lane.b32.xlu1 %v633_v15, %s652_s23 }
  0x21   : >> { %223 = vrot.lane.b32.xlu0 %v632_v14, %s653_s24  ;;  %225 = vrot.lane.b32.xlu1 %v633_v15, %s653_s24 }
  0x25   : >> { %265 = vrot.lane.b32.xlu0 %v634_v16, %s652_s23  ;;  %267 = vrot.lane.b32.xlu1 %v635_v17, %s652_s23 }
  0x29   : >> { %271 = vrot.lane.b32.xlu0 %v634_v16, %s653_s24  ;;  %273 = vrot.lane.b32.xlu1 %v635_v17, %s653_s24 }
  0x2d   : >> { %279 = vperm.xlu0 %628, %v726_v8   ;;  %284 = vperm.xlu1 %629, %v731_v9  }
  0x31   : >> { %294 = vperm.xlu0 %628, %v741_v11   ;;  %289 = vperm.xlu1 %629, %v736_v10  }
  0x87   : >> { %v242_v21 = vpop.permute.xlu0 %241  ;;  %v248_v22 = vpop.permute.xlu1 %247 }
  0x88   : >> { %567 = vmatprep.subr.bf16.mxu0 %v242_v21 }
  0x89   : >> { %568 = vmatpush3.bf16.msra.mxu0 %v632_v14 }
  0x8b   : >> { %v244_v23 = vpop.permute.xlu0 %243  ;;  %v218_v24 = vpop.permute.xlu1 %217 }
  0x8c   : >> { %569 = vmatprep.subr.bf16.mxu0 %v244_v23 }
  0x8d   : >> { %570 = vmatpush3.bf16.msra.mxu0 %v633_v15 }
  0x8e   : >> { %571 = vmatprep.subr.bf16.mxu0 %v248_v22 }
  0x8f   : >> { %v250_v25 = vpop.permute.xlu0 %249  ;;  %v220_v26 = vpop.permute.xlu1 %219 }
  0x91   : >> { %572 = vmatpush3.bf16.msra.mxu0 %v218_v24 }
  0x92   : >> { %573 = vmatprep.subr.bf16.mxu0 %v250_v25 }
  0x93   : >> { %v224_v27 = vpop.permute.xlu0 %223  ;;  %v226_v28 = vpop.permute.xlu1 %225 }
  0x95   : >> { %574 = vmatpush3.bf16.msra.mxu0 %v220_v26 }
  0x96   : >> { %575 = vmatprep.subr.bf16.mxu0 %v634_v16 }
  0x97   : >> { %v266_v29 = vpop.permute.xlu0 %265  ;;  %v268_v30 = vpop.permute.xlu1 %267 }
  0x99   : >> { %576 = vmatpush3.bf16.msra.mxu0 %v224_v27 }
  0x9a   : >> { %577 = vmatprep.subr.bf16.mxu0 %v635_v17 }
  0x9b   : >> { %v272_v31 = vpop.permute.xlu0 %271  ;;  %v274_v32 = vpop.permute.xlu1 %273 }
  0x9c   : >> { %599 = vmatprep.subr.bf16.mxu1 %v272_v31 }
  0x9d   : >> { %578 = vmatpush3.bf16.msra.mxu0 %v226_v28  ;;  %600 = vmatpush3.bf16.msra.mxu1 %v272_v31 }
  0x9e   : >> { %579 = vmatprep.subr.bf16.mxu0 %v266_v29  ;;  %601 = vmatprep.subr.bf16.mxu1 %v274_v32 }
  0xa1   : >> { %580 = vmatpush3.bf16.msra.mxu0 %v630_v12  ;;  %602 = vmatpush3.bf16.msra.mxu1 %v274_v32 }
  0xa2   : >> { %581 = vmatprep.subr.bf16.mxu0 %v268_v30 }
  0xa4   : >> { %604 = vmatmul.mubr.msk.bf16.vlgmr.msra.gmra.mrb[0].mxu1 %vm327_vm0, %v551_v33 }
  0xa5   : >> { %582 = vmatpush3.bf16.msra.mxu0 %v762_v13 }
  0xa8   : >> { %367 = vmatmul.mubr.bf16.vlgmr.msra.gmra.mrb[0].mxu0 %v546_v34 }
  0xa9   : >> { %374 = vmatprep.mubr.bf16.mxu0 %v550_v35 }
  0xac   : >> { %v280_v43 = vpop.permute.xlu0 %279  ;;  %v285_v47 = vpop.permute.xlu1 %284 }
  0xb0   : >> { %375 = vmatmul.mubr.bf16.gmra.mrb[4].mxu0 %v549_v36  ;;  %v290_v61 = vpop.permute.xlu1 %289  ;;  %v295_v15 = vpop.permute.xlu0 %294 }
 0x177   : >> { %v605_v37 = vpop.f32.mrb[0].mxu1 }
 0x178   : >> { %v417_v38 = vpop.f32.mrb[1].mxu1 }
 0x179   : >> { %v606_v39 = vpop.f32.mrb[2].mxu1 }
 0x17a   : >> { %v420_v40 = vpop.f32.mrb[3].mxu1 }
 0x17b   : >> { %v583_v41 = vpop.f32.mrb[0].mxu0 }
 0x17c   : >> { %v584_v42 = vpop.f32.mrb[1].mxu0 }
 0x17d   : >> { %v585_v44 = vadd.f32 %v584_v42, %v583_v41  ;;  %v586_v45 = vpop.f32.mrb[2].mxu0 }
 0x17e   : >> { %v587_v46 = vpop.f32.mrb[3].mxu0 }
 0x17f   : >> { %v369_v48 = vadd.f32 %v585_v44, %v280_v43  ;;  %v588_v49 = vadd.f32 %v587_v46, %v586_v45 }
 0x181   : >> { %v418_v50 = vadd.f32 %v417_v38, %v369_v48  ;;  %v372_v51 = vadd.f32 %v588_v49, %v285_v47 }
 0x183   : >> { %vm432_vm1 = vcmp.ge.f32.partialorder %v418_v50, 0.0  ;;  %v436_v52 = vmul.f32 0.1, %v418_v50  ;;  %v421_v53 = vadd.f32 %v420_v40, %v372_v51  ;;  %v589_v54 = vpop.f32.mrb[4].mxu0 }
 0x184   : >> { %v590_v55 = vpop.f32.mrb[5].mxu0 }
 0x185   : >> { %v440_v56 = vsel %vm432_vm1, %v418_v50, %v436_v52  ;;  %vm433_vm3 = vcmp.ge.f32.partialorder %v421_v53, 0.0  ;;  %v437_v57 = vmul.f32 0.1, %v421_v53  ;;  %v591_v58 = vadd.f32 %v590_v55, %v589_v54  ;;  %v592_v59 = vpop.f32.mrb[6].mxu0 }
 0x186   : >> { %v562_v60 = vpack.c.bf16 %v440_v56, %v440_v56  ;;  %v593_v62 = vpop.f32.mrb[7].mxu0 }
 0x187   : >> { %v441_v63 = vsel %vm433_vm3, %v421_v53, %v437_v57  ;;  %v377_v12 = vadd.f32 %v591_v58, %v290_v61  ;;  %v594_v13 = vadd.f32 %v593_v62, %v592_v59 }
 0x188   : >> { %463 = vst.msk [vmem:[%s461_s25] sm:$0xf] %vm462_vm2, %v562_v60  ;;  %v563_v14 = vpack.c.bf16 %v441_v63, %v441_v63 }
 0x189   : >> { %v426_v16 = vadd.f32 %v605_v37, %v377_v12  ;;  %v380_v17 = vadd.f32 %v594_v13, %v295_v15 }
 0x18a   : >> { %464 = vst.msk [vmem:[%s461_s25 + $0x4] sm:$0xf] %vm462_vm2, %v563_v14 }
 0x18b   : >> { %vm434_vm4 = vcmp.ge.f32.partialorder %v426_v16, 0.0  ;;  %v438_v18 = vmul.f32 0.1, %v426_v16  ;;  %v429_v19 = vadd.f32 %v606_v39, %v380_v17 }
 0x18c   : > { %188 = sbr.rel (!%p186_p4) target bundleno = 18 (0x12), region = 71 }
 0x18d   : >> { %v442_v20 = vsel %vm434_vm4, %v426_v16, %v438_v18  ;;  %vm435_vm5 = vcmp.ge.f32.partialorder %v429_v19, 0.0  ;;  %v439_v21 = vmul.f32 0.1, %v429_v19 }
 0x18e   : >> { %v564_v22 = vpack.c.bf16 %v442_v20, %v442_v20 }
 0x18f   : >> { %v443_v23 = vsel %vm435_vm5, %v429_v19, %v439_v21 }
 0x190   : >> { %465 = vst.msk [vmem:[%s461_s25 + $0x8] sm:$0xf] %vm462_vm2, %v564_v22  ;;  %v565_v24 = vpack.c.bf16 %v443_v23, %v443_v23 }
 0x192   : >> { %466 = vst.msk [vmem:[%s461_s25 + $0xc] sm:$0xf] %vm462_vm2, %v565_v24 }
 0x193 PF: > { %s13_s12 = sadd.s32 1, %s646_s12  }
 0x194   : > { %p10_p5 = scmp.ge.s32.totalorder %s13_s12, 4  }
 0x196   :  { %12 = sbr.rel (!%p10_p5) target bundleno = 1 (0x1), region = 82 }

// kernel: _lambda_.13
= control target key start
LH: loop header
LB: loop body
LE: loop exit
PB: predicated region body
PF: predicated region fallthrough
CT: control target
= control target key end

     0   :  { %s578_s14 = smov 0   ;;  %s632_s0 = inlined_call_operand.vmem [shape: bf16[1,288], index: 0, kind: input, shape index: {}]   ;;  %s633_s1 = inlined_call_operand.<no memory space> [shape: f32[1,1], index: 1, kind: input, shape index: {}]   ;;  %s634_s2 = inlined_call_operand.vmem [shape: bf16[2,67,32,4], index: 2, kind: input, shape index: {}]   ;;  %s635_s3 = inlined_call_operand.vmem [shape: f32[2,65,1,2], index: 3, kind: output, shape index: {}]  }
   0x1   :  { %v8_v0 = vstv %s633_s1 }
   0x2   :  { %9 = vst [vmem:[#allocation2] sm:$0x1] %v8_v0 }
   0x3 LB: > { %s450_s15 = sadd.s32 4294967295, %s543_s14   ;;  %p454_p0 = scmp.ge.s32.totalorder %s543_s14, 1  ;;  %s543_s14 = sphi %s578_s14, %s15_s14  }
   0x4   : > { %p139_p1 = scmp.lt.s32.totalorder %s543_s14, 3 }
   0x6   : > { %p140_p2 = pnand %p454_p0, %p139_p1 }
   0x7   : > { %p162_p3 = scmp.lt.s32.totalorder (!%p140_p2), %s450_s15, 1  ;;  %v589_v1 = vld.sshfl [vmem:[%s632_s0] sm:$0x13 pattern:$0x75316420] (!%p140_p2)  ;;  %s603_s25 = smov (!%p140_p2), 0  }
   0x8   : > { %143 = sbr.rel (%p140_p2) target bundleno = 390 (0x186), region = 32 }
   0x9   : > { %v591_v2 = vld [vmem:[#allocation2] sm:$0x1] (!%p140_p2) }
   0xf   : > { %s637_s15 = smov (!%p162_p3, %s450_s15), 1 }
  0x10   : > { %s502_s1 = smul.u32 1072, %s637_s15 }
  0x11   : > { %s503_s18 = smul.u32 65, %s637_s15 }
  0x12   : > { %s596_s21 = scalar_lea.vmem %s634_s2, %s502_s1 }
  0x13   : > { %s601_s24 = scalar_lea.vmem %s635_s3, %s503_s18 }
  0x14 LB: >> { %s468_s26 = sshll.u32 %s547_s25, 4  ;;  %s549_s28 = smov 127   ;;  %v272_v7 = vlaneseq  ;;  %v551_v8 = vmov 1966171168   ;;  %v552_v14 = vmov 0.0   ;;  %v284_v15 = vcombine.high %v589_v1, %v589_v1  ;;  %s547_s25 = sphi %s603_s25, %s179_s25  }
  0x15   : >> { %s182_s27 = scalar_lea.vmem %s596_s21, %s468_s26  ;;  %s550_s29 = smov 126   ;;  %v286_v9 = vunpack.c.l.s4 %v551_v8  ;;  %494 = vmatprep.subr.bf16.mxu1 %v552_v14  ;;  %vm553_vm0 = vmmov 0   ;;  %v554_v18 = vmov 0   ;;  %vm302_vm1 = vcmask 261120  }
  0x16   : >> { %v610_v3 = vld [vmem:[%s182_s27 + $0x10] sm:$0xff]   ;;  %v612_v4 = vld [vmem:[%s182_s27 + $0x18] sm:$0xff]   ;;  %v529_v5 = vld [vmem:[%s182_s27] sm:$0xff]   ;;  %v273_v12 = vshrl.u32 %v272_v7, 7  ;;  %498 = vmatprep.mubr.msk.bf16.mxu1 %vm553_vm0, %v552_v14  ;;  %526 = vset.pattern.permute.xlu0 %v554_v18  ;;  %s386_s30 = scalar_lea.vmem %s601_s24, %s547_s25  ;;  %vm387_vm2 = vcmask 8192   ;;  %s179_s25 = sadd.s32 1, %s547_s25  }
  0x17   : >> { %231 = vrot.lane.b32.xlu0 %v610_v3, %s549_s28  ;;  %237 = vrot.lane.b32.xlu1 %v610_v3, %s550_s29  ;;  %v530_v6 = vld [vmem:[%s182_s27 + $0x8] sm:$0xff]   ;;  %v531_v10 = vld [vmem:[%s182_s27 + $0x20] sm:$0xff]   ;;  %v287_v13 = vunpack.c.0.s8 %v286_v9  ;;  %p176_p4 = scmp.ge.s32.totalorder %s179_s25, 65  }
  0x18   : >> { %v532_v11 = vld [vmem:[%s182_s27 + $0x28] sm:$0xff]   ;;  %v274_v34 = vsub.s32 0, %v273_v12 }
  0x19   : >> { %v290_v16 = vsub.s32 %v287_v13, %v273_v12 }
  0x1b   : >> { %233 = vrot.lane.b32.xlu0 %v612_v4, %s549_s28  ;;  %207 = vrot.lane.b32.xlu1 %v529_v5, %s549_s28  ;;  %v298_v17 = vrot.slane %v284_v15, %v290_v16  ;;  %v291_v30 = vrot.slane %v589_v1, %v290_v16 }
  0x1d   : >> { %338 = vmatprep.mubr.bf16.mxu0 %v298_v17  ;;  %v299_v32 = vcombine.high %v291_v30, %v291_v30 }
  0x1f   : >> { %239 = vrot.lane.b32.xlu0 %v612_v4, %s550_s29  ;;  %209 = vrot.lane.b32.xlu1 %v530_v6, %s549_s28 }
  0x23   : >> { %213 = vrot.lane.b32.xlu0 %v529_v5, %s550_s29  ;;  %215 = vrot.lane.b32.xlu1 %v530_v6, %s550_s29 }
  0x27   : >> { %255 = vrot.lane.b32.xlu0 %v531_v10, %s549_s28  ;;  %257 = vrot.lane.b32.xlu1 %v532_v11, %s549_s28 }
  0x2b   : >> { %261 = vrot.lane.b32.xlu0 %v531_v10, %s550_s29  ;;  %263 = vrot.lane.b32.xlu1 %v532_v11, %s550_s29 }
  0x2f   : >> { %269 = vperm.xlu0 %526, %v591_v2  }
  0x89   : >> { %v232_v19 = vpop.permute.xlu0 %231  ;;  %v238_v20 = vpop.permute.xlu1 %237 }
  0x8a   : >> { %469 = vmatprep.subr.bf16.mxu0 %v232_v19 }
  0x8b   : >> { %470 = vmatpush3.bf16.msra.mxu0 %v529_v5 }
  0x8d   : >> { %v234_v21 = vpop.permute.xlu0 %233  ;;  %v208_v22 = vpop.permute.xlu1 %207 }
  0x8e   : >> { %471 = vmatprep.subr.bf16.mxu0 %v234_v21 }
  0x8f   : >> { %472 = vmatpush3.bf16.msra.mxu0 %v530_v6 }
  0x90   : >> { %473 = vmatprep.subr.bf16.mxu0 %v238_v20 }
  0x91   : >> { %v240_v23 = vpop.permute.xlu0 %239  ;;  %v210_v24 = vpop.permute.xlu1 %209 }
  0x93   : >> { %474 = vmatpush3.bf16.msra.mxu0 %v208_v22 }
  0x94   : >> { %475 = vmatprep.subr.bf16.mxu0 %v240_v23 }
  0x95   : >> { %v214_v25 = vpop.permute.xlu0 %213  ;;  %v216_v26 = vpop.permute.xlu1 %215 }
  0x97   : >> { %476 = vmatpush3.bf16.msra.mxu0 %v210_v24 }
  0x98   : >> { %477 = vmatprep.subr.bf16.mxu0 %v531_v10 }
  0x99   : >> { %v256_v27 = vpop.permute.xlu0 %255  ;;  %v258_v28 = vpop.permute.xlu1 %257 }
  0x9b   : >> { %478 = vmatpush3.bf16.msra.mxu0 %v214_v25 }
  0x9c   : >> { %479 = vmatprep.subr.bf16.mxu0 %v532_v11 }
  0x9d   : >> { %v262_v29 = vpop.permute.xlu0 %261  ;;  %v264_v31 = vpop.permute.xlu1 %263 }
  0x9e   : >> { %495 = vmatpush3.bf16.msra.mxu1 %v262_v29 }
  0x9f   : >> { %480 = vmatpush3.bf16.msra.mxu0 %v216_v26  ;;  %496 = vmatprep.subr.bf16.mxu1 %v552_v14 }
  0xa0   : >> { %481 = vmatprep.subr.bf16.mxu0 %v256_v27 }
  0xa2   : >> { %497 = vmatpush3.bf16.msra.mxu1 %v264_v31 }
  0xa3   : >> { %482 = vmatpush3.bf16.msra.mxu0 %v610_v3 }
  0xa4   : >> { %483 = vmatprep.subr.bf16.mxu0 %v258_v28 }
  0xa5   : >> { %499 = vmatmul.mubr.msk.bf16.vlgmr.msra.gmra.mrb[0].mxu1 %vm302_vm1, %v299_v32 }
  0xa7   : >> { %484 = vmatpush3.bf16.msra.mxu0 %v612_v4 }
  0xaa   : >> { %339 = vmatmul.mubr.bf16.vlgmr.msra.gmra.mrb[0].mxu0 %v291_v30 }
  0xae   : >> { %v270_v36 = vpop.permute.xlu0 %269 }
  0xaf   : >> { %v275_v40 = vrot.slane %v270_v36, %v274_v34 }
 0x178   : >> { %v380_v33 = vpop.f32.mrb[0].mxu1 }
 0x179   : >> { %v500_v35 = vpop.f32.mrb[1].mxu1 }
 0x17a   : >> { %v383_v37 = vpop.f32.mrb[2].mxu1 }
 0x17b   : >> { %v501_v38 = vpop.f32.mrb[3].mxu1 }
 0x17d   : >> { %v485_v39 = vpop.f32.mrb[0].mxu0 }
 0x17e   : >> { %v486_v41 = vpop.f32.mrb[1].mxu0 }
 0x17f   : >> { %v487_v42 = vadd.f32 %v486_v41, %v485_v39  ;;  %v488_v43 = vpop.f32.mrb[2].mxu0  ;;  %178 = sbr.rel (!%p176_p4) target bundleno = 20 (0x14), region = 71 }
 0x180   : >> { %v489_v44 = vpop.f32.mrb[3].mxu0 }
 0x181   : >> { %v341_v45 = vadd.f32 %v487_v42, %v275_v40 }
 0x183   : >> { %v381_v46 = vadd.f32 %v380_v33, %v341_v45 }
 0x185   : >> { %388 = vst.msk [vmem:[%s386_s30] sm:$0x1] %vm387_vm2, %v381_v46 }
 0x186 PF: > { %s15_s14 = sadd.s32 1, %s543_s14  }
 0x187   : > { %p12_p5 = scmp.ge.s32.totalorder %s15_s14, 4  }
 0x189   :  { %14 = sbr.rel (!%p12_p5) target bundleno = 3 (0x3), region = 82 }

</bundles_post_ra>
